<compile_context>
chip_gen: v7x
topology: tpu7x:2x2x1
jax: 0.10.0
libtpu: 0.0.40
codegen_flags: <defaults>
</compile_context>

<pallas_src>
import functools

import jax
import jax.numpy as jnp
from jax.experimental import pallas as pl
from jax.experimental.pallas import tpu as pltpu

LATENT_DIM = 128


def _round_up(x, m):
    return ((x + m - 1) // m) * m


def _apply_act(x, activation):
    if activation == "relu":
        return jnp.maximum(x, 0.0)
    if activation == "sigmoid":
        return jax.nn.sigmoid(x)
    return x


# ---------------------------------------------------------------------------
# Pallas kernels
# ---------------------------------------------------------------------------
def _mm_bias_act_onepass_kernel(a_ref, b_ref, bias_ref, o_ref, *, activation):
    """Single-K-step matmul: o = act(a @ b + bias); no accumulator scratch."""
    acc = jnp.dot(a_ref[...], b_ref[...], preferred_element_type=jnp.float32)
    acc = _apply_act(acc + bias_ref[...], activation)
    o_ref[...] = acc.astype(o_ref.dtype)


def _mm_bias_act_kernel(a_ref, b_ref, bias_ref, o_ref, acc_ref, *, activation):
    """Multi-K-step matmul with f32 VMEM accumulator (kept for K > tk)."""
    k = pl.program_id(2)

    @pl.when(k == 0)
    def _():
        acc_ref[...] = jnp.zeros_like(acc_ref)

    acc_ref[...] += jnp.dot(a_ref[...], b_ref[...], preferred_element_type=jnp.float32)

    @pl.when(k == pl.num_programs(2) - 1)
    def _():
        acc = _apply_act(acc_ref[...] + bias_ref[...], activation)
        o_ref[...] = acc.astype(o_ref.dtype)


def matmul_bias_act(a, b, bias, activation="none", *, out_dtype=jnp.bfloat16,
                    tm_cap=512, tn_cap=512, tk_cap=1024):
    """out = act(a @ b + bias).  a:[M,K] (cast to bf16), b:[K,N] bf16 (pre-padded,
    lane-aligned K), bias:[1,N] f32.  f32 accumulation and epilogue, `out_dtype` result."""
    M, K = a.shape
    K2, N = b.shape
    assert K == K2 and bias.shape == (1, N)
    assert K % 128 == 0, "pre-pad K to a lane multiple (done in prepare_params / boundary)"

    # M tiling: 16-row multiples (bf16 sublane packing); split in two when large enough so
    # the leading 'parallel' grid axis can shard across both TensorCores on v7x.
    m16 = _round_up(M, 16)
    tm = min(tm_cap, m16)
    if m16 >= 128:
        tm = min(tm, _round_up(-(-m16 // 2), 16))
    MP = _round_up(M, tm)
    tn = N if N <= tn_cap else tn_cap
    assert N % tn == 0
    tk = K if K <= tk_cap else tk_cap
    assert K % tk == 0
    nk = K // tk

    a_p = a if a.dtype == jnp.bfloat16 else a.astype(jnp.bfloat16)
    if MP != M:
        a_p = jnp.pad(a_p, ((0, MP - M), (0, 0)))

    cost = pl.CostEstimate(
        flops=2 * MP * N * K,
        transcendentals=MP * N if activation == "sigmoid" else 0,
        bytes_accessed=2 * (MP * K + K * N) + 4 * MP * N)

    if nk == 1:
        out = pl.pallas_call(
            functools.partial(_mm_bias_act_onepass_kernel, activation=activation),
            out_shape=jax.ShapeDtypeStruct((MP, N), out_dtype),
            grid=(MP // tm, N // tn),
            in_specs=[
                pl.BlockSpec((tm, K), lambda i, j: (i, 0)),
                pl.BlockSpec((K, tn), lambda i, j: (0, j)),
                pl.BlockSpec((1, tn), lambda i, j: (0, j)),
            ],
            out_specs=pl.BlockSpec((tm, tn), lambda i, j: (i, j)),
            compiler_params=pltpu.CompilerParams(
                dimension_semantics=("parallel", "parallel")),
            cost_estimate=cost,
        )(a_p, b, bias)
    else:
        out = pl.pallas_call(
            functools.partial(_mm_bias_act_kernel, activation=activation),
            out_shape=jax.ShapeDtypeStruct((MP, N), out_dtype),
            grid=(MP // tm, N // tn, nk),
            in_specs=[
                pl.BlockSpec((tm, tk), lambda i, j, k: (i, k)),
                pl.BlockSpec((tk, tn), lambda i, j, k: (k, j)),
                pl.BlockSpec((1, tn), lambda i, j, k: (0, j)),
            ],
            out_specs=pl.BlockSpec((tm, tn), lambda i, j, k: (i, j)),
            scratch_shapes=[pltpu.VMEM((tm, tn), jnp.float32)],
            compiler_params=pltpu.CompilerParams(
                dimension_semantics=("parallel", "parallel", "arbitrary")),
            cost_estimate=cost,
        )(a_p, b, bias)
    if MP != M:
        out = out[:M]
    return out


def _head_kernel(a_ref, wh_ref, bh_ref, eps_ref, wd_ref, bd_ref, muvar_ref, d_ref):
    """Fused fc_mu||fc_logvar + reparameterization + fc_decode (z stays in VMEM)."""
    acc = jnp.dot(a_ref[...], wh_ref[...], preferred_element_type=jnp.float32)
    acc = acc + bh_ref[...]
    muvar_ref[...] = acc
    mu = acc[:, :LATENT_DIM]
    logvar = acc[:, LATENT_DIM:]
    z = mu + eps_ref[...] * jnp.exp(0.5 * logvar)
    d = jnp.dot(z.astype(jnp.bfloat16), wd_ref[...], preferred_element_type=jnp.float32)
    d_ref[...] = (d + bd_ref[...]).astype(d_ref.dtype)


def encode_decode_head(flat, w_head, b_head, eps, w_dec, b_dec):
    """flat:[B,2048] -> (mu, logvar, d) with d = fc_decode(mu + eps * exp(0.5*logvar))."""
    B, K = flat.shape
    L = LATENT_DIM
    N1 = w_head.shape[1]                       # 2L (mu || logvar)
    N2 = w_dec.shape[1]                        # 2048
    assert w_head.shape == (K, 2 * L) and w_dec.shape == (L, N2)
    MP = _round_up(B, 16)
    tm = MP

    a_p = flat if flat.dtype == jnp.bfloat16 else flat.astype(jnp.bfloat16)
    eps_p = eps.astype(jnp.float32)
    if MP != B:
        a_p = jnp.pad(a_p, ((0, MP - B), (0, 0)))
        eps_p = jnp.pad(eps_p, ((0, MP - B), (0, 0)))

    muvar, d = pl.pallas_call(
        _head_kernel,
        out_shape=(jax.ShapeDtypeStruct((MP, N1), jnp.float32),
                   jax.ShapeDtypeStruct((MP, N2), jnp.bfloat16)),
        grid=(MP // tm,),
        in_specs=[
            pl.BlockSpec((tm, K), lambda i: (i, 0)),
            pl.BlockSpec((K, N1), lambda i: (0, 0)),
            pl.BlockSpec((1, N1), lambda i: (0, 0)),
            pl.BlockSpec((tm, L), lambda i: (i, 0)),
            pl.BlockSpec((L, N2), lambda i: (0, 0)),
            pl.BlockSpec((1, N2), lambda i: (0, 0)),
        ],
        out_specs=(pl.BlockSpec((tm, N1), lambda i: (i, 0)),
                   pl.BlockSpec((tm, N2), lambda i: (i, 0))),
        compiler_params=pltpu.CompilerParams(dimension_semantics=("parallel",)),
    )(a_p, w_head, b_head, eps_p, w_dec, b_dec)
    mu = muvar[:B, :L]
    logvar = muvar[:B, L:]
    return mu, logvar, d[:B]


# ---------------------------------------------------------------------------
# Conv layers: channels-last im2col / phase-decomposition glue around the matmul kernel
# ---------------------------------------------------------------------------
def conv2d_s2k4p1(x, wmat, bias, activation, out_dtype=jnp.bfloat16):
    """Conv2d(k=4, s=2, p=1) on NHWC x.  wmat:[16*C, Cout], rows ordered (kh, kw, c)."""
    B, H, W, C = x.shape
    Ho, Wo = H // 2, W // 2
    Cout = wmat.shape[1]
    xp = jnp.pad(x, ((0, 0), (1, 1), (1, 1), (0, 0)))
    cols = [xp[:, kh:kh + 2 * Ho:2, kw:kw + 2 * Wo:2, :]
            for kh in range(4) for kw in range(4)]
    patches = jnp.concatenate(cols, axis=-1).reshape(B * Ho * Wo, 16 * C)
    out = matmul_bias_act(patches, wmat, bias, activation, out_dtype=out_dtype)
    return out.reshape(B, Ho, Wo, Cout)


def conv_transpose2d_s2k4p1(x, wmat, bvec, activation, out_dtype=jnp.bfloat16):
    """ConvTranspose2d(k=4, s=2, p=1) on NHWC x via sub-pixel phase decomposition.

    wmat:[4*Cin, 4*Cout], rows ordered (dh,dw,cin), cols (rh,rw,cout); bvec:[1, 4*Cout]."""
    B, H, W, Cin = x.shape
    Cout = wmat.shape[1] // 4
    xp = jnp.pad(x, ((0, 0), (1, 1), (1, 1), (0, 0)))
    cols = [xp[:, dh:dh + H + 1, dw:dw + W + 1, :] for dh in range(2) for dw in range(2)]
    patches = jnp.concatenate(cols, axis=-1).reshape(B * (H + 1) * (W + 1), 4 * Cin)
    out = matmul_bias_act(patches, wmat, bvec, activation, out_dtype=out_dtype)
    R = out.reshape(B, H + 1, W + 1, 4, Cout)
    # phase (rh, rw) at output (2p+rh, 2q+rw) comes from R[p+rh, q+rw, 2*rh+rw, :]
    phases = [R[:, rh:rh + H, rw:rw + W, 2 * rh + rw, :]
              for rh in range(2) for rw in range(2)]
    y = jnp.stack(phases, axis=3).reshape(B, H, W, 2, 2, Cout)
    return y.transpose(0, 1, 3, 2, 4, 5).reshape(B, 2 * H, 2 * W, Cout)


# ---------------------------------------------------------------------------
# Parameters: PyTorch-layout init + one-time prep into padded bf16 matmul layouts
# ---------------------------------------------------------------------------
def _uniform(key, shape, bound):
    return jax.random.uniform(key, shape, jnp.float32, -bound, bound)


def init_params(key):
    ks = jax.random.split(key, 24)
    p = {}
    enc_dims = [(3, 32), (32, 64), (64, 128)]
    for i, (cin, cout) in enumerate(enc_dims):
        bound = 1.0 / (cin * 16) ** 0.5
        p[f"enc{i}_w"] = _uniform(ks[2 * i], (cout, cin, 4, 4), bound)      # [Cout,Cin,4,4]
        p[f"enc{i}_b"] = _uniform(ks[2 * i + 1], (cout,), bound)
    bound = 1.0 / (128 * 4 * 4) ** 0.5
    p["fc_mu_w"] = _uniform(ks[6], (LATENT_DIM, 128 * 4 * 4), bound)
    p["fc_mu_b"] = _uniform(ks[7], (LATENT_DIM,), bound)
    p["fc_logvar_w"] = _uniform(ks[8], (LATENT_DIM, 128 * 4 * 4), bound)
    p["fc_logvar_b"] = _uniform(ks[9], (LATENT_DIM,), bound)
    bound = 1.0 / LATENT_DIM ** 0.5
    p["fc_decode_w"] = _uniform(ks[10], (128 * 4 * 4, LATENT_DIM), bound)
    p["fc_decode_b"] = _uniform(ks[11], (128 * 4 * 4,), bound)
    dec_dims = [(128, 64), (64, 32), (32, 3)]
    for i, (cin, cout) in enumerate(dec_dims):
        bound = 1.0 / (cin * 16) ** 0.5
        p[f"dec{i}_w"] = _uniform(ks[12 + 2 * i], (cin, cout, 4, 4), bound)  # [Cin,Cout,4,4]
        p[f"dec{i}_b"] = _uniform(ks[13 + 2 * i], (cout,), bound)
    return p


def _conv_wmat(w_torch, cin_pad=None):
    """Conv2d weight [Cout,Cin,4,4] -> bf16 [16*Cin(_pad), Cout], rows ordered (kh,kw,cin)."""
    cout, cin = w_torch.shape[0], w_torch.shape[1]
    w = w_torch.transpose(2, 3, 1, 0)                       # [4,4,Cin,Cout]
    if cin_pad is not None and cin_pad > cin:
        w = jnp.pad(w, ((0, 0), (0, 0), (0, cin_pad - cin), (0, 0)))
        cin = cin_pad
    return w.reshape(16 * cin, cout).astype(jnp.bfloat16)


def _convt_wmat(w_torch):
    """ConvTranspose2d weight [Cin,Cout,4,4] -> bf16 [4*Cin, 4*Cout]:
       wmat[(dh,dw,cin), (rh,rw,cout)] = W[cin, cout, 3-rh-2*dh, 3-rw-2*dw]."""
    rows = []
    for dh in range(2):
        for dw in range(2):
            cols_ = [w_torch[:, :, 3 - rh - 2 * dh, 3 - rw - 2 * dw]
                     for rh in range(2) for rw in range(2)]
            rows.append(jnp.concatenate(cols_, axis=1))
    return jnp.concatenate(rows, axis=0).astype(jnp.bfloat16)


def _bias_row(b):
    return b.astype(jnp.float32).reshape(1, -1)


def prepare_params(p):
    """One-time conversion of PyTorch-layout params to padded, bf16, matmul-ready layouts."""
    L = LATENT_DIM
    q = {}
    q["enc0_wmat"] = _conv_wmat(p["enc0_w"], cin_pad=8)     # K = 16*8 = 128 (image padded 3->8)
    q["enc0_b"] = _bias_row(p["enc0_b"])
    q["enc1_wmat"] = _conv_wmat(p["enc1_w"])                # [512, 64]
    q["enc1_b"] = _bias_row(p["enc1_b"])
    q["enc2_wmat"] = _conv_wmat(p["enc2_w"])                # [1024, 128]
    q["enc2_b"] = _bias_row(p["enc2_b"])

    def enc_fc_perm(w):  # [L, 2048] (torch (c,h,w) cols) -> [2048, L] ((h,w,c) rows, NHWC)
        return w.reshape(L, 128, 4, 4).transpose(2, 3, 1, 0).reshape(2048, L)

    q["head_w"] = jnp.concatenate(
        [enc_fc_perm(p["fc_mu_w"]), enc_fc_perm(p["fc_logvar_w"])],
        axis=1).astype(jnp.bfloat16)                        # [2048, 2L]  (mu || logvar)
    q["head_b"] = _bias_row(jnp.concatenate([p["fc_mu_b"], p["fc_logvar_b"]]))

    # fc_decode: pre-transposed [L, 2048] with output cols permuted (c,h,w) -> (h,w,c)
    q["dec_fc_w"] = (p["fc_decode_w"].reshape(128, 4, 4, L)
                     .transpose(1, 2, 0, 3).reshape(2048, L).T).astype(jnp.bfloat16)
    q["dec_fc_b"] = _bias_row(
        p["fc_decode_b"].reshape(128, 4, 4).transpose(1, 2, 0).reshape(2048))

    for i in range(3):
        q[f"dec{i}_wmat"] = _convt_wmat(p[f"dec{i}_w"])     # [4*Cin, 4*Cout]
        q[f"dec{i}_bvec"] = _bias_row(jnp.tile(p[f"dec{i}_b"], 4))
    return q


# ---------------------------------------------------------------------------
# Forward pass (external interface NCHW, matching PyTorch; NHWC/bf16 internally)
# ---------------------------------------------------------------------------
def cvae_forward(params, x_nchw, eps):
    x = x_nchw.transpose(0, 2, 3, 1).astype(jnp.bfloat16)             # NHWC, bf16
    x = jnp.pad(x, ((0, 0), (0, 0), (0, 0), (0, 5)))                  # C: 3 -> 8  (K = 128)
    h = conv2d_s2k4p1(x, params["enc0_wmat"], params["enc0_b"], "relu")        # [B,16,16,32]
    h = conv2d_s2k4p1(h, params["enc1_wmat"], params["enc1_b"], "relu")        # [B,8,8,64]
    h = conv2d_s2k4p1(h, params["enc2_wmat"], params["enc2_b"], "relu")        # [B,4,4,128]
    B = h.shape[0]
    flat = h.reshape(B, 4 * 4 * 128)                                           # NHWC flatten
    mu, logvar, d = encode_decode_head(
        flat, params["head_w"], params["head_b"], eps,
        params["dec_fc_w"], params["dec_fc_b"])                                # d:[B,2048]
    d = d.reshape(B, 4, 4, 128)
    d = conv_transpose2d_s2k4p1(d, params["dec0_wmat"], params["dec0_bvec"], "relu")   # 8x8x64
    d = conv_transpose2d_s2k4p1(d, params["dec1_wmat"], params["dec1_bvec"], "relu")   # 16x16x32
    x_rec = conv_transpose2d_s2k4p1(d, params["dec2_wmat"], params["dec2_bvec"],
                                    "sigmoid", out_dtype=jnp.float32)                  # 32x32x3
    return x_rec.transpose(0, 3, 1, 2), mu, logvar


# ---------------------------------------------------------------------------
# Plain-JAX f32 references (for value-level validation only)
# ---------------------------------------------------------------------------
def _conv_ref_nhwc(x, w_torch, b):
    k = w_torch.transpose(2, 3, 1, 0)                       # HWIO
    y = jax.lax.conv_general_dilated(
        x.astype(jnp.float32), k.astype(jnp.float32), window_strides=(2, 2),
        padding=((1, 1), (1, 1)), dimension_numbers=("NHWC", "HWIO", "NHWC"),
        precision=jax.lax.Precision.HIGHEST)
    return y + b


def _convt_ref_nhwc(x, w_torch, b):
    k = w_torch.transpose(2, 3, 0, 1)[::-1, ::-1]           # HWIO, spatially flipped
    y = jax.lax.conv_general_dilated(
        x.astype(jnp.float32), k.astype(jnp.float32), window_strides=(1, 1),
        padding=((2, 2), (2, 2)), lhs_dilation=(2, 2),
        dimension_numbers=("NHWC", "HWIO", "NHWC"),
        precision=jax.lax.Precision.HIGHEST)
    return y + b


def reference_forward(raw, x_nchw, eps):
    hp = jax.lax.Precision.HIGHEST
    h = x_nchw.transpose(0, 2, 3, 1)
    for i in range(3):
        h = jax.nn.relu(_conv_ref_nhwc(h, raw[f"enc{i}_w"], raw[f"enc{i}_b"]))
    B = h.shape[0]
    flat = h.transpose(0, 3, 1, 2).reshape(B, 2048)         # torch NCHW flatten
    mu = jnp.dot(flat, raw["fc_mu_w"].T, precision=hp) + raw["fc_mu_b"]
    logvar = jnp.dot(flat, raw["fc_logvar_w"].T, precision=hp) + raw["fc_logvar_b"]
    z = mu + eps * jnp.exp(0.5 * logvar)
    d = jnp.dot(z, raw["fc_decode_w"].T, precision=hp) + raw["fc_decode_b"]
    d = d.reshape(B, 128, 4, 4).transpose(0, 2, 3, 1)       # NHWC
    d = jax.nn.relu(_convt_ref_nhwc(d, raw["dec0_w"], raw["dec0_b"]))
    d = jax.nn.relu(_convt_ref_nhwc(d, raw["dec1_w"], raw["dec1_b"]))
    x_rec = jax.nn.sigmoid(_convt_ref_nhwc(d, raw["dec2_w"], raw["dec2_b"]))
    return x_rec.transpose(0, 3, 1, 2), mu, logvar


if __name__ == "__main__":
    key = jax.random.PRNGKey(0)
    k_param, k_x, k_eps, k_tw, k_tb, k_tx = jax.random.split(key, 6)

    raw = init_params(k_param)
    params = prepare_params(raw)

    x = jax.random.normal(k_x, (2, 3, 32, 32), jnp.float32)        # CIFAR-10-sized NCHW input
    eps = jax.random.normal(k_eps, (2, LATENT_DIM), jnp.float32)   # torch.randn_like(mu)

    fwd = jax.jit(cvae_forward)
    x_rec, mu, logvar = fwd(params, x, eps)
    jax.block_until_ready((x_rec, mu, logvar))

    assert x_rec.shape == (2, 3, 32, 32)
    assert mu.shape == (2, LATENT_DIM) and logvar.shape == (2, LATENT_DIM)
    assert bool(jnp.all(jnp.isfinite(x_rec)))
    assert bool(jnp.all((x_rec >= 0.0) & (x_rec <= 1.0)))          # sigmoid output range

    # Value-level check of the ConvTranspose2d phase decomposition vs XLA (review request).
    wt = 0.25 * jax.random.normal(k_tw, (32, 8, 4, 4), jnp.float32)   # torch [Cin,Cout,4,4]
    bt = 0.1 * jax.random.normal(k_tb, (8,), jnp.float32)
    xt = jax.random.normal(k_tx, (2, 4, 4, 32), jnp.float32)
    y_pl = conv_transpose2d_s2k4p1(xt, _convt_wmat(wt), _bias_row(jnp.tile(bt, 4)),
                                   "none", out_dtype=jnp.float32)
    y_ref = _convt_ref_nhwc(xt, wt, bt)
    assert float(jnp.max(jnp.abs(y_pl - y_ref))) < 0.25, "convT phase decomposition mismatch"

    # End-to-end value check vs plain-JAX f32 reference (bf16 MXU operands -> loose tol).
    xr_ref, mu_ref, lv_ref = reference_forward(raw, x, eps)
    assert float(jnp.max(jnp.abs(mu - mu_ref))) < 2e-2
    assert float(jnp.max(jnp.abs(logvar - lv_ref))) < 2e-2
    assert float(jnp.max(jnp.abs(x_rec - xr_ref))) < 2e-2

    print("KERNEL_OK")
</pallas_src>

<mosaic_0001>
module attributes {stable_mosaic.version = 11 : i64} {
  func.func @_mm_bias_act_onepass_kernel(%arg0: i32, %arg1: i32, %arg2: memref<256x128xbf16, #tpu.memory_space<vmem>>, %arg3: memref<128x32xbf16, #tpu.memory_space<vmem>>, %arg4: memref<1x32xf32, #tpu.memory_space<vmem>>, %arg5: memref<256x32xbf16, #tpu.memory_space<vmem>>) attributes {dimension_semantics = [#tpu.dimension_semantics<parallel>, #tpu.dimension_semantics<parallel>], iteration_bounds = array<i64: 2, 1>, scalar_prefetch = 0 : i64, scratch_operands = 0 : i64, tpu.core_type = #tpu.core_type<tc>, window_params = [{transform_indices = @transform_0, window_bounds = array<i64: 256, 128>}, {transform_indices = @transform_1, window_bounds = array<i64: 128, 32>}, {transform_indices = @transform_2, window_bounds = array<i64: 1, 32>}, {transform_indices = @transform_3, window_bounds = array<i64: 256, 32>}]} {
    %c0 = arith.constant 0 : index
    %c0_0 = arith.constant 0 : index
    %0 = vector.load %arg2[%c0, %c0_0] : memref<256x128xbf16, #tpu.memory_space<vmem>>, vector<256x128xbf16>
    %c0_1 = arith.constant 0 : index
    %c0_2 = arith.constant 0 : index
    %1 = vector.load %arg3[%c0_1, %c0_2] : memref<128x32xbf16, #tpu.memory_space<vmem>>, vector<128x32xbf16>
    %cst = arith.constant dense<0.000000e+00> : vector<256x32xf32>
    %2 = tpu.matmul %0, %1, %cst {dimension_numbers = #tpu.dot_dimension_numbers<[1], [0], [0], [1], [0, 0, 1, 1], [], []>} : vector<256x128xbf16>, vector<128x32xbf16>, vector<256x32xf32> -> vector<256x32xf32>
    %c0_3 = arith.constant 0 : index
    %c0_4 = arith.constant 0 : index
    %3 = vector.load %arg4[%c0_3, %c0_4] : memref<1x32xf32, #tpu.memory_space<vmem>>, vector<1x32xf32>
    %4 = vector.broadcast %3 : vector<1x32xf32> to vector<256x32xf32>
    %5 = arith.addf %2, %4 : vector<256x32xf32>
    %cst_5 = arith.constant 0.000000e+00 : f32
    %6 = vector.broadcast %cst_5 : f32 to vector<256x32xf32>
    %7 = arith.maximumf %5, %6 : vector<256x32xf32>
    %8 = arith.truncf %7 : vector<256x32xf32> to vector<256x32xbf16>
    %c0_6 = arith.constant 0 : index
    %c0_7 = arith.constant 0 : index
    %9 = vector.load %arg5[%c0_6, %c0_7] : memref<256x32xbf16, #tpu.memory_space<vmem>>, vector<256x32xbf16>
    tpu.vector_store %arg5[%c0_6, %c0_7], %8 {strides = array<i32>} : memref<256x32xbf16, #tpu.memory_space<vmem>>, vector<256x32xbf16>,
    return
  }
  func.func @transform_0(%arg0: i32, %arg1: i32) -> (i32, i32) {
    %c0_i32 = arith.constant 0 : i32
    %c0_i32_0 = arith.constant 0 : i32
    return %arg0, %c0_i32 : i32, i32
  }
  func.func @transform_1(%arg0: i32, %arg1: i32) -> (i32, i32) {
    %c0_i32 = arith.constant 0 : i32
    %c0_i32_0 = arith.constant 0 : i32
    return %c0_i32, %arg1 : i32, i32
  }
  func.func @transform_2(%arg0: i32, %arg1: i32) -> (i32, i32) {
    %c0_i32 = arith.constant 0 : i32
    %c0_i32_0 = arith.constant 0 : i32
    return %c0_i32, %arg1 : i32, i32
  }
  func.func @transform_3(%arg0: i32, %arg1: i32) -> (i32, i32) {
    %c0_i32 = arith.constant 0 : i32
    return %arg0, %arg1 : i32, i32
  }
}

module attributes {stable_mosaic.version = 11 : i64} {
  func.func @_mm_bias_act_onepass_kernel(%arg0: i32, %arg1: i32, %arg2: memref<64x512xbf16, #tpu.memory_space<vmem>>, %arg3: memref<512x64xbf16, #tpu.memory_space<vmem>>, %arg4: memref<1x64xf32, #tpu.memory_space<vmem>>, %arg5: memref<64x64xbf16, #tpu.memory_space<vmem>>) attributes {dimension_semantics = [#tpu.dimension_semantics<parallel>, #tpu.dimension_semantics<parallel>], iteration_bounds = array<i64: 2, 1>, scalar_prefetch = 0 : i64, scratch_operands = 0 : i64, tpu.core_type = #tpu.core_type<tc>, window_params = [{transform_indices = @transform_0, window_bounds = array<i64: 64, 512>}, {transform_indices = @transform_1, window_bounds = array<i64: 512, 64>}, {transform_indices = @transform_2, window_bounds = array<i64: 1, 64>}, {transform_indices = @transform_3, window_bounds = array<i64: 64, 64>}]} {
    %c0 = arith.constant 0 : index
    %c0_0 = arith.constant 0 : index
    %0 = vector.load %arg2[%c0, %c0_0] : memref<64x512xbf16, #tpu.memory_space<vmem>>, vector<64x512xbf16>
    %c0_1 = arith.constant 0 : index
    %c0_2 = arith.constant 0 : index
    %1 = vector.load %arg3[%c0_1, %c0_2] : memref<512x64xbf16, #tpu.memory_space<vmem>>, vector<512x64xbf16>
    %cst = arith.constant dense<0.000000e+00> : vector<64x64xf32>
    %2 = tpu.matmul %0, %1, %cst {dimension_numbers = #tpu.dot_dimension_numbers<[1], [0], [0], [1], [0, 0, 1, 1], [], []>} : vector<64x512xbf16>, vector<512x64xbf16>, vector<64x64xf32> -> vector<64x64xf32>
    %c0_3 = arith.constant 0 : index
    %c0_4 = arith.constant 0 : index
    %3 = vector.load %arg4[%c0_3, %c0_4] : memref<1x64xf32, #tpu.memory_space<vmem>>, vector<1x64xf32>
    %4 = vector.broadcast %3 : vector<1x64xf32> to vector<64x64xf32>
    %5 = arith.addf %2, %4 : vector<64x64xf32>
    %cst_5 = arith.constant 0.000000e+00 : f32
    %6 = vector.broadcast %cst_5 : f32 to vector<64x64xf32>
    %7 = arith.maximumf %5, %6 : vector<64x64xf32>
    %8 = arith.truncf %7 : vector<64x64xf32> to vector<64x64xbf16>
    %c0_6 = arith.constant 0 : index
    %c0_7 = arith.constant 0 : index
    %9 = vector.load %arg5[%c0_6, %c0_7] : memref<64x64xbf16, #tpu.memory_space<vmem>>, vector<64x64xbf16>
    tpu.vector_store %arg5[%c0_6, %c0_7], %8 {strides = array<i32>} : memref<64x64xbf16, #tpu.memory_space<vmem>>, vector<64x64xbf16>,
    return
  }
  func.func @transform_0(%arg0: i32, %arg1: i32) -> (i32, i32) {
    %c0_i32 = arith.constant 0 : i32
    %c0_i32_0 = arith.constant 0 : i32
    return %arg0, %c0_i32 : i32, i32
  }
  func.func @transform_1(%arg0: i32, %arg1: i32) -> (i32, i32) {
    %c0_i32 = arith.constant 0 : i32
    %c0_i32_0 = arith.constant 0 : i32
    return %c0_i32, %arg1 : i32, i32
  }
  func.func @transform_2(%arg0: i32, %arg1: i32) -> (i32, i32) {
    %c0_i32 = arith.constant 0 : i32
    %c0_i32_0 = arith.constant 0 : i32
    return %c0_i32, %arg1 : i32, i32
  }
  func.func @transform_3(%arg0: i32, %arg1: i32) -> (i32, i32) {
    %c0_i32 = arith.constant 0 : i32
    return %arg0, %arg1 : i32, i32
  }
}

module attributes {stable_mosaic.version = 11 : i64} {
  func.func @_mm_bias_act_onepass_kernel(%arg0: i32, %arg1: i32, %arg2: memref<32x1024xbf16, #tpu.memory_space<vmem>>, %arg3: memref<1024x128xbf16, #tpu.memory_space<vmem>>, %arg4: memref<1x128xf32, #tpu.memory_space<vmem>>, %arg5: memref<32x128xbf16, #tpu.memory_space<vmem>>) attributes {dimension_semantics = [#tpu.dimension_semantics<parallel>, #tpu.dimension_semantics<parallel>], iteration_bounds = array<i64: 1, 1>, scalar_prefetch = 0 : i64, scratch_operands = 0 : i64, tpu.core_type = #tpu.core_type<tc>, window_params = [{transform_indices = @transform_0, window_bounds = array<i64: 32, 1024>}, {transform_indices = @transform_1, window_bounds = array<i64: 1024, 128>}, {transform_indices = @transform_2, window_bounds = array<i64: 1, 128>}, {transform_indices = @transform_3, window_bounds = array<i64: 32, 128>}]} {
    %c0 = arith.constant 0 : index
    %c0_0 = arith.constant 0 : index
    %0 = vector.load %arg2[%c0, %c0_0] : memref<32x1024xbf16, #tpu.memory_space<vmem>>, vector<32x1024xbf16>
    %c0_1 = arith.constant 0 : index
    %c0_2 = arith.constant 0 : index
    %1 = vector.load %arg3[%c0_1, %c0_2] : memref<1024x128xbf16, #tpu.memory_space<vmem>>, vector<1024x128xbf16>
    %cst = arith.constant dense<0.000000e+00> : vector<32x128xf32>
    %2 = tpu.matmul %0, %1, %cst {dimension_numbers = #tpu.dot_dimension_numbers<[1], [0], [0], [1], [0, 0, 1, 1], [], []>} : vector<32x1024xbf16>, vector<1024x128xbf16>, vector<32x128xf32> -> vector<32x128xf32>
    %c0_3 = arith.constant 0 : index
    %c0_4 = arith.constant 0 : index
    %3 = vector.load %arg4[%c0_3, %c0_4] : memref<1x128xf32, #tpu.memory_space<vmem>>, vector<1x128xf32>
    %4 = vector.broadcast %3 : vector<1x128xf32> to vector<32x128xf32>
    %5 = arith.addf %2, %4 : vector<32x128xf32>
    %cst_5 = arith.constant 0.000000e+00 : f32
    %6 = vector.broadcast %cst_5 : f32 to vector<32x128xf32>
    %7 = arith.maximumf %5, %6 : vector<32x128xf32>
    %8 = arith.truncf %7 : vector<32x128xf32> to vector<32x128xbf16>
    %c0_6 = arith.constant 0 : index
    %c0_7 = arith.constant 0 : index
    %9 = vector.load %arg5[%c0_6, %c0_7] : memref<32x128xbf16, #tpu.memory_space<vmem>>, vector<32x128xbf16>
    tpu.vector_store %arg5[%c0_6, %c0_7], %8 {strides = array<i32>} : memref<32x128xbf16, #tpu.memory_space<vmem>>, vector<32x128xbf16>,
    return
  }
  func.func @transform_0(%arg0: i32, %arg1: i32) -> (i32, i32) {
    %c0_i32 = arith.constant 0 : i32
    %c0_i32_0 = arith.constant 0 : i32
    return %arg0, %c0_i32 : i32, i32
  }
  func.func @transform_1(%arg0: i32, %arg1: i32) -> (i32, i32) {
    %c0_i32 = arith.constant 0 : i32
    %c0_i32_0 = arith.constant 0 : i32
    return %c0_i32, %arg1 : i32, i32
  }
  func.func @transform_2(%arg0: i32, %arg1: i32) -> (i32, i32) {
    %c0_i32 = arith.constant 0 : i32
    %c0_i32_0 = arith.constant 0 : i32
    return %c0_i32, %arg1 : i32, i32
  }
  func.func @transform_3(%arg0: i32, %arg1: i32) -> (i32, i32) {
    %c0_i32 = arith.constant 0 : i32
    return %arg0, %arg1 : i32, i32
  }
}

module attributes {stable_mosaic.version = 11 : i64} {
  func.func @_head_kernel(%arg0: i32, %arg1: memref<16x2048xbf16, #tpu.memory_space<vmem>>, %arg2: memref<2048x256xbf16, #tpu.memory_space<vmem>>, %arg3: memref<1x256xf32, #tpu.memory_space<vmem>>, %arg4: memref<16x128xf32, #tpu.memory_space<vmem>>, %arg5: memref<128x2048xbf16, #tpu.memory_space<vmem>>, %arg6: memref<1x2048xf32, #tpu.memory_space<vmem>>, %arg7: memref<16x256xf32, #tpu.memory_space<vmem>>, %arg8: memref<16x2048xbf16, #tpu.memory_space<vmem>>) attributes {dimension_semantics = [#tpu.dimension_semantics<parallel>], iteration_bounds = array<i64: 1>, scalar_prefetch = 0 : i64, scratch_operands = 0 : i64, tpu.core_type = #tpu.core_type<tc>, window_params = [{transform_indices = @transform_0, window_bounds = array<i64: 16, 2048>}, {pipeline_mode = #tpu.pipeline_mode<synchronous>, transform_indices = @transform_1, window_bounds = array<i64: 2048, 256>}, {pipeline_mode = #tpu.pipeline_mode<synchronous>, transform_indices = @transform_2, window_bounds = array<i64: 1, 256>}, {transform_indices = @transform_3, window_bounds = array<i64: 16, 128>}, {pipeline_mode = #tpu.pipeline_mode<synchronous>, transform_indices = @transform_4, window_bounds = array<i64: 128, 2048>}, {pipeline_mode = #tpu.pipeline_mode<synchronous>, transform_indices = @transform_5, window_bounds = array<i64: 1, 2048>}, {transform_indices = @transform_6, window_bounds = array<i64: 16, 256>}, {transform_indices = @transform_7, window_bounds = array<i64: 16, 2048>}]} {
    %c0 = arith.constant 0 : index
    %c0_0 = arith.constant 0 : index
    %0 = vector.load %arg1[%c0, %c0_0] : memref<16x2048xbf16, #tpu.memory_space<vmem>>, vector<16x2048xbf16>
    %c0_1 = arith.constant 0 : index
    %c0_2 = arith.constant 0 : index
    %1 = vector.load %arg2[%c0_1, %c0_2] : memref<2048x256xbf16, #tpu.memory_space<vmem>>, vector<2048x256xbf16>
    %cst = arith.constant dense<0.000000e+00> : vector<16x256xf32>
    %2 = tpu.matmul %0, %1, %cst {dimension_numbers = #tpu.dot_dimension_numbers<[1], [0], [0], [1], [0, 0, 1, 1], [], []>} : vector<16x2048xbf16>, vector<2048x256xbf16>, vector<16x256xf32> -> vector<16x256xf32>
    %c0_3 = arith.constant 0 : index
    %c0_4 = arith.constant 0 : index
    %3 = vector.load %arg3[%c0_3, %c0_4] : memref<1x256xf32, #tpu.memory_space<vmem>>, vector<1x256xf32>
    %4 = vector.broadcast %3 : vector<1x256xf32> to vector<16x256xf32>
    %5 = arith.addf %2, %4 : vector<16x256xf32>
    %c0_5 = arith.constant 0 : index
    %c0_6 = arith.constant 0 : index
    %6 = vector.load %arg7[%c0_5, %c0_6] : memref<16x256xf32, #tpu.memory_space<vmem>>, vector<16x256xf32>
    tpu.vector_store %arg7[%c0_5, %c0_6], %5 {strides = array<i32>} : memref<16x256xf32, #tpu.memory_space<vmem>>, vector<16x256xf32>,
    %7 = vector.extract_strided_slice %5 {offsets = [0, 0], sizes = [16, 128], strides = [1, 1]} : vector<16x256xf32> to vector<16x128xf32>
    %8 = vector.extract_strided_slice %5 {offsets = [0, 128], sizes = [16, 128], strides = [1, 1]} : vector<16x256xf32> to vector<16x128xf32>
    %c0_7 = arith.constant 0 : index
    %c0_8 = arith.constant 0 : index
    %9 = vector.load %arg4[%c0_7, %c0_8] : memref<16x128xf32, #tpu.memory_space<vmem>>, vector<16x128xf32>
    %cst_9 = arith.constant 5.000000e-01 : f32
    %10 = vector.broadcast %cst_9 : f32 to vector<16x128xf32>
    %11 = arith.mulf %10, %8 : vector<16x128xf32>
    %12 = math.exp %11 : vector<16x128xf32>
    %13 = arith.mulf %9, %12 : vector<16x128xf32>
    %14 = arith.addf %7, %13 : vector<16x128xf32>
    %15 = arith.truncf %14 : vector<16x128xf32> to vector<16x128xbf16>
    %c0_10 = arith.constant 0 : index
    %c0_11 = arith.constant 0 : index
    %16 = vector.load %arg5[%c0_10, %c0_11] : memref<128x2048xbf16, #tpu.memory_space<vmem>>, vector<128x2048xbf16>
    %cst_12 = arith.constant dense<0.000000e+00> : vector<16x2048xf32>
    %17 = tpu.matmul %15, %16, %cst_12 {dimension_numbers = #tpu.dot_dimension_numbers<[1], [0], [0], [1], [0, 0, 1, 1], [], []>} : vector<16x128xbf16>, vector<128x2048xbf16>, vector<16x2048xf32> -> vector<16x2048xf32>
    %c0_13 = arith.constant 0 : index
    %c0_14 = arith.constant 0 : index
    %18 = vector.load %arg6[%c0_13, %c0_14] : memref<1x2048xf32, #tpu.memory_space<vmem>>, vector<1x2048xf32>
    %19 = vector.broadcast %18 : vector<1x2048xf32> to vector<16x2048xf32>
    %20 = arith.addf %17, %19 : vector<16x2048xf32>
    %21 = arith.truncf %20 : vector<16x2048xf32> to vector<16x2048xbf16>
    %c0_15 = arith.constant 0 : index
    %c0_16 = arith.constant 0 : index
    %22 = vector.load %arg8[%c0_15, %c0_16] : memref<16x2048xbf16, #tpu.memory_space<vmem>>, vector<16x2048xbf16>
    tpu.vector_store %arg8[%c0_15, %c0_16], %21 {strides = array<i32>} : memref<16x2048xbf16, #tpu.memory_space<vmem>>, vector<16x2048xbf16>,
    return
  }
  func.func @transform_0(%arg0: i32) -> (i32, i32) {
    %c0_i32 = arith.constant 0 : i32
    %c0_i32_0 = arith.constant 0 : i32
    return %arg0, %c0_i32 : i32, i32
  }
  func.func @transform_1(%arg0: i32) -> (i32, i32) {
    %c0_i32 = arith.constant 0 : i32
    %c0_i32_0 = arith.constant 0 : i32
    %c0_i32_1 = arith.constant 0 : i32
    return %c0_i32, %c0_i32_0 : i32, i32
  }
  func.func @transform_2(%arg0: i32) -> (i32, i32) {
    %c0_i32 = arith.constant 0 : i32
    %c0_i32_0 = arith.constant 0 : i32
    %c0_i32_1 = arith.constant 0 : i32
    return %c0_i32, %c0_i32_0 : i32, i32
  }
  func.func @transform_3(%arg0: i32) -> (i32, i32) {
    %c0_i32 = arith.constant 0 : i32
    %c0_i32_0 = arith.constant 0 : i32
    return %arg0, %c0_i32 : i32, i32
  }
  func.func @transform_4(%arg0: i32) -> (i32, i32) {
    %c0_i32 = arith.constant 0 : i32
    %c0_i32_0 = arith.constant 0 : i32
    %c0_i32_1 = arith.constant 0 : i32
    return %c0_i32, %c0_i32_0 : i32, i32
  }
  func.func @transform_5(%arg0: i32) -> (i32, i32) {
    %c0_i32 = arith.constant 0 : i32
    %c0_i32_0 = arith.constant 0 : i32
    %c0_i32_1 = arith.constant 0 : i32
    return %c0_i32, %c0_i32_0 : i32, i32
  }
  func.func @transform_6(%arg0: i32) -> (i32, i32) {
    %c0_i32 = arith.constant 0 : i32
    %c0_i32_0 = arith.constant 0 : i32
    return %arg0, %c0_i32 : i32, i32
  }
  func.func @transform_7(%arg0: i32) -> (i32, i32) {
    %c0_i32 = arith.constant 0 : i32
    %c0_i32_0 = arith.constant 0 : i32
    return %arg0, %c0_i32 : i32, i32
  }
}

module attributes {stable_mosaic.version = 11 : i64} {
  func.func @_mm_bias_act_onepass_kernel(%arg0: i32, %arg1: i32, %arg2: memref<64x512xbf16, #tpu.memory_space<vmem>>, %arg3: memref<512x256xbf16, #tpu.memory_space<vmem>>, %arg4: memref<1x256xf32, #tpu.memory_space<vmem>>, %arg5: memref<64x256xbf16, #tpu.memory_space<vmem>>) attributes {dimension_semantics = [#tpu.dimension_semantics<parallel>, #tpu.dimension_semantics<parallel>], iteration_bounds = array<i64: 1, 1>, scalar_prefetch = 0 : i64, scratch_operands = 0 : i64, tpu.core_type = #tpu.core_type<tc>, window_params = [{transform_indices = @transform_0, window_bounds = array<i64: 64, 512>}, {transform_indices = @transform_1, window_bounds = array<i64: 512, 256>}, {transform_indices = @transform_2, window_bounds = array<i64: 1, 256>}, {transform_indices = @transform_3, window_bounds = array<i64: 64, 256>}]} {
    %c0 = arith.constant 0 : index
    %c0_0 = arith.constant 0 : index
    %0 = vector.load %arg2[%c0, %c0_0] : memref<64x512xbf16, #tpu.memory_space<vmem>>, vector<64x512xbf16>
    %c0_1 = arith.constant 0 : index
    %c0_2 = arith.constant 0 : index
    %1 = vector.load %arg3[%c0_1, %c0_2] : memref<512x256xbf16, #tpu.memory_space<vmem>>, vector<512x256xbf16>
    %cst = arith.constant dense<0.000000e+00> : vector<64x256xf32>
    %2 = tpu.matmul %0, %1, %cst {dimension_numbers = #tpu.dot_dimension_numbers<[1], [0], [0], [1], [0, 0, 1, 1], [], []>} : vector<64x512xbf16>, vector<512x256xbf16>, vector<64x256xf32> -> vector<64x256xf32>
    %c0_3 = arith.constant 0 : index
    %c0_4 = arith.constant 0 : index
    %3 = vector.load %arg4[%c0_3, %c0_4] : memref<1x256xf32, #tpu.memory_space<vmem>>, vector<1x256xf32>
    %4 = vector.broadcast %3 : vector<1x256xf32> to vector<64x256xf32>
    %5 = arith.addf %2, %4 : vector<64x256xf32>
    %cst_5 = arith.constant 0.000000e+00 : f32
    %6 = vector.broadcast %cst_5 : f32 to vector<64x256xf32>
    %7 = arith.maximumf %5, %6 : vector<64x256xf32>
    %8 = arith.truncf %7 : vector<64x256xf32> to vector<64x256xbf16>
    %c0_6 = arith.constant 0 : index
    %c0_7 = arith.constant 0 : index
    %9 = vector.load %arg5[%c0_6, %c0_7] : memref<64x256xbf16, #tpu.memory_space<vmem>>, vector<64x256xbf16>
    tpu.vector_store %arg5[%c0_6, %c0_7], %8 {strides = array<i32>} : memref<64x256xbf16, #tpu.memory_space<vmem>>, vector<64x256xbf16>,
    return
  }
  func.func @transform_0(%arg0: i32, %arg1: i32) -> (i32, i32) {
    %c0_i32 = arith.constant 0 : i32
    %c0_i32_0 = arith.constant 0 : i32
    return %arg0, %c0_i32 : i32, i32
  }
  func.func @transform_1(%arg0: i32, %arg1: i32) -> (i32, i32) {
    %c0_i32 = arith.constant 0 : i32
    %c0_i32_0 = arith.constant 0 : i32
    return %c0_i32, %arg1 : i32, i32
  }
  func.func @transform_2(%arg0: i32, %arg1: i32) -> (i32, i32) {
    %c0_i32 = arith.constant 0 : i32
    %c0_i32_0 = arith.constant 0 : i32
    return %c0_i32, %arg1 : i32, i32
  }
  func.func @transform_3(%arg0: i32, %arg1: i32) -> (i32, i32) {
    %c0_i32 = arith.constant 0 : i32
    return %arg0, %arg1 : i32, i32
  }
}

module attributes {stable_mosaic.version = 11 : i64} {
  func.func @_mm_bias_act_onepass_kernel(%arg0: i32, %arg1: i32, %arg2: memref<96x256xbf16, #tpu.memory_space<vmem>>, %arg3: memref<256x128xbf16, #tpu.memory_space<vmem>>, %arg4: memref<1x128xf32, #tpu.memory_space<vmem>>, %arg5: memref<96x128xbf16, #tpu.memory_space<vmem>>) attributes {dimension_semantics = [#tpu.dimension_semantics<parallel>, #tpu.dimension_semantics<parallel>], iteration_bounds = array<i64: 2, 1>, scalar_prefetch = 0 : i64, scratch_operands = 0 : i64, tpu.core_type = #tpu.core_type<tc>, window_params = [{transform_indices = @transform_0, window_bounds = array<i64: 96, 256>}, {transform_indices = @transform_1, window_bounds = array<i64: 256, 128>}, {transform_indices = @transform_2, window_bounds = array<i64: 1, 128>}, {transform_indices = @transform_3, window_bounds = array<i64: 96, 128>}]} {
    %c0 = arith.constant 0 : index
    %c0_0 = arith.constant 0 : index
    %0 = vector.load %arg2[%c0, %c0_0] : memref<96x256xbf16, #tpu.memory_space<vmem>>, vector<96x256xbf16>
    %c0_1 = arith.constant 0 : index
    %c0_2 = arith.constant 0 : index
    %1 = vector.load %arg3[%c0_1, %c0_2] : memref<256x128xbf16, #tpu.memory_space<vmem>>, vector<256x128xbf16>
    %cst = arith.constant dense<0.000000e+00> : vector<96x128xf32>
    %2 = tpu.matmul %0, %1, %cst {dimension_numbers = #tpu.dot_dimension_numbers<[1], [0], [0], [1], [0, 0, 1, 1], [], []>} : vector<96x256xbf16>, vector<256x128xbf16>, vector<96x128xf32> -> vector<96x128xf32>
    %c0_3 = arith.constant 0 : index
    %c0_4 = arith.constant 0 : index
    %3 = vector.load %arg4[%c0_3, %c0_4] : memref<1x128xf32, #tpu.memory_space<vmem>>, vector<1x128xf32>
    %4 = vector.broadcast %3 : vector<1x128xf32> to vector<96x128xf32>
    %5 = arith.addf %2, %4 : vector<96x128xf32>
    %cst_5 = arith.constant 0.000000e+00 : f32
    %6 = vector.broadcast %cst_5 : f32 to vector<96x128xf32>
    %7 = arith.maximumf %5, %6 : vector<96x128xf32>
    %8 = arith.truncf %7 : vector<96x128xf32> to vector<96x128xbf16>
    %c0_6 = arith.constant 0 : index
    %c0_7 = arith.constant 0 : index
    %9 = vector.load %arg5[%c0_6, %c0_7] : memref<96x128xbf16, #tpu.memory_space<vmem>>, vector<96x128xbf16>
    tpu.vector_store %arg5[%c0_6, %c0_7], %8 {strides = array<i32>} : memref<96x128xbf16, #tpu.memory_space<vmem>>, vector<96x128xbf16>,
    return
  }
  func.func @transform_0(%arg0: i32, %arg1: i32) -> (i32, i32) {
    %c0_i32 = arith.constant 0 : i32
    %c0_i32_0 = arith.constant 0 : i32
    return %arg0, %c0_i32 : i32, i32
  }
  func.func @transform_1(%arg0: i32, %arg1: i32) -> (i32, i32) {
    %c0_i32 = arith.constant 0 : i32
    %c0_i32_0 = arith.constant 0 : i32
    return %c0_i32, %arg1 : i32, i32
  }
  func.func @transform_2(%arg0: i32, %arg1: i32) -> (i32, i32) {
    %c0_i32 = arith.constant 0 : i32
    %c0_i32_0 = arith.constant 0 : i32
    return %c0_i32, %arg1 : i32, i32
  }
  func.func @transform_3(%arg0: i32, %arg1: i32) -> (i32, i32) {
    %c0_i32 = arith.constant 0 : i32
    return %arg0, %arg1 : i32, i32
  }
}

module attributes {stable_mosaic.version = 11 : i64} {
  func.func @_mm_bias_act_onepass_kernel(%arg0: i32, %arg1: i32, %arg2: memref<304x128xbf16, #tpu.memory_space<vmem>>, %arg3: memref<128x12xbf16, #tpu.memory_space<vmem>>, %arg4: memref<1x12xf32, #tpu.memory_space<vmem>>, %arg5: memref<304x12xf32, #tpu.memory_space<vmem>>) attributes {dimension_semantics = [#tpu.dimension_semantics<parallel>, #tpu.dimension_semantics<parallel>], iteration_bounds = array<i64: 2, 1>, scalar_prefetch = 0 : i64, scratch_operands = 0 : i64, tpu.core_type = #tpu.core_type<tc>, window_params = [{transform_indices = @transform_0, window_bounds = array<i64: 304, 128>}, {transform_indices = @transform_1, window_bounds = array<i64: 128, 12>}, {transform_indices = @transform_2, window_bounds = array<i64: 1, 12>}, {transform_indices = @transform_3, window_bounds = array<i64: 304, 12>}]} {
    %c0 = arith.constant 0 : index
    %c0_0 = arith.constant 0 : index
    %0 = vector.load %arg2[%c0, %c0_0] : memref<304x128xbf16, #tpu.memory_space<vmem>>, vector<304x128xbf16>
    %c0_1 = arith.constant 0 : index
    %c0_2 = arith.constant 0 : index
    %1 = vector.load %arg3[%c0_1, %c0_2] : memref<128x12xbf16, #tpu.memory_space<vmem>>, vector<128x12xbf16>
    %cst = arith.constant dense<0.000000e+00> : vector<304x12xf32>
    %2 = tpu.matmul %0, %1, %cst {dimension_numbers = #tpu.dot_dimension_numbers<[1], [0], [0], [1], [0, 0, 1, 1], [], []>} : vector<304x128xbf16>, vector<128x12xbf16>, vector<304x12xf32> -> vector<304x12xf32>
    %c0_3 = arith.constant 0 : index
    %c0_4 = arith.constant 0 : index
    %3 = vector.load %arg4[%c0_3, %c0_4] : memref<1x12xf32, #tpu.memory_space<vmem>>, vector<1x12xf32>
    %4 = vector.broadcast %3 : vector<1x12xf32> to vector<304x12xf32>
    %5 = arith.addf %2, %4 : vector<304x12xf32>
    %6 = arith.negf %5 : vector<304x12xf32>
    %7 = math.exp %6 : vector<304x12xf32>
    %cst_5 = arith.constant 1.000000e+00 : f32
    %8 = vector.broadcast %cst_5 : f32 to vector<304x12xf32>
    %9 = arith.addf %8, %7 : vector<304x12xf32>
    %10 = arith.divf %8, %9 : vector<304x12xf32>
    %c0_6 = arith.constant 0 : index
    %c0_7 = arith.constant 0 : index
    %11 = vector.load %arg5[%c0_6, %c0_7] : memref<304x12xf32, #tpu.memory_space<vmem>>, vector<304x12xf32>
    tpu.vector_store %arg5[%c0_6, %c0_7], %10 {strides = array<i32>} : memref<304x12xf32, #tpu.memory_space<vmem>>, vector<304x12xf32>,
    return
  }
  func.func @transform_0(%arg0: i32, %arg1: i32) -> (i32, i32) {
    %c0_i32 = arith.constant 0 : i32
    %c0_i32_0 = arith.constant 0 : i32
    return %arg0, %c0_i32 : i32, i32
  }
  func.func @transform_1(%arg0: i32, %arg1: i32) -> (i32, i32) {
    %c0_i32 = arith.constant 0 : i32
    %c0_i32_0 = arith.constant 0 : i32
    return %c0_i32, %arg1 : i32, i32
  }
  func.func @transform_2(%arg0: i32, %arg1: i32) -> (i32, i32) {
    %c0_i32 = arith.constant 0 : i32
    %c0_i32_0 = arith.constant 0 : i32
    return %c0_i32, %arg1 : i32, i32
  }
  func.func @transform_3(%arg0: i32, %arg1: i32) -> (i32, i32) {
    %c0_i32 = arith.constant 0 : i32
    return %arg0, %arg1 : i32, i32
  }
}

</mosaic_0001>

<bundles_post_ra>
// kernel: cvae_forward.7
= control target key start
LH: loop header
LB: loop body
LE: loop exit
PB: predicated region body
PF: predicated region fallthrough
CT: control target
= control target key end

     0   :  { %s1163_s12 = smov 0   ;;  %s1165_s13 = smov 0   ;;  %s1348_s0 = inlined_call_operand.vmem [shape: bf16[512,128], index: 0, kind: input, shape index: {}]   ;;  %s1349_s1 = inlined_call_operand.vmem [shape: bf16[128,32], index: 1, kind: input, shape index: {}]   ;;  %s1350_s2 = inlined_call_operand.vmem [shape: f32[1,32], index: 2, kind: input, shape index: {}]   ;;  %s1351_s3 = inlined_call_operand.vmem [shape: bf16[512,32], index: 3, kind: output, shape index: {}]  }
   0x1   :  { %s1167_s14 = smov 0  }
   0x2 LB: > { %s25_s15 = sadd.s32 1, %s1137_s13  ;;  %p887_p0 = scmp.ge.s32.totalorder %s1141_s14, 1  ;;  %s1141_s14 = sphi %s1167_s14, %s13_s14   ;;  %s1137_s13 = sphi %s1165_s13, %s1353_s13   ;;  %s1133_s12 = sphi %s1163_s12, %s1352_s12  }
   0x3   : > { %p27_p1 = scmp.ge.s32.totalorder %s25_s15, 2  ;;  %p169_p2 = scmp.lt.s32.totalorder %s1141_s14, 3 }
   0x5   : > { %s1355_s15 = smov (%p27_p1, %s25_s15), 0  ;;  %p170_p3 = pnand %p887_p0, %p169_p2 }
   0x6   : > { %v1095_v0 = vld [vmem:[%s1349_s1] sm:$0xff] (!%p170_p3)   ;;  %s888_s18 = sshll.u32 (!%p170_p3), %s1133_s12, 5  ;;  %v1096_v1 = vld [vmem:[%s1349_s1 + $0x8] sm:$0xff] (!%p170_p3)   ;;  %v1097_v2 = vld [vmem:[%s1349_s1 + $0x10] sm:$0xff] (!%p170_p3)   ;;  %vm746_vm0 = vcmask (!%p170_p3), 257024  }
   0x7   : > { %173 = sbr.rel (%p170_p3) target bundleno = 285 (0x11d), region = 32  ;;  %p204_p4 = scmp.lt.s32.totalorder (!%p170_p3), %s888_s18, 63  ;;  %1007 = vmatprep.subr.bf16.mxu0 (!%p170_p3), %v1095_v0  ;;  %1055 = vmatprep.subr.bf16.mxu1 (!%p170_p3), %v1095_v0  ;;  %v1098_v3 = vld [vmem:[%s1349_s1 + $0x18] sm:$0xff] (!%p170_p3)   ;;  %v1099_v6 = vld [vmem:[%s1349_s1 + $0x20] sm:$0xff] (!%p170_p3)   ;;  %v1100_v7 = vld [vmem:[%s1349_s1 + $0x28] sm:$0xff] (!%p170_p3)  }
   0x8   : > { %1008 = vmatpush3.bf16.msra.mxu0 (!%p170_p3), %v1095_v0  ;;  %1063 = vmatpush3.bf16.msra.mxu1 (!%p170_p3), %v1095_v0  ;;  %v1101_v8 = vld [vmem:[%s1349_s1 + $0x30] sm:$0xff] (!%p170_p3)   ;;  %v1102_v9 = vld [vmem:[%s1349_s1 + $0x38] sm:$0xff] (!%p170_p3)   ;;  %v1234_v24 = vld [vmem:[%s1350_s2] ss:$0 sm:$0xff] (!%p170_p3) }
   0x9   : > { %1009 = vmatprep.subr.bf16.mxu0 (!%p170_p3), %v1096_v1  ;;  %1056 = vmatprep.subr.bf16.mxu1 (!%p170_p3), %v1096_v1 }
   0xc   : > { %1010 = vmatpush3.bf16.msra.mxu0 (!%p170_p3), %v1096_v1  ;;  %1064 = vmatpush3.bf16.msra.mxu1 (!%p170_p3), %v1096_v1 }
   0xd   : > { %1011 = vmatprep.subr.bf16.mxu0 (!%p170_p3), %v1097_v2  ;;  %1057 = vmatprep.subr.bf16.mxu1 (!%p170_p3), %v1097_v2 }
   0xe   : > { %s1357_s18 = smov (!%p204_p4, %s888_s18), 63 }
   0xf   : > { %s889_s23 = sshll.u32 %s1357_s18, 2 }
  0x10   : > { %s1198_s26 = scalar_lea.vmem %s1348_s0, %s889_s23  ;;  %1012 = vmatpush3.bf16.msra.mxu0 %v1097_v2  ;;  %1065 = vmatpush3.bf16.msra.mxu1 %v1097_v2  ;;  %s1247_s17 = scalar_lea.vmem %s1351_s3, %s889_s23 }
  0x11   : > { %v1103_v4 = vld [vmem:[%s1198_s26] sm:$0xff]   ;;  %1013 = vmatprep.subr.bf16.mxu0 %v1098_v3  ;;  %1058 = vmatprep.subr.bf16.mxu1 %v1098_v3  ;;  %v1105_v10 = vld [vmem:[%s1198_s26 + $0x8] sm:$0xff]   ;;  %v1107_v12 = vld [vmem:[%s1198_s26 + $0x10] sm:$0xff]  }
  0x12   : > { %v1104_v5 = vld [vmem:[%s1198_s26 + $0x40] sm:$0xff]   ;;  %1023 = vmatprep.mubr.bf16.mxu0 %v1103_v4  ;;  %v1106_v11 = vld [vmem:[%s1198_s26 + $0x48] sm:$0xff]   ;;  %v1108_v13 = vld [vmem:[%s1198_s26 + $0x50] sm:$0xff]  }
  0x13   : > { %1039 = vmatprep.mubr.bf16.mxu1 %v1104_v5  ;;  %v1109_v14 = vld [vmem:[%s1198_s26 + $0x18] sm:$0xff]   ;;  %v1111_v16 = vld [vmem:[%s1198_s26 + $0x20] sm:$0xff]   ;;  %v1113_v18 = vld [vmem:[%s1198_s26 + $0x28] sm:$0xff]  }
  0x14   : > { %1014 = vmatpush3.bf16.msra.mxu0 %v1098_v3  ;;  %1066 = vmatpush3.bf16.msra.mxu1 %v1098_v3  ;;  %v1110_v15 = vld [vmem:[%s1198_s26 + $0x58] sm:$0xff]   ;;  %v1112_v17 = vld [vmem:[%s1198_s26 + $0x60] sm:$0xff]   ;;  %v1114_v19 = vld [vmem:[%s1198_s26 + $0x68] sm:$0xff]  }
  0x15   : > { %1015 = vmatprep.subr.bf16.mxu0 %v1099_v6  ;;  %1059 = vmatprep.subr.bf16.mxu1 %v1099_v6  ;;  %v1115_v20 = vld [vmem:[%s1198_s26 + $0x30] sm:$0xff]   ;;  %v1117_v22 = vld [vmem:[%s1198_s26 + $0x38] sm:$0xff]  }
  0x16   : > { %v1116_v21 = vld [vmem:[%s1198_s26 + $0x70] sm:$0xff]   ;;  %v1118_v23 = vld [vmem:[%s1198_s26 + $0x78] sm:$0xff]  }
  0x18   : > { %1016 = vmatpush3.bf16.msra.mxu0 %v1099_v6  ;;  %1067 = vmatpush3.bf16.msra.mxu1 %v1099_v6 }
  0x19   : > { %1017 = vmatprep.subr.bf16.mxu0 %v1100_v7  ;;  %1060 = vmatprep.subr.bf16.mxu1 %v1100_v7 }
  0x1c   : > { %1018 = vmatpush3.bf16.msra.mxu0 %v1100_v7  ;;  %1068 = vmatpush3.bf16.msra.mxu1 %v1100_v7 }
  0x1d   : > { %1019 = vmatprep.subr.bf16.mxu0 %v1101_v8  ;;  %1061 = vmatprep.subr.bf16.mxu1 %v1101_v8 }
  0x20   : > { %1020 = vmatpush3.bf16.msra.mxu0 %v1101_v8  ;;  %1069 = vmatpush3.bf16.msra.mxu1 %v1101_v8 }
  0x21   : > { %1021 = vmatprep.subr.bf16.mxu0 %v1102_v9  ;;  %1062 = vmatprep.subr.bf16.mxu1 %v1102_v9 }
  0x24   : > { %1022 = vmatpush3.bf16.msra.mxu0 %v1102_v9  ;;  %1070 = vmatpush3.bf16.msra.mxu1 %v1102_v9 }
  0x27   : > { %1024 = vmatmul.mubr.bf16.vlgmr.msra.gmra.mrb[0].mxu0 %v1105_v10  ;;  %1040 = vmatmul.mubr.bf16.vlgmr.msra.gmra.mrb[0].mxu1 %v1106_v11 }
  0x28   : > { %1027 = vmatprep.mubr.bf16.mxu0 %v1107_v12  ;;  %1043 = vmatprep.mubr.bf16.mxu1 %v1108_v13 }
  0x2f   : > { %1028 = vmatmul.mubr.bf16.gmra.mrb[4].mxu0 %v1109_v14  ;;  %1044 = vmatmul.mubr.bf16.gmra.mrb[4].mxu1 %v1110_v15 }
  0x30   : > { %1031 = vmatprep.mubr.bf16.mxu0 %v1111_v16  ;;  %1047 = vmatprep.mubr.bf16.mxu1 %v1112_v17 }
  0x37   : > { %1032 = vmatmul.mubr.bf16.gmra.mrb[8].mxu0 %v1113_v18  ;;  %1048 = vmatmul.mubr.bf16.gmra.mrb[8].mxu1 %v1114_v19 }
  0x38   : > { %1035 = vmatprep.mubr.bf16.mxu0 %v1115_v20  ;;  %1051 = vmatprep.mubr.bf16.mxu1 %v1116_v21 }
  0x3f   : > { %1036 = vmatmul.mubr.bf16.gmra.mrb[12].mxu0 %v1117_v22  ;;  %1052 = vmatmul.mubr.bf16.gmra.mrb[12].mxu1 %v1118_v23 }
  0xfa   : > { %v1025_v25 = vpop.f32.mrb[0].mxu0  ;;  %v1041_v26 = vpop.f32.mrb[0].mxu1 }
  0xfb   : > { %v468_v27 = vadd.f32 %v1025_v25, %v1234_v24  ;;  %v532_v28 = vadd.f32 %v1041_v26, %v1234_v24  ;;  %v459_v29 = vpop.f32.mrb[1].mxu0  ;;  %v523_v30 = vpop.f32.mrb[1].mxu1 }
  0xfc   : > { %v460_v31 = vadd.f32 %v1234_v24, %v459_v29  ;;  %v524_v32 = vadd.f32 %v1234_v24, %v523_v30  ;;  %v1026_v33 = vpop.f32.mrb[2].mxu0  ;;  %v1042_v34 = vpop.f32.mrb[2].mxu1 }
  0xfd   : > { %v588_v35 = vmax.f32 %v468_v27, 0.0  ;;  %v604_v36 = vmax.f32 %v532_v28, 0.0  ;;  %v471_v37 = vadd.f32 %v1026_v33, %v1234_v24  ;;  %v535_v38 = vadd.f32 %v1042_v34, %v1234_v24  ;;  %v462_v39 = vpop.f32.mrb[3].mxu0  ;;  %v526_v40 = vpop.f32.mrb[3].mxu1 }
  0xfe   : > { %v586_v41 = vmax.f32 %v460_v31, 0.0  ;;  %v602_v42 = vmax.f32 %v524_v32, 0.0  ;;  %v463_v43 = vadd.f32 %v1234_v24, %v462_v39  ;;  %v527_v44 = vadd.f32 %v1234_v24, %v526_v40 }
  0xff   : > { %v953_v45 = vpack.c.bf16 %v588_v35, %v588_v35  ;;  %v969_v46 = vpack.c.bf16 %v604_v36, %v604_v36  ;;  %v589_v47 = vmax.f32 %v471_v37, 0.0  ;;  %v605_v48 = vmax.f32 %v535_v38, 0.0 }
 0x100   : > { %v951_v49 = vpack.c.bf16 %v586_v41, %v586_v41  ;;  %v967_v50 = vpack.c.bf16 %v602_v42, %v602_v42  ;;  %v587_v51 = vmax.f32 %v463_v43, 0.0  ;;  %v603_v52 = vmax.f32 %v527_v44, 0.0 }
 0x101   : > { %749 = vst.msk [vmem:[%s1247_s17 + $0x8] sm:$0xf] %vm746_vm0, %v953_v45  ;;  %765 = vst.msk [vmem:[%s1247_s17 + $0x48] sm:$0xf] %vm746_vm0, %v969_v46  ;;  %v954_v53 = vpack.c.bf16 %v589_v47, %v589_v47  ;;  %v970_v54 = vpack.c.bf16 %v605_v48, %v605_v48 }
 0x102   : > { %747 = vst.msk [vmem:[%s1247_s17] sm:$0xf] %vm746_vm0, %v951_v49  ;;  %763 = vst.msk [vmem:[%s1247_s17 + $0x40] sm:$0xf] %vm746_vm0, %v967_v50  ;;  %v952_v55 = vpack.c.bf16 %v587_v51, %v587_v51  ;;  %v968_v56 = vpack.c.bf16 %v603_v52, %v603_v52  ;;  %v1029_v57 = vpop.f32.mrb[4].mxu0  ;;  %v1045_v58 = vpop.f32.mrb[4].mxu1 }
 0x103   : > { %750 = vst.msk [vmem:[%s1247_s17 + $0xc] sm:$0xf] %vm746_vm0, %v954_v53  ;;  %766 = vst.msk [vmem:[%s1247_s17 + $0x4c] sm:$0xf] %vm746_vm0, %v970_v54  ;;  %v484_v59 = vadd.f32 %v1029_v57, %v1234_v24  ;;  %v548_v60 = vadd.f32 %v1045_v58, %v1234_v24  ;;  %v475_v61 = vpop.f32.mrb[5].mxu0  ;;  %v539_v62 = vpop.f32.mrb[5].mxu1 }
 0x104   : > { %748 = vst.msk [vmem:[%s1247_s17 + $0x4] sm:$0xf] %vm746_vm0, %v952_v55  ;;  %764 = vst.msk [vmem:[%s1247_s17 + $0x44] sm:$0xf] %vm746_vm0, %v968_v56  ;;  %v476_v63 = vadd.f32 %v1234_v24, %v475_v61  ;;  %v540_v0 = vadd.f32 %v1234_v24, %v539_v62  ;;  %v1030_v1 = vpop.f32.mrb[6].mxu0  ;;  %v1046_v2 = vpop.f32.mrb[6].mxu1 }
 0x105   : > { %v592_v3 = vmax.f32 %v484_v59, 0.0  ;;  %v608_v4 = vmax.f32 %v548_v60, 0.0  ;;  %v487_v5 = vadd.f32 %v1030_v1, %v1234_v24  ;;  %v551_v6 = vadd.f32 %v1046_v2, %v1234_v24  ;;  %v478_v7 = vpop.f32.mrb[7].mxu0  ;;  %v542_v8 = vpop.f32.mrb[7].mxu1 }
 0x106   : > { %v590_v9 = vmax.f32 %v476_v63, 0.0  ;;  %v606_v10 = vmax.f32 %v540_v0, 0.0  ;;  %v479_v11 = vadd.f32 %v1234_v24, %v478_v7  ;;  %v543_v12 = vadd.f32 %v1234_v24, %v542_v8 }
 0x107   : > { %v957_v13 = vpack.c.bf16 %v592_v3, %v592_v3  ;;  %v973_v14 = vpack.c.bf16 %v608_v4, %v608_v4  ;;  %v593_v15 = vmax.f32 %v487_v5, 0.0  ;;  %v609_v16 = vmax.f32 %v551_v6, 0.0 }
 0x108   : > { %v955_v17 = vpack.c.bf16 %v590_v9, %v590_v9  ;;  %v971_v18 = vpack.c.bf16 %v606_v10, %v606_v10  ;;  %v591_v19 = vmax.f32 %v479_v11, 0.0  ;;  %v607_v20 = vmax.f32 %v543_v12, 0.0 }
 0x109   : > { %753 = vst.msk [vmem:[%s1247_s17 + $0x18] sm:$0xf] %vm746_vm0, %v957_v13  ;;  %769 = vst.msk [vmem:[%s1247_s17 + $0x58] sm:$0xf] %vm746_vm0, %v973_v14  ;;  %v958_v21 = vpack.c.bf16 %v593_v15, %v593_v15  ;;  %v974_v22 = vpack.c.bf16 %v609_v16, %v609_v16 }
 0x10a   : > { %751 = vst.msk [vmem:[%s1247_s17 + $0x10] sm:$0xf] %vm746_vm0, %v955_v17  ;;  %767 = vst.msk [vmem:[%s1247_s17 + $0x50] sm:$0xf] %vm746_vm0, %v971_v18  ;;  %v956_v23 = vpack.c.bf16 %v591_v19, %v591_v19  ;;  %v972_v25 = vpack.c.bf16 %v607_v20, %v607_v20  ;;  %v1033_v26 = vpop.f32.mrb[8].mxu0  ;;  %v1049_v27 = vpop.f32.mrb[8].mxu1 }
 0x10b   : > { %754 = vst.msk [vmem:[%s1247_s17 + $0x1c] sm:$0xf] %vm746_vm0, %v958_v21  ;;  %770 = vst.msk [vmem:[%s1247_s17 + $0x5c] sm:$0xf] %vm746_vm0, %v974_v22  ;;  %v500_v28 = vadd.f32 %v1033_v26, %v1234_v24  ;;  %v564_v29 = vadd.f32 %v1049_v27, %v1234_v24  ;;  %v491_v30 = vpop.f32.mrb[9].mxu0  ;;  %v555_v31 = vpop.f32.mrb[9].mxu1 }
 0x10c   : > { %752 = vst.msk [vmem:[%s1247_s17 + $0x14] sm:$0xf] %vm746_vm0, %v956_v23  ;;  %768 = vst.msk [vmem:[%s1247_s17 + $0x54] sm:$0xf] %vm746_vm0, %v972_v25  ;;  %v492_v32 = vadd.f32 %v1234_v24, %v491_v30  ;;  %v556_v33 = vadd.f32 %v1234_v24, %v555_v31  ;;  %v1034_v34 = vpop.f32.mrb[10].mxu0  ;;  %v1050_v35 = vpop.f32.mrb[10].mxu1 }
 0x10d   : > { %v596_v36 = vmax.f32 %v500_v28, 0.0  ;;  %v612_v37 = vmax.f32 %v564_v29, 0.0  ;;  %v503_v38 = vadd.f32 %v1034_v34, %v1234_v24  ;;  %v567_v39 = vadd.f32 %v1050_v35, %v1234_v24  ;;  %v494_v40 = vpop.f32.mrb[11].mxu0  ;;  %v558_v41 = vpop.f32.mrb[11].mxu1 }
 0x10e   : > { %v594_v42 = vmax.f32 %v492_v32, 0.0  ;;  %v610_v43 = vmax.f32 %v556_v33, 0.0  ;;  %v495_v44 = vadd.f32 %v1234_v24, %v494_v40  ;;  %v559_v45 = vadd.f32 %v1234_v24, %v558_v41 }
 0x10f   : > { %v961_v46 = vpack.c.bf16 %v596_v36, %v596_v36  ;;  %v977_v47 = vpack.c.bf16 %v612_v37, %v612_v37  ;;  %v597_v48 = vmax.f32 %v503_v38, 0.0  ;;  %v613_v49 = vmax.f32 %v567_v39, 0.0 }
 0x110   : > { %v959_v50 = vpack.c.bf16 %v594_v42, %v594_v42  ;;  %v975_v51 = vpack.c.bf16 %v610_v43, %v610_v43  ;;  %v595_v52 = vmax.f32 %v495_v44, 0.0  ;;  %v611_v53 = vmax.f32 %v559_v45, 0.0 }
 0x111   : > { %757 = vst.msk [vmem:[%s1247_s17 + $0x28] sm:$0xf] %vm746_vm0, %v961_v46  ;;  %773 = vst.msk [vmem:[%s1247_s17 + $0x68] sm:$0xf] %vm746_vm0, %v977_v47  ;;  %v962_v54 = vpack.c.bf16 %v597_v48, %v597_v48  ;;  %v978_v55 = vpack.c.bf16 %v613_v49, %v613_v49 }
 0x112   : > { %755 = vst.msk [vmem:[%s1247_s17 + $0x20] sm:$0xf] %vm746_vm0, %v959_v50  ;;  %771 = vst.msk [vmem:[%s1247_s17 + $0x60] sm:$0xf] %vm746_vm0, %v975_v51  ;;  %v960_v56 = vpack.c.bf16 %v595_v52, %v595_v52  ;;  %v976_v57 = vpack.c.bf16 %v611_v53, %v611_v53  ;;  %v1037_v58 = vpop.f32.mrb[12].mxu0  ;;  %v1053_v59 = vpop.f32.mrb[12].mxu1 }
 0x113   : > { %758 = vst.msk [vmem:[%s1247_s17 + $0x2c] sm:$0xf] %vm746_vm0, %v962_v54  ;;  %774 = vst.msk [vmem:[%s1247_s17 + $0x6c] sm:$0xf] %vm746_vm0, %v978_v55  ;;  %v516_v60 = vadd.f32 %v1037_v58, %v1234_v24  ;;  %v580_v61 = vadd.f32 %v1053_v59, %v1234_v24  ;;  %v507_v62 = vpop.f32.mrb[13].mxu0  ;;  %v571_v63 = vpop.f32.mrb[13].mxu1 }
 0x114   : > { %756 = vst.msk [vmem:[%s1247_s17 + $0x24] sm:$0xf] %vm746_vm0, %v960_v56  ;;  %772 = vst.msk [vmem:[%s1247_s17 + $0x64] sm:$0xf] %vm746_vm0, %v976_v57  ;;  %v508_v0 = vadd.f32 %v1234_v24, %v507_v62  ;;  %v572_v1 = vadd.f32 %v1234_v24, %v571_v63  ;;  %v1038_v2 = vpop.f32.mrb[14].mxu0  ;;  %v1054_v3 = vpop.f32.mrb[14].mxu1 }
 0x115   : > { %v600_v4 = vmax.f32 %v516_v60, 0.0  ;;  %v616_v5 = vmax.f32 %v580_v61, 0.0  ;;  %v519_v6 = vadd.f32 %v1038_v2, %v1234_v24  ;;  %v583_v7 = vadd.f32 %v1054_v3, %v1234_v24  ;;  %v510_v8 = vpop.f32.mrb[15].mxu0  ;;  %v574_v9 = vpop.f32.mrb[15].mxu1 }
 0x116   : > { %v598_v10 = vmax.f32 %v508_v0, 0.0  ;;  %v614_v11 = vmax.f32 %v572_v1, 0.0  ;;  %v511_v12 = vadd.f32 %v1234_v24, %v510_v8  ;;  %v575_v13 = vadd.f32 %v1234_v24, %v574_v9 }
 0x117   : > { %v965_v14 = vpack.c.bf16 %v600_v4, %v600_v4  ;;  %v981_v15 = vpack.c.bf16 %v616_v5, %v616_v5  ;;  %v601_v16 = vmax.f32 %v519_v6, 0.0  ;;  %v617_v17 = vmax.f32 %v583_v7, 0.0 }
 0x118   : > { %v963_v18 = vpack.c.bf16 %v598_v10, %v598_v10  ;;  %v979_v19 = vpack.c.bf16 %v614_v11, %v614_v11  ;;  %v599_v20 = vmax.f32 %v511_v12, 0.0  ;;  %v615_v21 = vmax.f32 %v575_v13, 0.0 }
 0x119   : > { %761 = vst.msk [vmem:[%s1247_s17 + $0x38] sm:$0xf] %vm746_vm0, %v965_v14  ;;  %777 = vst.msk [vmem:[%s1247_s17 + $0x78] sm:$0xf] %vm746_vm0, %v981_v15  ;;  %v966_v22 = vpack.c.bf16 %v601_v16, %v601_v16  ;;  %v982_v23 = vpack.c.bf16 %v617_v17, %v617_v17 }
 0x11a   : > { %759 = vst.msk [vmem:[%s1247_s17 + $0x30] sm:$0xf] %vm746_vm0, %v963_v18  ;;  %775 = vst.msk [vmem:[%s1247_s17 + $0x70] sm:$0xf] %vm746_vm0, %v979_v19  ;;  %v964_v24 = vpack.c.bf16 %v599_v20, %v599_v20  ;;  %v980_v25 = vpack.c.bf16 %v615_v21, %v615_v21 }
 0x11b   : > { %762 = vst.msk [vmem:[%s1247_s17 + $0x3c] sm:$0xf] %vm746_vm0, %v966_v22  ;;  %778 = vst.msk [vmem:[%s1247_s17 + $0x7c] sm:$0xf] %vm746_vm0, %v982_v23 }
 0x11c   : > { %760 = vst.msk [vmem:[%s1247_s17 + $0x34] sm:$0xf] %vm746_vm0, %v964_v24  ;;  %776 = vst.msk [vmem:[%s1247_s17 + $0x74] sm:$0xf] %vm746_vm0, %v980_v25 }
 0x11d PF: > { %s13_s14 = sadd.s32 1, %s1141_s14   ;;  %s1352_s12 = smov %s1137_s13 }
 0x11e   : > { %p10_p5 = scmp.ge.s32.totalorder %s13_s14, 4   ;;  %s1353_s13 = smov %s1355_s15 }
 0x120   :  { %12 = sbr.rel (!%p10_p5) target bundleno = 2 (0x2), region = 68 }

// kernel: cvae_forward.8
= control target key start
LH: loop header
LB: loop body
LE: loop exit
PB: predicated region body
PF: predicated region fallthrough
CT: control target
= control target key end

     0   :  { %s1153_s12 = smov 0   ;;  %s1155_s13 = smov 0   ;;  %s1338_s0 = inlined_call_operand.vmem [shape: bf16[128,512], index: 0, kind: input, shape index: {}]   ;;  %s1339_s1 = inlined_call_operand.vmem [shape: bf16[512,64], index: 1, kind: input, shape index: {}]   ;;  %s1340_s2 = inlined_call_operand.vmem [shape: f32[1,64], index: 2, kind: input, shape index: {}]   ;;  %s1341_s3 = inlined_call_operand.vmem [shape: bf16[128,64], index: 3, kind: output, shape index: {}]  }
   0x1   :  { %s1157_s14 = smov 0  }
   0x2 LB: > { %s25_s15 = sadd.s32 1, %s1127_s13  ;;  %p875_p0 = scmp.ge.s32.totalorder %s1131_s14, 1  ;;  %s1131_s14 = sphi %s1157_s14, %s13_s14   ;;  %s1127_s13 = sphi %s1155_s13, %s1343_s13   ;;  %s1123_s12 = sphi %s1153_s12, %s1342_s12  }
   0x3   : > { %p27_p1 = scmp.ge.s32.totalorder %s25_s15, 2  ;;  %p170_p2 = scmp.lt.s32.totalorder %s1131_s14, 3 }
   0x5   : > { %s1345_s15 = smov (%p27_p1, %s25_s15), 0  ;;  %p171_p3 = pnand %p875_p0, %p170_p2 }
   0x6   : > { %v1053_v0 = vld [vmem:[%s1339_s1 + $0x40] sm:$0xff] (!%p171_p3)   ;;  %v1057_v4 = vld [vmem:[%s1339_s1 + $0x48] sm:$0xff] (!%p171_p3)   ;;  %v1061_v8 = vld [vmem:[%s1339_s1 + $0x50] sm:$0xff] (!%p171_p3)   ;;  %s876_s25 = sshll.u32 (!%p171_p3), %s1123_s12, 3  ;;  %vm758_vm0 = vcmask (!%p171_p3), 519168  }
   0x7   : > { %174 = sbr.rel (%p171_p3) target bundleno = 290 (0x122), region = 32  ;;  %v1054_v1 = vld [vmem:[%s1339_s1 + $0xc0] sm:$0xff] (!%p171_p3)   ;;  %949 = vmatprep.subr.bf16.mxu0 (!%p171_p3), %v1053_v0  ;;  %v1058_v5 = vld [vmem:[%s1339_s1 + $0xc8] sm:$0xff] (!%p171_p3)   ;;  %v1062_v9 = vld [vmem:[%s1339_s1 + $0xd0] sm:$0xff] (!%p171_p3)   ;;  %p206_p4 = scmp.lt.s32.totalorder (!%p171_p3), %s876_s25, 15 }
   0x8   : > { %v1055_v2 = vld [vmem:[%s1339_s1] sm:$0xff] (!%p171_p3)   ;;  %989 = vmatprep.subr.bf16.mxu1 (!%p171_p3), %v1054_v1  ;;  %v1059_v6 = vld [vmem:[%s1339_s1 + $0x8] sm:$0xff] (!%p171_p3)   ;;  %v1063_v10 = vld [vmem:[%s1339_s1 + $0x10] sm:$0xff] (!%p171_p3)  }
   0x9   : > { %v1056_v3 = vld [vmem:[%s1339_s1 + $0x80] sm:$0xff] (!%p171_p3)   ;;  %950 = vmatpush3.bf16.msra.mxu0 (!%p171_p3), %v1055_v2  ;;  %v1060_v7 = vld [vmem:[%s1339_s1 + $0x88] sm:$0xff] (!%p171_p3)   ;;  %v1064_v11 = vld [vmem:[%s1339_s1 + $0x90] sm:$0xff] (!%p171_p3)  }
   0xa   : > { %990 = vmatpush3.bf16.msra.mxu1 (!%p171_p3), %v1056_v3  ;;  %951 = vmatprep.subr.bf16.mxu0 (!%p171_p3), %v1057_v4  ;;  %v1065_v12 = vld [vmem:[%s1339_s1 + $0x58] sm:$0xff] (!%p171_p3)   ;;  %v1069_v16 = vld [vmem:[%s1339_s1 + $0x60] sm:$0xff] (!%p171_p3)   ;;  %v1073_v20 = vld [vmem:[%s1339_s1 + $0x68] sm:$0xff] (!%p171_p3)  }
   0xb   : > { %991 = vmatprep.subr.bf16.mxu1 (!%p171_p3), %v1058_v5  ;;  %v1066_v13 = vld [vmem:[%s1339_s1 + $0xd8] sm:$0xff] (!%p171_p3)   ;;  %v1070_v17 = vld [vmem:[%s1339_s1 + $0xe0] sm:$0xff] (!%p171_p3)   ;;  %v1074_v21 = vld [vmem:[%s1339_s1 + $0xe8] sm:$0xff] (!%p171_p3)  }
   0xc   : > { %v1067_v14 = vld [vmem:[%s1339_s1 + $0x18] sm:$0xff] (!%p171_p3)   ;;  %v1071_v18 = vld [vmem:[%s1339_s1 + $0x20] sm:$0xff] (!%p171_p3)   ;;  %v1075_v22 = vld [vmem:[%s1339_s1 + $0x28] sm:$0xff] (!%p171_p3)  }
   0xd   : > { %952 = vmatpush3.bf16.msra.mxu0 (!%p171_p3), %v1059_v6  ;;  %v1068_v15 = vld [vmem:[%s1339_s1 + $0x98] sm:$0xff] (!%p171_p3)   ;;  %v1072_v19 = vld [vmem:[%s1339_s1 + $0xa0] sm:$0xff] (!%p171_p3)   ;;  %v1076_v23 = vld [vmem:[%s1339_s1 + $0xa8] sm:$0xff] (!%p171_p3)  }
   0xe   : > { %992 = vmatpush3.bf16.msra.mxu1 %v1060_v7  ;;  %953 = vmatprep.subr.bf16.mxu0 %v1061_v8  ;;  %s1347_s25 = smov (!%p206_p4, %s876_s25), 15  ;;  %v1077_v24 = vld [vmem:[%s1339_s1 + $0x70] sm:$0xff]   ;;  %v1081_v28 = vld [vmem:[%s1339_s1 + $0x78] sm:$0xff]   ;;  %v1297_v50 = vld [vmem:[%s1340_s2] ss:$0 sm:$0xff] }
   0xf   : > { %993 = vmatprep.subr.bf16.mxu1 %v1062_v9  ;;  %v1078_v25 = vld [vmem:[%s1339_s1 + $0xf0] sm:$0xff]   ;;  %s940_s24 = sshll.u32 %s1347_s25, 4  ;;  %v1082_v29 = vld [vmem:[%s1339_s1 + $0xf8] sm:$0xff]   ;;  %s880_s17 = sshll.u32 %s1347_s25, 2 }
  0x10   : > { %v1079_v26 = vld [vmem:[%s1339_s1 + $0x30] sm:$0xff]   ;;  %s1270_s12 = scalar_lea.vmem %s1338_s0, %s940_s24  ;;  %v1083_v30 = vld [vmem:[%s1339_s1 + $0x38] sm:$0xff]   ;;  %s1305_s20 = scalar_lea.vmem %s1341_s3, %s880_s17 }
  0x11   : > { %954 = vmatpush3.bf16.msra.mxu0 %v1063_v10  ;;  %v1080_v27 = vld [vmem:[%s1339_s1 + $0xb0] sm:$0xff]   ;;  %v1084_v31 = vld [vmem:[%s1339_s1 + $0xb8] sm:$0xff]  }
  0x12   : > { %994 = vmatpush3.bf16.msra.mxu1 %v1064_v11  ;;  %955 = vmatprep.subr.bf16.mxu0 %v1065_v12  ;;  %v1085_v32 = vld [vmem:[%s1270_s12] ss:$16 sps:$4 sm:$0xff]   ;;  %v1087_v33 = vld [vmem:[%s1270_s12 + $0x4] ss:$16 sps:$4 sm:$0xff]   ;;  %v1088_v34 = vld [vmem:[%s1270_s12 + $0x8] ss:$16 sps:$4 sm:$0xff]  }
  0x13   : > { %995 = vmatprep.subr.bf16.mxu1 %v1066_v13  ;;  %v1090_v35 = vld [vmem:[%s1270_s12 + $0xc] ss:$16 sps:$4 sm:$0xff]   ;;  %620 = vmatprep.mubr.bf16.mxu0 %v1087_v33  ;;  %v1091_v36 = vld [vmem:[%s1270_s12 + $0x24] ss:$16 sps:$4 sm:$0xff]   ;;  %v1095_v38 = vld [vmem:[%s1270_s12 + $0x20] ss:$16 sps:$4 sm:$0xff]  }
  0x14   : > { %685 = vmatprep.mubr.bf16.mxu1 %v1090_v35  ;;  %v1093_v37 = vld [vmem:[%s1270_s12 + $0x2c] ss:$16 sps:$4 sm:$0xff]   ;;  %v1096_v39 = vld [vmem:[%s1270_s12 + $0x28] ss:$16 sps:$4 sm:$0xff]   ;;  %v1097_v40 = vld [vmem:[%s1270_s12 + $0x44] ss:$16 sps:$4 sm:$0xff]  }
  0x15   : > { %956 = vmatpush3.bf16.msra.mxu0 %v1067_v14  ;;  %v1099_v41 = vld [vmem:[%s1270_s12 + $0x4c] ss:$16 sps:$4 sm:$0xff]   ;;  %v1101_v42 = vld [vmem:[%s1270_s12 + $0x40] ss:$16 sps:$4 sm:$0xff]   ;;  %v1102_v43 = vld [vmem:[%s1270_s12 + $0x48] ss:$16 sps:$4 sm:$0xff]  }
  0x16   : > { %996 = vmatpush3.bf16.msra.mxu1 %v1068_v15  ;;  %957 = vmatprep.subr.bf16.mxu0 %v1069_v16  ;;  %v1103_v44 = vld [vmem:[%s1270_s12 + $0x64] ss:$16 sps:$4 sm:$0xff]   ;;  %v1105_v45 = vld [vmem:[%s1270_s12 + $0x6c] ss:$16 sps:$4 sm:$0xff]   ;;  %v1107_v46 = vld [vmem:[%s1270_s12 + $0x60] ss:$16 sps:$4 sm:$0xff]  }
  0x17   : > { %997 = vmatprep.subr.bf16.mxu1 %v1070_v17  ;;  %v1108_v47 = vld [vmem:[%s1270_s12 + $0x68] ss:$16 sps:$4 sm:$0xff]  }
  0x19   : > { %958 = vmatpush3.bf16.msra.mxu0 %v1071_v18 }
  0x1a   : > { %998 = vmatpush3.bf16.msra.mxu1 %v1072_v19  ;;  %959 = vmatprep.subr.bf16.mxu0 %v1073_v20 }
  0x1b   : > { %999 = vmatprep.subr.bf16.mxu1 %v1074_v21 }
  0x1d   : > { %960 = vmatpush3.bf16.msra.mxu0 %v1075_v22 }
  0x1e   : > { %1000 = vmatpush3.bf16.msra.mxu1 %v1076_v23  ;;  %961 = vmatprep.subr.bf16.mxu0 %v1077_v24 }
  0x1f   : > { %1001 = vmatprep.subr.bf16.mxu1 %v1078_v25 }
  0x21   : > { %962 = vmatpush3.bf16.msra.mxu0 %v1079_v26 }
  0x22   : > { %1002 = vmatpush3.bf16.msra.mxu1 %v1080_v27  ;;  %963 = vmatprep.subr.bf16.mxu0 %v1081_v28 }
  0x23   : > { %1003 = vmatprep.subr.bf16.mxu1 %v1082_v29 }
  0x25   : > { %964 = vmatpush3.bf16.msra.mxu0 %v1083_v30 }
  0x26   : > { %1004 = vmatpush3.bf16.msra.mxu1 %v1084_v31 }
  0x28   : > { %621 = vmatmul.mubr.bf16.vlgmr.msra.gmra.mrb[0].mxu0 %v1085_v32 }
  0x29   : > { %686 = vmatmul.mubr.bf16.vlgmr.msra.gmra.mrb[0].mxu1 %v1088_v34  ;;  %628 = vmatprep.mubr.bf16.mxu0 %v1091_v36 }
  0x2a   : > { %693 = vmatprep.mubr.bf16.mxu1 %v1093_v37 }
  0x30   : > { %629 = vmatmul.mubr.bf16.gmra.mrb[4].mxu0 %v1095_v38 }
  0x31   : > { %694 = vmatmul.mubr.bf16.gmra.mrb[4].mxu1 %v1096_v39  ;;  %636 = vmatprep.mubr.bf16.mxu0 %v1097_v40 }
  0x32   : > { %701 = vmatprep.mubr.bf16.mxu1 %v1099_v41 }
  0x38   : > { %637 = vmatmul.mubr.bf16.gmra.mrb[8].mxu0 %v1101_v42 }
  0x39   : > { %702 = vmatmul.mubr.bf16.gmra.mrb[8].mxu1 %v1102_v43  ;;  %644 = vmatprep.mubr.bf16.mxu0 %v1103_v44 }
  0x3a   : > { %709 = vmatprep.mubr.bf16.mxu1 %v1105_v45 }
  0x40   : > { %645 = vmatmul.mubr.bf16.gmra.mrb[12].mxu0 %v1107_v46 }
  0x41   : > { %710 = vmatmul.mubr.bf16.gmra.mrb[12].mxu1 %v1108_v47 }
  0xfb   : > { %v965_v48 = vpop.f32.mrb[0].mxu0 }
  0xfc   : > { %v1005_v49 = vpop.f32.mrb[0].mxu1  ;;  %v966_v51 = vpop.f32.mrb[1].mxu0 }
  0xfd   : > { %v967_v52 = vadd.f32 %v966_v51, %v965_v48  ;;  %v1006_v53 = vpop.f32.mrb[1].mxu1  ;;  %v968_v54 = vpop.f32.mrb[2].mxu0 }
  0xfe   : > { %v1007_v55 = vadd.f32 %v1006_v53, %v1005_v49  ;;  %v1008_v56 = vpop.f32.mrb[2].mxu1  ;;  %v969_v57 = vpop.f32.mrb[3].mxu0 }
  0xff   : > { %v623_v58 = vadd.f32 %v967_v52, %v1297_v50  ;;  %v970_v59 = vadd.f32 %v969_v57, %v968_v54  ;;  %v1009_v60 = vpop.f32.mrb[3].mxu1 }
 0x100   : > { %v1010_v61 = vadd.f32 %v1009_v60, %v1008_v56 }
 0x101   : > { %v688_v62 = vadd.f32 %v1007_v55, %v623_v58  ;;  %v626_v63 = vadd.f32 %v970_v59, %v1297_v50 }
 0x103   : > { %v718_v0 = vmax.f32 %v688_v62, 0.0  ;;  %v691_v1 = vadd.f32 %v1010_v61, %v626_v63  ;;  %v971_v2 = vpop.f32.mrb[4].mxu0 }
 0x104   : > { %v1011_v3 = vpop.f32.mrb[4].mxu1  ;;  %v972_v4 = vpop.f32.mrb[5].mxu0 }
 0x105   : > { %v941_v5 = vpack.c.bf16 %v718_v0, %v718_v0  ;;  %v719_v6 = vmax.f32 %v691_v1, 0.0  ;;  %v973_v7 = vadd.f32 %v972_v4, %v971_v2  ;;  %v1012_v8 = vpop.f32.mrb[5].mxu1  ;;  %v974_v9 = vpop.f32.mrb[6].mxu0 }
 0x106   : > { %v1013_v10 = vadd.f32 %v1012_v8, %v1011_v3  ;;  %v1014_v11 = vpop.f32.mrb[6].mxu1  ;;  %v975_v12 = vpop.f32.mrb[7].mxu0 }
 0x107   : > { %759 = vst.msk [vmem:[%s1305_s20] sm:$0xf] %vm758_vm0, %v941_v5  ;;  %v942_v13 = vpack.c.bf16 %v719_v6, %v719_v6  ;;  %v631_v14 = vadd.f32 %v973_v7, %v1297_v50  ;;  %v976_v15 = vadd.f32 %v975_v12, %v974_v9  ;;  %v1015_v16 = vpop.f32.mrb[7].mxu1 }
 0x108   : > { %v1016_v17 = vadd.f32 %v1015_v16, %v1014_v11 }
 0x109   : > { %760 = vst.msk [vmem:[%s1305_s20 + $0x4] sm:$0xf] %vm758_vm0, %v942_v13  ;;  %v696_v18 = vadd.f32 %v1013_v10, %v631_v14  ;;  %v634_v19 = vadd.f32 %v976_v15, %v1297_v50 }
 0x10b   : > { %v720_v20 = vmax.f32 %v696_v18, 0.0  ;;  %v699_v21 = vadd.f32 %v1016_v17, %v634_v19  ;;  %v977_v22 = vpop.f32.mrb[8].mxu0 }
 0x10c   : > { %v1017_v23 = vpop.f32.mrb[8].mxu1  ;;  %v978_v24 = vpop.f32.mrb[9].mxu0 }
 0x10d   : > { %v943_v25 = vpack.c.bf16 %v720_v20, %v720_v20  ;;  %v721_v26 = vmax.f32 %v699_v21, 0.0  ;;  %v979_v27 = vadd.f32 %v978_v24, %v977_v22  ;;  %v1018_v28 = vpop.f32.mrb[9].mxu1  ;;  %v980_v29 = vpop.f32.mrb[10].mxu0 }
 0x10e   : > { %v1019_v30 = vadd.f32 %v1018_v28, %v1017_v23  ;;  %v1020_v31 = vpop.f32.mrb[10].mxu1  ;;  %v981_v32 = vpop.f32.mrb[11].mxu0 }
 0x10f   : > { %761 = vst.msk [vmem:[%s1305_s20 + $0x8] sm:$0xf] %vm758_vm0, %v943_v25  ;;  %v944_v33 = vpack.c.bf16 %v721_v26, %v721_v26  ;;  %v639_v34 = vadd.f32 %v979_v27, %v1297_v50  ;;  %v982_v35 = vadd.f32 %v981_v32, %v980_v29  ;;  %v1021_v36 = vpop.f32.mrb[11].mxu1 }
 0x110   : > { %v1022_v37 = vadd.f32 %v1021_v36, %v1020_v31 }
 0x111   : > { %762 = vst.msk [vmem:[%s1305_s20 + $0xc] sm:$0xf] %vm758_vm0, %v944_v33  ;;  %v704_v38 = vadd.f32 %v1019_v30, %v639_v34  ;;  %v642_v39 = vadd.f32 %v982_v35, %v1297_v50 }
 0x113   : > { %v722_v40 = vmax.f32 %v704_v38, 0.0  ;;  %v707_v41 = vadd.f32 %v1022_v37, %v642_v39  ;;  %v983_v42 = vpop.f32.mrb[12].mxu0 }
 0x114   : > { %v1023_v43 = vpop.f32.mrb[12].mxu1  ;;  %v984_v44 = vpop.f32.mrb[13].mxu0 }
 0x115   : > { %v945_v45 = vpack.c.bf16 %v722_v40, %v722_v40  ;;  %v723_v46 = vmax.f32 %v707_v41, 0.0  ;;  %v985_v47 = vadd.f32 %v984_v44, %v983_v42  ;;  %v1024_v48 = vpop.f32.mrb[13].mxu1  ;;  %v986_v49 = vpop.f32.mrb[14].mxu0 }
 0x116   : > { %v1025_v51 = vadd.f32 %v1024_v48, %v1023_v43  ;;  %v1026_v52 = vpop.f32.mrb[14].mxu1  ;;  %v987_v53 = vpop.f32.mrb[15].mxu0 }
 0x117   : > { %763 = vst.msk [vmem:[%s1305_s20 + $0x10] sm:$0xf] %vm758_vm0, %v945_v45  ;;  %v946_v54 = vpack.c.bf16 %v723_v46, %v723_v46  ;;  %v647_v55 = vadd.f32 %v985_v47, %v1297_v50  ;;  %v988_v56 = vadd.f32 %v987_v53, %v986_v49  ;;  %v1027_v57 = vpop.f32.mrb[15].mxu1 }
 0x118   : > { %v1028_v58 = vadd.f32 %v1027_v57, %v1026_v52 }
 0x119   : > { %764 = vst.msk [vmem:[%s1305_s20 + $0x14] sm:$0xf] %vm758_vm0, %v946_v54  ;;  %v712_v59 = vadd.f32 %v1025_v51, %v647_v55  ;;  %v650_v60 = vadd.f32 %v988_v56, %v1297_v50 }
 0x11b   : > { %v724_v61 = vmax.f32 %v712_v59, 0.0  ;;  %v715_v62 = vadd.f32 %v1028_v58, %v650_v60 }
 0x11d   : > { %v947_v63 = vpack.c.bf16 %v724_v61, %v724_v61  ;;  %v725_v0 = vmax.f32 %v715_v62, 0.0 }
 0x11f   : > { %765 = vst.msk [vmem:[%s1305_s20 + $0x18] sm:$0xf] %vm758_vm0, %v947_v63  ;;  %v948_v1 = vpack.c.bf16 %v725_v0, %v725_v0 }
 0x121   : > { %766 = vst.msk [vmem:[%s1305_s20 + $0x1c] sm:$0xf] %vm758_vm0, %v948_v1 }
 0x122 PF: > { %s13_s14 = sadd.s32 1, %s1131_s14   ;;  %s1342_s12 = smov %s1127_s13 }
 0x123   : > { %p10_p5 = scmp.ge.s32.totalorder %s13_s14, 4   ;;  %s1343_s13 = smov %s1345_s15 }
 0x125   :  { %12 = sbr.rel (!%p10_p5) target bundleno = 2 (0x2), region = 68 }

// kernel: cvae_forward.9
= control target key start
LH: loop header
LB: loop body
LE: loop exit
PB: predicated region body
PF: predicated region fallthrough
CT: control target
= control target key end

     0   :  { %s1399_s1 = inlined_call_operand.vmem [shape: bf16[1024,128], index: 1, kind: input, shape index: {}]   ;;  %s1400_s0 = inlined_call_operand.vmem [shape: bf16[32,1024], index: 0, kind: input, shape index: {}]   ;;  %s1401_s2 = inlined_call_operand.vmem [shape: f32[1,128], index: 2, kind: input, shape index: {}]   ;;  %s1402_s3 = inlined_call_operand.vmem [shape: bf16[32,128], index: 3, kind: output, shape index: {}]  }
   0x1   :  { %v1066_v0 = vld [vmem:[%s1399_s1 + $0x40] sm:$0xff]   ;;  %v1070_v4 = vld [vmem:[%s1399_s1 + $0x48] sm:$0xff]   ;;  %v1074_v8 = vld [vmem:[%s1399_s1 + $0x50] sm:$0xff]  }
   0x2   :  { %v1067_v1 = vld [vmem:[%s1399_s1 + $0xc0] sm:$0xff]   ;;  %954 = vmatprep.subr.bf16.mxu0 %v1066_v0  ;;  %v1071_v5 = vld [vmem:[%s1399_s1 + $0xc8] sm:$0xff]   ;;  %v1075_v9 = vld [vmem:[%s1399_s1 + $0xd0] sm:$0xff]  }
   0x3   :  { %v1068_v2 = vld [vmem:[%s1399_s1] sm:$0xff]   ;;  %982 = vmatprep.subr.bf16.mxu1 %v1067_v1  ;;  %v1072_v6 = vld [vmem:[%s1399_s1 + $0x8] sm:$0xff]   ;;  %v1076_v10 = vld [vmem:[%s1399_s1 + $0x10] sm:$0xff]  }
   0x4   :  { %v1069_v3 = vld [vmem:[%s1399_s1 + $0x80] sm:$0xff]   ;;  %955 = vmatpush3.bf16.msra.mxu0 %v1068_v2  ;;  %v1073_v7 = vld [vmem:[%s1399_s1 + $0x88] sm:$0xff]   ;;  %v1077_v11 = vld [vmem:[%s1399_s1 + $0x90] sm:$0xff]  }
   0x5   :  { %983 = vmatpush3.bf16.msra.mxu1 %v1069_v3  ;;  %956 = vmatprep.subr.bf16.mxu0 %v1070_v4  ;;  %v1078_v12 = vld [vmem:[%s1399_s1 + $0x58] sm:$0xff]   ;;  %v1082_v16 = vld [vmem:[%s1399_s1 + $0x60] sm:$0xff]   ;;  %v1086_v20 = vld [vmem:[%s1399_s1 + $0x68] sm:$0xff]  }
   0x6   :  { %984 = vmatprep.subr.bf16.mxu1 %v1071_v5  ;;  %v1079_v13 = vld [vmem:[%s1399_s1 + $0xd8] sm:$0xff]   ;;  %v1083_v17 = vld [vmem:[%s1399_s1 + $0xe0] sm:$0xff]   ;;  %v1087_v21 = vld [vmem:[%s1399_s1 + $0xe8] sm:$0xff]  }
   0x7   :  { %v1080_v14 = vld [vmem:[%s1399_s1 + $0x18] sm:$0xff]   ;;  %v1084_v18 = vld [vmem:[%s1399_s1 + $0x20] sm:$0xff]   ;;  %v1088_v22 = vld [vmem:[%s1399_s1 + $0x28] sm:$0xff]  }
   0x8   :  { %957 = vmatpush3.bf16.msra.mxu0 %v1072_v6  ;;  %v1081_v15 = vld [vmem:[%s1399_s1 + $0x98] sm:$0xff]   ;;  %v1085_v19 = vld [vmem:[%s1399_s1 + $0xa0] sm:$0xff]   ;;  %v1089_v23 = vld [vmem:[%s1399_s1 + $0xa8] sm:$0xff]  }
   0x9   :  { %985 = vmatpush3.bf16.msra.mxu1 %v1073_v7  ;;  %958 = vmatprep.subr.bf16.mxu0 %v1074_v8  ;;  %v1090_v24 = vld [vmem:[%s1399_s1 + $0x70] sm:$0xff]   ;;  %v1094_v28 = vld [vmem:[%s1399_s1 + $0x78] sm:$0xff]   ;;  %v15_v32 = vld [vmem:[%s1400_s0] sm:$0xff] }
   0xa   :  { %986 = vmatprep.subr.bf16.mxu1 %v1075_v9  ;;  %v1091_v25 = vld [vmem:[%s1399_s1 + $0xf0] sm:$0xff]   ;;  %v1095_v29 = vld [vmem:[%s1399_s1 + $0xf8] sm:$0xff]   ;;  %v19_v33 = vld [vmem:[%s1400_s0 + $0x20] sm:$0xff] }
   0xb   :  { %v1092_v26 = vld [vmem:[%s1399_s1 + $0x30] sm:$0xff]   ;;  %v1096_v30 = vld [vmem:[%s1399_s1 + $0x38] sm:$0xff]   ;;  %v16_v34 = vld [vmem:[%s1400_s0 + $0x8] sm:$0xff]  ;;  %v855_v35 = vcombine.low %v15_v32, %v19_v33  ;;  %v856_v36 = vcombine.high %v15_v32, %v19_v33 }
   0xc   :  { %959 = vmatpush3.bf16.msra.mxu0 %v1076_v10  ;;  %v1093_v27 = vld [vmem:[%s1399_s1 + $0xb0] sm:$0xff]   ;;  %v1097_v31 = vld [vmem:[%s1399_s1 + $0xb8] sm:$0xff]   ;;  %v20_v37 = vld [vmem:[%s1400_s0 + $0x28] sm:$0xff] }
   0xd   :  { %987 = vmatpush3.bf16.msra.mxu1 %v1077_v11  ;;  %960 = vmatprep.subr.bf16.mxu0 %v1078_v12  ;;  %v857_v38 = vcombine.low %v16_v34, %v20_v37  ;;  %v858_v39 = vcombine.high %v16_v34, %v20_v37  ;;  %v1098_v40 = vld [vmem:[%s1399_s1 + $0x140] sm:$0xff]   ;;  %v1102_v44 = vld [vmem:[%s1399_s1 + $0x148] sm:$0xff]   ;;  %v1106_v48 = vld [vmem:[%s1399_s1 + $0x150] sm:$0xff]  }
   0xe   :  { %988 = vmatprep.subr.bf16.mxu1 %v1079_v13  ;;  %662 = vmatprep.mubr.bf16.mxu0 %v856_v36  ;;  %v1099_v41 = vld [vmem:[%s1399_s1 + $0x1c0] sm:$0xff]   ;;  %v1103_v45 = vld [vmem:[%s1399_s1 + $0x1c8] sm:$0xff]   ;;  %v1107_v49 = vld [vmem:[%s1399_s1 + $0x1d0] sm:$0xff]  }
   0xf   :  { %711 = vmatprep.mubr.bf16.mxu1 %v858_v39  ;;  %v1100_v42 = vld [vmem:[%s1399_s1 + $0x100] sm:$0xff]   ;;  %v1104_v46 = vld [vmem:[%s1399_s1 + $0x108] sm:$0xff]   ;;  %v1108_v50 = vld [vmem:[%s1399_s1 + $0x110] sm:$0xff]  }
  0x10   :  { %961 = vmatpush3.bf16.msra.mxu0 %v1080_v14  ;;  %v1101_v43 = vld [vmem:[%s1399_s1 + $0x180] sm:$0xff]   ;;  %v1105_v47 = vld [vmem:[%s1399_s1 + $0x188] sm:$0xff]   ;;  %v1109_v51 = vld [vmem:[%s1399_s1 + $0x190] sm:$0xff]  }
  0x11   :  { %989 = vmatpush3.bf16.msra.mxu1 %v1081_v15  ;;  %962 = vmatprep.subr.bf16.mxu0 %v1082_v16  ;;  %v1110_v52 = vld [vmem:[%s1399_s1 + $0x158] sm:$0xff]   ;;  %v1114_v56 = vld [vmem:[%s1399_s1 + $0x160] sm:$0xff]   ;;  %v1118_v63 = vld [vmem:[%s1399_s1 + $0x168] sm:$0xff]  }
  0x12   :  { %990 = vmatprep.subr.bf16.mxu1 %v1083_v17  ;;  %v1111_v53 = vld [vmem:[%s1399_s1 + $0x1d8] sm:$0xff]   ;;  %v1115_v57 = vld [vmem:[%s1399_s1 + $0x1e0] sm:$0xff]   ;;  %v1119_v1 = vld [vmem:[%s1399_s1 + $0x1e8] sm:$0xff]  }
  0x13   :  { %v1112_v54 = vld [vmem:[%s1399_s1 + $0x118] sm:$0xff]   ;;  %v1116_v58 = vld [vmem:[%s1399_s1 + $0x120] sm:$0xff]   ;;  %v1120_v2 = vld [vmem:[%s1399_s1 + $0x128] sm:$0xff]  }
  0x14   :  { %963 = vmatpush3.bf16.msra.mxu0 %v1084_v18  ;;  %v1113_v55 = vld [vmem:[%s1399_s1 + $0x198] sm:$0xff]   ;;  %v1117_v59 = vld [vmem:[%s1399_s1 + $0x1a0] sm:$0xff]   ;;  %v1121_v3 = vld [vmem:[%s1399_s1 + $0x1a8] sm:$0xff]  }
  0x15   :  { %991 = vmatpush3.bf16.msra.mxu1 %v1085_v19  ;;  %964 = vmatprep.subr.bf16.mxu0 %v1086_v20  ;;  %v23_v60 = vld [vmem:[%s1400_s0 + $0x40] sm:$0xff]  ;;  %v24_v4 = vld [vmem:[%s1400_s0 + $0x48] sm:$0xff]  ;;  %v1122_v8 = vld [vmem:[%s1399_s1 + $0x170] sm:$0xff]  }
  0x16   :  { %992 = vmatprep.subr.bf16.mxu1 %v1087_v21  ;;  %v27_v61 = vld [vmem:[%s1400_s0 + $0x60] sm:$0xff]  ;;  %v28_v5 = vld [vmem:[%s1400_s0 + $0x68] sm:$0xff]  ;;  %v1123_v9 = vld [vmem:[%s1399_s1 + $0x1f0] sm:$0xff]  }
  0x17   :  { %v864_v62 = vcombine.high %v23_v60, %v27_v61  ;;  %v863_v0 = vcombine.low %v23_v60, %v27_v61  ;;  %v866_v6 = vcombine.high %v24_v4, %v28_v5  ;;  %v865_v7 = vcombine.low %v24_v4, %v28_v5  ;;  %v1124_v10 = vld [vmem:[%s1399_s1 + $0x130] sm:$0xff]   ;;  %v1126_v12 = vld [vmem:[%s1399_s1 + $0x178] sm:$0xff]   ;;  %v854_v34 = vld [vmem:[%s1401_s2] ss:$0 sm:$0xff] }
  0x18   :  { %965 = vmatpush3.bf16.msra.mxu0 %v1088_v22  ;;  %v1125_v11 = vld [vmem:[%s1399_s1 + $0x1b0] sm:$0xff]   ;;  %v1127_v13 = vld [vmem:[%s1399_s1 + $0x1f8] sm:$0xff]  }
  0x19   :  { %993 = vmatpush3.bf16.msra.mxu1 %v1089_v23  ;;  %966 = vmatprep.subr.bf16.mxu0 %v1090_v24  ;;  %v1128_v14 = vld [vmem:[%s1399_s1 + $0x138] sm:$0xff]   ;;  %v17_v16 = vld [vmem:[%s1400_s0 + $0x10] sm:$0xff] }
  0x1a   :  { %994 = vmatprep.subr.bf16.mxu1 %v1091_v25  ;;  %v1129_v15 = vld [vmem:[%s1399_s1 + $0x1b8] sm:$0xff]   ;;  %v21_v17 = vld [vmem:[%s1400_s0 + $0x30] sm:$0xff] }
  0x1b   :  { %v18_v18 = vld [vmem:[%s1400_s0 + $0x18] sm:$0xff]  ;;  %v859_v20 = vcombine.low %v17_v16, %v21_v17  ;;  %v860_v21 = vcombine.high %v17_v16, %v21_v17  ;;  %v25_v24 = vld [vmem:[%s1400_s0 + $0x50] sm:$0xff] }
  0x1c   :  { %967 = vmatpush3.bf16.msra.mxu0 %v1092_v26  ;;  %v22_v19 = vld [vmem:[%s1400_s0 + $0x38] sm:$0xff]  ;;  %v29_v25 = vld [vmem:[%s1400_s0 + $0x70] sm:$0xff] }
  0x1d   :  { %995 = vmatpush3.bf16.msra.mxu1 %v1093_v27  ;;  %968 = vmatprep.subr.bf16.mxu0 %v1094_v28  ;;  %v861_v22 = vcombine.low %v18_v18, %v22_v19  ;;  %v862_v23 = vcombine.high %v18_v18, %v22_v19  ;;  %v26_v26 = vld [vmem:[%s1400_s0 + $0x58] sm:$0xff]  ;;  %v868_v27 = vcombine.high %v25_v24, %v29_v25 }
  0x1e   :  { %996 = vmatprep.subr.bf16.mxu1 %v1095_v29  ;;  %v30_v28 = vld [vmem:[%s1400_s0 + $0x78] sm:$0xff] }
  0x1f   :  { %v870_v29 = vcombine.high %v26_v26, %v30_v28 }
  0x20   :  { %969 = vmatpush3.bf16.msra.mxu0 %v1096_v30  ;;  %v867_v30 = vcombine.low %v25_v24, %v29_v25 }
  0x21   :  { %997 = vmatpush3.bf16.msra.mxu1 %v1097_v31  ;;  %1010 = vmatprep.subr.bf16.mxu0 %v1098_v40  ;;  %v869_v31 = vcombine.low %v26_v26, %v30_v28 }
  0x22   :  { %1038 = vmatprep.subr.bf16.mxu1 %v1099_v41 }
  0x23   :  { %663 = vmatmul.mubr.bf16.vlgmr.msra.gmra.mrb[0].mxu0 %v855_v35 }
  0x24   :  { %712 = vmatmul.mubr.bf16.vlgmr.msra.gmra.mrb[0].mxu1 %v857_v38  ;;  %1011 = vmatpush3.bf16.msra.mxu0 %v1100_v42 }
  0x25   :  { %1039 = vmatpush3.bf16.msra.mxu1 %v1101_v43  ;;  %1012 = vmatprep.subr.bf16.mxu0 %v1102_v44 }
  0x26   :  { %1040 = vmatprep.subr.bf16.mxu1 %v1103_v45  ;;  %670 = vmatprep.mubr.bf16.mxu0 %v864_v62 }
  0x27   :  { %719 = vmatprep.mubr.bf16.mxu1 %v866_v6 }
  0x28   :  { %1013 = vmatpush3.bf16.msra.mxu0 %v1104_v46 }
  0x29   :  { %1041 = vmatpush3.bf16.msra.mxu1 %v1105_v47  ;;  %1014 = vmatprep.subr.bf16.mxu0 %v1106_v48 }
  0x2a   :  { %1042 = vmatprep.subr.bf16.mxu1 %v1107_v49 }
  0x2b   :  { %671 = vmatmul.mubr.bf16.gmra.mrb[4].mxu0 %v863_v0 }
  0x2c   :  { %1015 = vmatpush3.bf16.msra.mxu0 %v1108_v50  ;;  %720 = vmatmul.mubr.bf16.gmra.mrb[4].mxu1 %v865_v7 }
  0x2d   :  { %1043 = vmatpush3.bf16.msra.mxu1 %v1109_v51  ;;  %1016 = vmatprep.subr.bf16.mxu0 %v1110_v52 }
  0x2e   :  { %1044 = vmatprep.subr.bf16.mxu1 %v1111_v53  ;;  %760 = vmatprep.mubr.bf16.mxu0 %v860_v21 }
  0x2f   :  { %809 = vmatprep.mubr.bf16.mxu1 %v862_v23 }
  0x30   :  { %1017 = vmatpush3.bf16.msra.mxu0 %v1112_v54 }
  0x31   :  { %1045 = vmatpush3.bf16.msra.mxu1 %v1113_v55  ;;  %1018 = vmatprep.subr.bf16.mxu0 %v1114_v56 }
  0x32   :  { %1046 = vmatprep.subr.bf16.mxu1 %v1115_v57 }
  0x34   :  { %1019 = vmatpush3.bf16.msra.mxu0 %v1116_v58 }
  0x35   :  { %1047 = vmatpush3.bf16.msra.mxu1 %v1117_v59  ;;  %1020 = vmatprep.subr.bf16.mxu0 %v1118_v63 }
  0x36   :  { %1048 = vmatprep.subr.bf16.mxu1 %v1119_v1 }
  0x38   :  { %1021 = vmatpush3.bf16.msra.mxu0 %v1120_v2 }
  0x39   :  { %1049 = vmatpush3.bf16.msra.mxu1 %v1121_v3  ;;  %1022 = vmatprep.subr.bf16.mxu0 %v1122_v8 }
  0x3a   :  { %1050 = vmatprep.subr.bf16.mxu1 %v1123_v9 }
  0x3c   :  { %1023 = vmatpush3.bf16.msra.mxu0 %v1124_v10 }
  0x3d   :  { %1051 = vmatpush3.bf16.msra.mxu1 %v1125_v11  ;;  %1024 = vmatprep.subr.bf16.mxu0 %v1126_v12 }
  0x3e   :  { %1052 = vmatprep.subr.bf16.mxu1 %v1127_v13 }
  0x40   :  { %1025 = vmatpush3.bf16.msra.mxu0 %v1128_v14 }
  0x41   :  { %1053 = vmatpush3.bf16.msra.mxu1 %v1129_v15 }
  0x43   :  { %761 = vmatmul.mubr.bf16.vlgmr.msra.gmra.mrb[8].mxu0 %v859_v20 }
  0x44   :  { %810 = vmatmul.mubr.bf16.vlgmr.msra.gmra.mrb[8].mxu1 %v861_v22  ;;  %768 = vmatprep.mubr.bf16.mxu0 %v868_v27 }
  0x45   :  { %817 = vmatprep.mubr.bf16.mxu1 %v870_v29 }
  0x4b   :  { %769 = vmatmul.mubr.bf16.gmra.mrb[12].mxu0 %v867_v30 }
  0x4c   :  { %818 = vmatmul.mubr.bf16.gmra.mrb[12].mxu1 %v869_v31 }
  0xf6   :  { %v970_v32 = vpop.f32.mrb[0].mxu0 }
  0xf7   :  { %v998_v33 = vpop.f32.mrb[0].mxu1  ;;  %v971_v35 = vpop.f32.mrb[1].mxu0 }
  0xf8   :  { %v972_v36 = vadd.f32 %v971_v35, %v970_v32  ;;  %v999_v37 = vpop.f32.mrb[1].mxu1  ;;  %v973_v38 = vpop.f32.mrb[2].mxu0 }
  0xf9   :  { %v1000_v39 = vadd.f32 %v999_v37, %v998_v33  ;;  %v1001_v40 = vpop.f32.mrb[2].mxu1  ;;  %v974_v41 = vpop.f32.mrb[3].mxu0 }
  0xfa   :  { %v665_v42 = vadd.f32 %v972_v36, %v854_v34  ;;  %v975_v43 = vadd.f32 %v974_v41, %v973_v38  ;;  %v1002_v44 = vpop.f32.mrb[3].mxu1 }
  0xfb   :  { %v1003_v45 = vadd.f32 %v1002_v44, %v1001_v40 }
  0xfc   :  { %v714_v46 = vadd.f32 %v1000_v39, %v665_v42  ;;  %v668_v47 = vadd.f32 %v975_v43, %v854_v34 }
  0xfe   :  { %v717_v48 = vadd.f32 %v1003_v45, %v668_v47  ;;  %v976_v49 = vpop.f32.mrb[4].mxu0 }
  0xff   :  { %v977_v50 = vpop.f32.mrb[5].mxu0  ;;  %v1004_v56 = vpop.f32.mrb[4].mxu1 }
 0x100   :  { %v978_v51 = vadd.f32 %v977_v50, %v976_v49  ;;  %v979_v52 = vpop.f32.mrb[6].mxu0  ;;  %v1005_v57 = vpop.f32.mrb[5].mxu1 }
 0x101   :  { %v980_v53 = vpop.f32.mrb[7].mxu0  ;;  %v1006_v59 = vadd.f32 %v1005_v57, %v1004_v56  ;;  %v1007_v60 = vpop.f32.mrb[6].mxu1 }
 0x102   :  { %v981_v54 = vadd.f32 %v980_v53, %v979_v52  ;;  %v673_v55 = vadd.f32 %v978_v51, %v854_v34  ;;  %v1008_v61 = vpop.f32.mrb[7].mxu1 }
 0x103   :  { %v1009_v63 = vadd.f32 %v1008_v61, %v1007_v60 }
 0x104   :  { %v676_v58 = vadd.f32 %v981_v54, %v854_v34  ;;  %v722_v62 = vadd.f32 %v1006_v59, %v673_v55 }
 0x106   :  { %v725_v0 = vadd.f32 %v1009_v63, %v676_v58 }
 0x116   :  { %v1026_v1 = vpop.f32.mrb[8].mxu0 }
 0x117   :  { %v1054_v2 = vpop.f32.mrb[8].mxu1  ;;  %v1027_v3 = vpop.f32.mrb[9].mxu0 }
 0x118   :  { %v1055_v4 = vpop.f32.mrb[9].mxu1  ;;  %v1028_v5 = vadd.f32 %v1027_v3, %v1026_v1  ;;  %v1029_v7 = vpop.f32.mrb[10].mxu0 }
 0x119   :  { %v1056_v6 = vadd.f32 %v1055_v4, %v1054_v2  ;;  %v1057_v8 = vpop.f32.mrb[10].mxu1  ;;  %v1030_v9 = vpop.f32.mrb[11].mxu0 }
 0x11a   :  { %v1058_v10 = vpop.f32.mrb[11].mxu1  ;;  %v763_v11 = vadd.f32 %v1028_v5, %v714_v46  ;;  %v1031_v12 = vadd.f32 %v1030_v9, %v1029_v7 }
 0x11b   :  { %v1059_v13 = vadd.f32 %v1058_v10, %v1057_v8 }
 0x11c   :  { %v812_v14 = vadd.f32 %v1056_v6, %v763_v11  ;;  %v766_v15 = vadd.f32 %v1031_v12, %v717_v48 }
 0x11e   :  { %v815_v16 = vadd.f32 %v1059_v13, %v766_v15  ;;  %v1032_v17 = vpop.f32.mrb[12].mxu0  ;;  %v826_v21 = vmax.f32 %v812_v14, 0.0 }
 0x11f   :  { %v1060_v18 = vpop.f32.mrb[12].mxu1  ;;  %v1033_v19 = vpop.f32.mrb[13].mxu0 }
 0x120   :  { %v1061_v20 = vpop.f32.mrb[13].mxu1  ;;  %v827_v22 = vmax.f32 %v815_v16, 0.0  ;;  %v1034_v23 = vadd.f32 %v1033_v19, %v1032_v17  ;;  %v1035_v25 = vpop.f32.mrb[14].mxu0 }
 0x121   :  { %v1062_v24 = vadd.f32 %v1061_v20, %v1060_v18  ;;  %v1063_v26 = vpop.f32.mrb[14].mxu1  ;;  %v1036_v27 = vpop.f32.mrb[15].mxu0 }
 0x122   :  { %v1064_v28 = vpop.f32.mrb[15].mxu1  ;;  %v946_v29 = vpack.c.bf16 %v827_v22, %v826_v21  ;;  %v771_v30 = vadd.f32 %v1034_v23, %v722_v62  ;;  %v1037_v31 = vadd.f32 %v1036_v27, %v1035_v25 }
 0x123   :  { %v1065_v32 = vadd.f32 %v1064_v28, %v1063_v26 }
 0x124   :  { %947 = vst [vmem:[%s1402_s3] sm:$0xff] %v946_v29   ;;  %v820_v33 = vadd.f32 %v1062_v24, %v771_v30  ;;  %v774_v34 = vadd.f32 %v1037_v31, %v725_v0 }
 0x126   :  { %v823_v35 = vadd.f32 %v1065_v32, %v774_v34  ;;  %v828_v36 = vmax.f32 %v820_v33, 0.0 }
 0x128   :  { %v829_v37 = vmax.f32 %v823_v35, 0.0 }
 0x12a   :  { %v951_v38 = vpack.c.bf16 %v829_v37, %v828_v36 }
 0x12c   :  { %953 = vst [vmem:[%s1402_s3 + $0x8] sm:$0xff] %v951_v38  }

// kernel: cvae_forward.11
= control target key start
LH: loop header
LB: loop body
LE: loop exit
PB: predicated region body
PF: predicated region fallthrough
CT: control target
= control target key end

     0   :  { %s1283_s1 = inlined_call_operand.vmem [shape: bf16[512,256], index: 1, kind: input, shape index: {}]   ;;  %s1284_s0 = inlined_call_operand.vmem [shape: bf16[64,512], index: 0, kind: input, shape index: {}]   ;;  %s1285_s2 = inlined_call_operand.vmem [shape: f32[1,256], index: 2, kind: input, shape index: {}]   ;;  %s1286_s3 = inlined_call_operand.vmem [shape: bf16[64,256], index: 3, kind: output, shape index: {}]  }
   0x1   :  { %v856_v0 = vld [vmem:[%s1283_s1 + $0x4] ss:$8 sps:$4 sm:$0xff]   ;;  %v860_v2 = vld [vmem:[%s1283_s1] ss:$8 sps:$4 sm:$0xff]   ;;  %v862_v4 = vld [vmem:[%s1283_s1 + $0x14] ss:$8 sps:$4 sm:$0xff]  }
   0x2   :  { %v858_v1 = vld [vmem:[%s1283_s1 + $0x104] ss:$8 sps:$4 sm:$0xff]   ;;  %506 = vmatprep.subr.bf16.mxu1 %v856_v0  ;;  %v861_v3 = vld [vmem:[%s1283_s1 + $0x100] ss:$8 sps:$4 sm:$0xff]   ;;  %v864_v5 = vld [vmem:[%s1283_s1 + $0x114] ss:$8 sps:$4 sm:$0xff]  }
   0x3   :  { %579 = vmatprep.subr.bf16.mxu0 %v858_v1  ;;  %507 = vmatpush1.bf16.msra.mxu1 %v860_v2  ;;  %v866_v6 = vld [vmem:[%s1283_s1 + $0x10] ss:$8 sps:$4 sm:$0xff]   ;;  %v868_v8 = vld [vmem:[%s1283_s1 + $0x24] ss:$8 sps:$4 sm:$0xff]   ;;  %v872_v10 = vld [vmem:[%s1283_s1 + $0x20] ss:$8 sps:$4 sm:$0xff]  }
   0x4   :  { %580 = vmatpush1.bf16.msra.mxu0 %v861_v3  ;;  %508 = vmatprep.subr.bf16.mxu1 %v862_v4  ;;  %v867_v7 = vld [vmem:[%s1283_s1 + $0x110] ss:$8 sps:$4 sm:$0xff]   ;;  %v870_v9 = vld [vmem:[%s1283_s1 + $0x124] ss:$8 sps:$4 sm:$0xff]   ;;  %v873_v11 = vld [vmem:[%s1283_s1 + $0x120] ss:$8 sps:$4 sm:$0xff]  }
   0x5   :  { %581 = vmatprep.subr.bf16.mxu0 %v864_v5  ;;  %v874_v12 = vld [vmem:[%s1283_s1 + $0x34] ss:$8 sps:$4 sm:$0xff]   ;;  %v878_v14 = vld [vmem:[%s1283_s1 + $0x30] ss:$8 sps:$4 sm:$0xff]   ;;  %v880_v16 = vld [vmem:[%s1283_s1 + $0x44] ss:$8 sps:$4 sm:$0xff]  }
   0x6   :  { %v876_v13 = vld [vmem:[%s1283_s1 + $0x134] ss:$8 sps:$4 sm:$0xff]   ;;  %v879_v15 = vld [vmem:[%s1283_s1 + $0x130] ss:$8 sps:$4 sm:$0xff]   ;;  %v882_v17 = vld [vmem:[%s1283_s1 + $0x144] ss:$8 sps:$4 sm:$0xff]  }
   0x7   :  { %509 = vmatpush1.bf16.msra.mxu1 %v866_v6  ;;  %v884_v18 = vld [vmem:[%s1283_s1 + $0x40] ss:$8 sps:$4 sm:$0xff]   ;;  %v886_v20 = vld [vmem:[%s1283_s1 + $0x54] ss:$8 sps:$4 sm:$0xff]   ;;  %v890_v22 = vld [vmem:[%s1283_s1 + $0x50] ss:$8 sps:$4 sm:$0xff]  }
   0x8   :  { %582 = vmatpush1.bf16.msra.mxu0 %v867_v7  ;;  %510 = vmatprep.subr.bf16.mxu1 %v868_v8  ;;  %v885_v19 = vld [vmem:[%s1283_s1 + $0x140] ss:$8 sps:$4 sm:$0xff]   ;;  %v888_v21 = vld [vmem:[%s1283_s1 + $0x154] ss:$8 sps:$4 sm:$0xff]   ;;  %v891_v23 = vld [vmem:[%s1283_s1 + $0x150] ss:$8 sps:$4 sm:$0xff]  }
   0x9   :  { %583 = vmatprep.subr.bf16.mxu0 %v870_v9  ;;  %v892_v24 = vld [vmem:[%s1283_s1 + $0x64] ss:$8 sps:$4 sm:$0xff]   ;;  %v896_v26 = vld [vmem:[%s1283_s1 + $0x60] ss:$8 sps:$4 sm:$0xff]   ;;  %v898_v28 = vld [vmem:[%s1283_s1 + $0x74] ss:$8 sps:$4 sm:$0xff]  }
   0xa   :  { %v894_v25 = vld [vmem:[%s1283_s1 + $0x164] ss:$8 sps:$4 sm:$0xff]   ;;  %v897_v27 = vld [vmem:[%s1283_s1 + $0x160] ss:$8 sps:$4 sm:$0xff]   ;;  %v900_v29 = vld [vmem:[%s1283_s1 + $0x174] ss:$8 sps:$4 sm:$0xff]  }
   0xb   :  { %511 = vmatpush1.bf16.msra.mxu1 %v872_v10  ;;  %v902_v30 = vld [vmem:[%s1283_s1 + $0x70] ss:$8 sps:$4 sm:$0xff]   ;;  %v904_v32 = vld [vmem:[%s1283_s1 + $0x84] ss:$8 sps:$4 sm:$0xff]   ;;  %v908_v34 = vld [vmem:[%s1283_s1 + $0x80] ss:$8 sps:$4 sm:$0xff]  }
   0xc   :  { %584 = vmatpush1.bf16.msra.mxu0 %v873_v11  ;;  %512 = vmatprep.subr.bf16.mxu1 %v874_v12  ;;  %v903_v31 = vld [vmem:[%s1283_s1 + $0x170] ss:$8 sps:$4 sm:$0xff]   ;;  %v906_v33 = vld [vmem:[%s1283_s1 + $0x184] ss:$8 sps:$4 sm:$0xff]   ;;  %v909_v35 = vld [vmem:[%s1283_s1 + $0x180] ss:$8 sps:$4 sm:$0xff]  }
   0xd   :  { %585 = vmatprep.subr.bf16.mxu0 %v876_v13  ;;  %v910_v36 = vld [vmem:[%s1283_s1 + $0x94] ss:$8 sps:$4 sm:$0xff]   ;;  %v914_v38 = vld [vmem:[%s1283_s1 + $0x90] ss:$8 sps:$4 sm:$0xff]   ;;  %v916_v40 = vld [vmem:[%s1283_s1 + $0xa4] ss:$8 sps:$4 sm:$0xff]  }
   0xe   :  { %v912_v37 = vld [vmem:[%s1283_s1 + $0x194] ss:$8 sps:$4 sm:$0xff]   ;;  %v915_v39 = vld [vmem:[%s1283_s1 + $0x190] ss:$8 sps:$4 sm:$0xff]   ;;  %v918_v41 = vld [vmem:[%s1283_s1 + $0x1a4] ss:$8 sps:$4 sm:$0xff]  }
   0xf   :  { %513 = vmatpush1.bf16.msra.mxu1 %v878_v14  ;;  %v920_v42 = vld [vmem:[%s1283_s1 + $0xa0] ss:$8 sps:$4 sm:$0xff]   ;;  %v922_v44 = vld [vmem:[%s1283_s1 + $0xb4] ss:$8 sps:$4 sm:$0xff]   ;;  %v926_v46 = vld [vmem:[%s1283_s1 + $0xb0] ss:$8 sps:$4 sm:$0xff]  }
  0x10   :  { %586 = vmatpush1.bf16.msra.mxu0 %v879_v15  ;;  %514 = vmatprep.subr.bf16.mxu1 %v880_v16  ;;  %v921_v43 = vld [vmem:[%s1283_s1 + $0x1a0] ss:$8 sps:$4 sm:$0xff]   ;;  %v924_v45 = vld [vmem:[%s1283_s1 + $0x1b4] ss:$8 sps:$4 sm:$0xff]   ;;  %v927_v47 = vld [vmem:[%s1283_s1 + $0x1b0] ss:$8 sps:$4 sm:$0xff]   ;;  %v96_v16 = vlaneseq }
  0x11   :  { %587 = vmatprep.subr.bf16.mxu0 %v882_v17  ;;  %v928_v48 = vld [vmem:[%s1283_s1 + $0xc4] ss:$8 sps:$4 sm:$0xff]   ;;  %v932_v52 = vld [vmem:[%s1283_s1 + $0xc0] ss:$8 sps:$4 sm:$0xff]   ;;  %v934_v54 = vld [vmem:[%s1283_s1 + $0xd4] ss:$8 sps:$4 sm:$0xff]  }
  0x12   :  { %v954_v49 = vld [vmem:[%s1284_s0 + $0x4] ss:$16 sps:$4 sm:$0xff]   ;;  %v957_v51 = vld [vmem:[%s1284_s0 + $0xc] ss:$16 sps:$4 sm:$0xff]   ;;  %v933_v53 = vld [vmem:[%s1283_s1 + $0x1c0] ss:$8 sps:$4 sm:$0xff]  }
  0x13   :  { %515 = vmatpush1.bf16.msra.mxu1 %v884_v18  ;;  %v930_v50 = vld [vmem:[%s1283_s1 + $0x1c4] ss:$8 sps:$4 sm:$0xff]   ;;  %538 = vmatprep.mubr.bf16.mxu1 %v954_v49  ;;  %v936_v55 = vld [vmem:[%s1283_s1 + $0x1d4] ss:$8 sps:$4 sm:$0xff]   ;;  %v938_v56 = vld [vmem:[%s1283_s1 + $0xd0] ss:$8 sps:$4 sm:$0xff]  }
  0x14   :  { %588 = vmatpush1.bf16.msra.mxu0 %v885_v19  ;;  %516 = vmatprep.subr.bf16.mxu1 %v886_v20  ;;  %v939_v57 = vld [vmem:[%s1283_s1 + $0x1d0] ss:$8 sps:$4 sm:$0xff]   ;;  %v940_v58 = vld [vmem:[%s1283_s1 + $0xe4] ss:$8 sps:$4 sm:$0xff]   ;;  %v944_v60 = vld [vmem:[%s1283_s1 + $0xe0] ss:$8 sps:$4 sm:$0xff]  }
  0x15   :  { %589 = vmatprep.subr.bf16.mxu0 %v888_v21  ;;  %611 = vmatprep.mubr.bf16.mxu0 %v957_v51  ;;  %v942_v59 = vld [vmem:[%s1283_s1 + $0x1e4] ss:$8 sps:$4 sm:$0xff]   ;;  %v945_v61 = vld [vmem:[%s1283_s1 + $0x1e0] ss:$8 sps:$4 sm:$0xff]   ;;  %v946_v62 = vld [vmem:[%s1283_s1 + $0xf4] ss:$8 sps:$4 sm:$0xff]  }
  0x16   :  { %v948_v63 = vld [vmem:[%s1283_s1 + $0x1f4] ss:$8 sps:$4 sm:$0xff]   ;;  %v950_v0 = vld [vmem:[%s1283_s1 + $0xf0] ss:$8 sps:$4 sm:$0xff]   ;;  %v97_v17 = vshrl.u32 %v96_v16, 7 }
  0x17   :  { %517 = vmatpush1.bf16.msra.mxu1 %v890_v22  ;;  %v951_v1 = vld [vmem:[%s1283_s1 + $0x1f0] ss:$8 sps:$4 sm:$0xff]   ;;  %v958_v4 = vld [vmem:[%s1284_s0 + $0x24] ss:$16 sps:$4 sm:$0xff]   ;;  %v960_v5 = vld [vmem:[%s1284_s0 + $0x2c] ss:$16 sps:$4 sm:$0xff]  }
  0x18   :  { %590 = vmatpush1.bf16.msra.mxu0 %v891_v23  ;;  %518 = vmatprep.subr.bf16.mxu1 %v892_v24  ;;  %v952_v2 = vld [vmem:[%s1284_s0] ss:$16 sps:$4 sm:$0xff]   ;;  %v955_v3 = vld [vmem:[%s1284_s0 + $0x8] ss:$16 sps:$4 sm:$0xff]   ;;  %v964_v8 = vld [vmem:[%s1284_s0 + $0x44] ss:$16 sps:$4 sm:$0xff]  }
  0x19   :  { %591 = vmatprep.subr.bf16.mxu0 %v894_v25  ;;  %v962_v6 = vld [vmem:[%s1284_s0 + $0x20] ss:$16 sps:$4 sm:$0xff]   ;;  %v963_v7 = vld [vmem:[%s1284_s0 + $0x28] ss:$16 sps:$4 sm:$0xff]   ;;  %v966_v9 = vld [vmem:[%s1284_s0 + $0x4c] ss:$16 sps:$4 sm:$0xff]  }
  0x1a   :  { %v968_v10 = vld [vmem:[%s1284_s0 + $0x40] ss:$16 sps:$4 sm:$0xff]   ;;  %v969_v11 = vld [vmem:[%s1284_s0 + $0x48] ss:$16 sps:$4 sm:$0xff]   ;;  %v970_v12 = vld [vmem:[%s1284_s0 + $0x64] ss:$16 sps:$4 sm:$0xff]  }
  0x1b   :  { %519 = vmatpush1.bf16.msra.mxu1 %v896_v26  ;;  %v972_v13 = vld [vmem:[%s1284_s0 + $0x6c] ss:$16 sps:$4 sm:$0xff]   ;;  %v974_v14 = vld [vmem:[%s1284_s0 + $0x60] ss:$16 sps:$4 sm:$0xff]   ;;  %v975_v15 = vld [vmem:[%s1284_s0 + $0x68] ss:$16 sps:$4 sm:$0xff]  }
  0x1c   :  { %592 = vmatpush1.bf16.msra.mxu0 %v897_v27  ;;  %520 = vmatprep.subr.bf16.mxu1 %v898_v28  ;;  %v98_v18 = vsub.s32 0, %v97_v17  ;;  %v94_v19 = vld [vmem:[%s1285_s2] sm:$0x3]  ;;  %v102_v20 = vsub.s32 1, %v97_v17 }
  0x1d   :  { %593 = vmatprep.subr.bf16.mxu0 %v900_v29 }
  0x1e   :  { %v1239_v21 = vrot.slane %v94_v19, %v98_v18  ;;  %v1241_v22 = vrot.slane %v94_v19, %v102_v20 }
  0x1f   :  { %521 = vmatpush1.bf16.msra.mxu1 %v902_v30 }
  0x20   :  { %594 = vmatpush1.bf16.msra.mxu0 %v903_v31  ;;  %522 = vmatprep.subr.bf16.mxu1 %v904_v32 }
  0x21   :  { %595 = vmatprep.subr.bf16.mxu0 %v906_v33 }
  0x23   :  { %523 = vmatpush1.bf16.msra.mxu1 %v908_v34 }
  0x24   :  { %596 = vmatpush1.bf16.msra.mxu0 %v909_v35  ;;  %524 = vmatprep.subr.bf16.mxu1 %v910_v36 }
  0x25   :  { %597 = vmatprep.subr.bf16.mxu0 %v912_v37 }
  0x27   :  { %525 = vmatpush1.bf16.msra.mxu1 %v914_v38 }
  0x28   :  { %598 = vmatpush1.bf16.msra.mxu0 %v915_v39  ;;  %526 = vmatprep.subr.bf16.mxu1 %v916_v40 }
  0x29   :  { %599 = vmatprep.subr.bf16.mxu0 %v918_v41 }
  0x2b   :  { %527 = vmatpush1.bf16.msra.mxu1 %v920_v42 }
  0x2c   :  { %600 = vmatpush1.bf16.msra.mxu0 %v921_v43  ;;  %528 = vmatprep.subr.bf16.mxu1 %v922_v44 }
  0x2d   :  { %601 = vmatprep.subr.bf16.mxu0 %v924_v45 }
  0x2f   :  { %529 = vmatpush1.bf16.msra.mxu1 %v926_v46 }
  0x30   :  { %602 = vmatpush1.bf16.msra.mxu0 %v927_v47  ;;  %530 = vmatprep.subr.bf16.mxu1 %v928_v48 }
  0x31   :  { %603 = vmatprep.subr.bf16.mxu0 %v930_v50 }
  0x33   :  { %531 = vmatpush1.bf16.msra.mxu1 %v932_v52 }
  0x34   :  { %604 = vmatpush1.bf16.msra.mxu0 %v933_v53  ;;  %532 = vmatprep.subr.bf16.mxu1 %v934_v54 }
  0x35   :  { %605 = vmatprep.subr.bf16.mxu0 %v936_v55 }
  0x37   :  { %533 = vmatpush1.bf16.msra.mxu1 %v938_v56 }
  0x38   :  { %606 = vmatpush1.bf16.msra.mxu0 %v939_v57  ;;  %534 = vmatprep.subr.bf16.mxu1 %v940_v58 }
  0x39   :  { %607 = vmatprep.subr.bf16.mxu0 %v942_v59 }
  0x3b   :  { %535 = vmatpush1.bf16.msra.mxu1 %v944_v60 }
  0x3c   :  { %608 = vmatpush1.bf16.msra.mxu0 %v945_v61  ;;  %536 = vmatprep.subr.bf16.mxu1 %v946_v62 }
  0x3d   :  { %609 = vmatprep.subr.bf16.mxu0 %v948_v63 }
  0x3f   :  { %537 = vmatpush1.bf16.msra.mxu1 %v950_v0 }
  0x40   :  { %610 = vmatpush1.bf16.msra.mxu0 %v951_v1 }
  0x42   :  { %539 = vmatmul.mubr.bf16.vlgmr.msra.gmra.mrb[0].mxu1 %v952_v2 }
  0x43   :  { %612 = vmatmul.mubr.bf16.vlgmr.msra.gmra.mrb[0].mxu0 %v955_v3  ;;  %548 = vmatprep.mubr.bf16.mxu1 %v958_v4 }
  0x44   :  { %621 = vmatprep.mubr.bf16.mxu0 %v960_v5 }
  0x4a   :  { %549 = vmatmul.mubr.bf16.gmra.mrb[4].mxu1 %v962_v6 }
  0x4b   :  { %622 = vmatmul.mubr.bf16.gmra.mrb[4].mxu0 %v963_v7  ;;  %558 = vmatprep.mubr.bf16.mxu1 %v964_v8 }
  0x4c   :  { %631 = vmatprep.mubr.bf16.mxu0 %v966_v9 }
  0x52   :  { %559 = vmatmul.mubr.bf16.gmra.mrb[8].mxu1 %v968_v10 }
  0x53   :  { %632 = vmatmul.mubr.bf16.gmra.mrb[8].mxu0 %v969_v11  ;;  %568 = vmatprep.mubr.bf16.mxu1 %v970_v12 }
  0x54   :  { %641 = vmatprep.mubr.bf16.mxu0 %v972_v13 }
  0x5a   :  { %569 = vmatmul.mubr.bf16.gmra.mrb[12].mxu1 %v974_v14 }
  0x5b   :  { %642 = vmatmul.mubr.bf16.gmra.mrb[12].mxu0 %v975_v15 }
 0x115   :  { %v540_v23 = vpop.f32.mrb[0].mxu1 }
 0x116   :  { %v613_v24 = vpop.f32.mrb[0].mxu0  ;;  %v541_v25 = vadd.f32 %v540_v23, %v1239_v21  ;;  %v542_v26 = vpop.f32.mrb[1].mxu1 }
 0x117   :  { %v615_v27 = vpop.f32.mrb[1].mxu0  ;;  %v543_v28 = vadd.f32 %v542_v26, %v1241_v22  ;;  %v544_v29 = vpop.f32.mrb[2].mxu1 }
 0x118   :  { %v617_v30 = vpop.f32.mrb[2].mxu0  ;;  %v614_v31 = vadd.f32 %v613_v24, %v541_v25  ;;  %v545_v32 = vadd.f32 %v544_v29, %v1239_v21  ;;  %v546_v33 = vpop.f32.mrb[3].mxu1 }
 0x119   :  { %v619_v34 = vpop.f32.mrb[3].mxu0  ;;  %v616_v35 = vadd.f32 %v615_v27, %v543_v28  ;;  %v547_v36 = vadd.f32 %v546_v33, %v1241_v22 }
 0x11a   :  { %v652_v37 = vmax.f32 %v614_v31, 0.0  ;;  %v618_v38 = vadd.f32 %v617_v30, %v545_v32 }
 0x11b   :  { %v653_v39 = vmax.f32 %v616_v35, 0.0  ;;  %v620_v40 = vadd.f32 %v619_v34, %v547_v36 }
 0x11c   :  { %v654_v41 = vmax.f32 %v618_v38, 0.0 }
 0x11d   :  { %v816_v42 = vpack.c.bf16 %v653_v39, %v652_v37  ;;  %v655_v43 = vmax.f32 %v620_v40, 0.0  ;;  %v550_v44 = vpop.f32.mrb[4].mxu1 }
 0x11e   :  { %v623_v45 = vpop.f32.mrb[4].mxu0  ;;  %v551_v46 = vadd.f32 %v550_v44, %v1239_v21  ;;  %v552_v47 = vpop.f32.mrb[5].mxu1 }
 0x11f   :  { %v625_v48 = vpop.f32.mrb[5].mxu0  ;;  %716 = vst [vmem:[%s1286_s3] sm:$0xff] %v816_v42  ;;  %v817_v49 = vpack.c.bf16 %v655_v43, %v654_v41  ;;  %v553_v50 = vadd.f32 %v552_v47, %v1241_v22  ;;  %v554_v51 = vpop.f32.mrb[6].mxu1 }
 0x120   :  { %v627_v52 = vpop.f32.mrb[6].mxu0  ;;  %v624_v53 = vadd.f32 %v623_v45, %v551_v46  ;;  %v555_v54 = vadd.f32 %v554_v51, %v1239_v21  ;;  %v556_v55 = vpop.f32.mrb[7].mxu1 }
 0x121   :  { %v629_v56 = vpop.f32.mrb[7].mxu0  ;;  %717 = vst [vmem:[%s1286_s3 + $0x8] sm:$0xff] %v817_v49  ;;  %v626_v57 = vadd.f32 %v625_v48, %v553_v50  ;;  %v557_v58 = vadd.f32 %v556_v55, %v1241_v22 }
 0x122   :  { %v656_v59 = vmax.f32 %v624_v53, 0.0  ;;  %v628_v60 = vadd.f32 %v627_v52, %v555_v54 }
 0x123   :  { %v657_v61 = vmax.f32 %v626_v57, 0.0  ;;  %v630_v62 = vadd.f32 %v629_v56, %v557_v58 }
 0x124   :  { %v658_v63 = vmax.f32 %v628_v60, 0.0 }
 0x125   :  { %v818_v0 = vpack.c.bf16 %v657_v61, %v656_v59  ;;  %v659_v1 = vmax.f32 %v630_v62, 0.0  ;;  %v560_v2 = vpop.f32.mrb[8].mxu1 }
 0x126   :  { %v633_v3 = vpop.f32.mrb[8].mxu0  ;;  %v561_v4 = vadd.f32 %v560_v2, %v1239_v21  ;;  %v562_v5 = vpop.f32.mrb[9].mxu1 }
 0x127   :  { %v635_v6 = vpop.f32.mrb[9].mxu0  ;;  %718 = vst [vmem:[%s1286_s3 + $0x10] sm:$0xff] %v818_v0  ;;  %v819_v7 = vpack.c.bf16 %v659_v1, %v658_v63  ;;  %v563_v8 = vadd.f32 %v562_v5, %v1241_v22  ;;  %v564_v9 = vpop.f32.mrb[10].mxu1 }
 0x128   :  { %v637_v10 = vpop.f32.mrb[10].mxu0  ;;  %v634_v11 = vadd.f32 %v633_v3, %v561_v4  ;;  %v565_v12 = vadd.f32 %v564_v9, %v1239_v21  ;;  %v566_v13 = vpop.f32.mrb[11].mxu1 }
 0x129   :  { %v639_v14 = vpop.f32.mrb[11].mxu0  ;;  %719 = vst [vmem:[%s1286_s3 + $0x18] sm:$0xff] %v819_v7  ;;  %v636_v15 = vadd.f32 %v635_v6, %v563_v8  ;;  %v567_v16 = vadd.f32 %v566_v13, %v1241_v22 }
 0x12a   :  { %v660_v17 = vmax.f32 %v634_v11, 0.0  ;;  %v638_v18 = vadd.f32 %v637_v10, %v565_v12 }
 0x12b   :  { %v661_v19 = vmax.f32 %v636_v15, 0.0  ;;  %v640_v20 = vadd.f32 %v639_v14, %v567_v16 }
 0x12c   :  { %v662_v23 = vmax.f32 %v638_v18, 0.0 }
 0x12d   :  { %v820_v24 = vpack.c.bf16 %v661_v19, %v660_v17  ;;  %v663_v25 = vmax.f32 %v640_v20, 0.0  ;;  %v570_v26 = vpop.f32.mrb[12].mxu1 }
 0x12e   :  { %v643_v27 = vpop.f32.mrb[12].mxu0  ;;  %v571_v28 = vadd.f32 %v570_v26, %v1239_v21  ;;  %v572_v29 = vpop.f32.mrb[13].mxu1 }
 0x12f   :  { %v645_v30 = vpop.f32.mrb[13].mxu0  ;;  %720 = vst [vmem:[%s1286_s3 + $0x20] sm:$0xff] %v820_v24  ;;  %v821_v31 = vpack.c.bf16 %v663_v25, %v662_v23  ;;  %v573_v32 = vadd.f32 %v572_v29, %v1241_v22  ;;  %v574_v33 = vpop.f32.mrb[14].mxu1 }
 0x130   :  { %v647_v34 = vpop.f32.mrb[14].mxu0  ;;  %v644_v35 = vadd.f32 %v643_v27, %v571_v28  ;;  %v575_v36 = vadd.f32 %v574_v33, %v1239_v21  ;;  %v576_v37 = vpop.f32.mrb[15].mxu1 }
 0x131   :  { %v649_v38 = vpop.f32.mrb[15].mxu0  ;;  %721 = vst [vmem:[%s1286_s3 + $0x28] sm:$0xff] %v821_v31  ;;  %v646_v39 = vadd.f32 %v645_v30, %v573_v32  ;;  %v577_v40 = vadd.f32 %v576_v37, %v1241_v22 }
 0x132   :  { %v664_v41 = vmax.f32 %v644_v35, 0.0  ;;  %v648_v42 = vadd.f32 %v647_v34, %v575_v36 }
 0x133   :  { %v665_v43 = vmax.f32 %v646_v39, 0.0  ;;  %v650_v44 = vadd.f32 %v649_v38, %v577_v40 }
 0x134   :  { %v666_v45 = vmax.f32 %v648_v42, 0.0 }
 0x135   :  { %v822_v46 = vpack.c.bf16 %v665_v43, %v664_v41  ;;  %v667_v47 = vmax.f32 %v650_v44, 0.0 }
 0x137   :  { %722 = vst [vmem:[%s1286_s3 + $0x30] sm:$0xff] %v822_v46  ;;  %v823_v21 = vpack.c.bf16 %v667_v47, %v666_v45 }
 0x139   :  { %723 = vst [vmem:[%s1286_s3 + $0x38] sm:$0xff] %v823_v21 }

// kernel: cvae_forward.10
= control target key start
LH: loop header
LB: loop body
LE: loop exit
PB: predicated region body
PF: predicated region fallthrough
CT: control target
= control target key end

     0   :  { %s5612_s1 = inlined_call_operand.vmem [shape: bf16[2048,256], index: 1, kind: input, shape index: {}]   ;;  %s5613_s0 = inlined_call_operand.vmem [shape: bf16[16,2048], index: 0, kind: input, shape index: {}]   ;;  %s5614_s4 = inlined_call_operand.vmem [shape: bf16[128,2048], index: 4, kind: input, shape index: {}]   ;;  %s5615_s2 = inlined_call_operand.vmem [shape: f32[1,256], index: 2, kind: input, shape index: {}]   ;;  %s5616_s6 = inlined_call_operand.vmem [shape: f32[16,256], index: 6, kind: output, shape index: {0}]   ;;  %s5617_s3 = inlined_call_operand.vmem [shape: f32[16,128], index: 3, kind: input, shape index: {}]   ;;  %s5618_s5 = inlined_call_operand.vmem [shape: f32[1,2048], index: 5, kind: input, shape index: {}]   ;;  %s5619_s7 = inlined_call_operand.vmem [shape: bf16[16,2048], index: 7, kind: output, shape index: {1}]  }
   0x1   :  { %v3812_v0 = vld [vmem:[%s5612_s1 + $0x204] ss:$8 sps:$4 sm:$0xff]   ;;  %v3814_v1 = vld [vmem:[%s5612_s1 + $0x200] ss:$8 sps:$4 sm:$0xff]   ;;  %v3815_v2 = vld [vmem:[%s5612_s1 + $0x214] ss:$8 sps:$4 sm:$0xff]  }
   0x2   :  { %1756 = vmatprep.subr.bf16.mxu0 %v3812_v0  ;;  %v3817_v3 = vld [vmem:[%s5612_s1 + $0x210] ss:$8 sps:$4 sm:$0xff]   ;;  %v3818_v4 = vld [vmem:[%s5612_s1 + $0x224] ss:$8 sps:$4 sm:$0xff]   ;;  %v3820_v5 = vld [vmem:[%s5612_s1 + $0x220] ss:$8 sps:$4 sm:$0xff]  }
   0x3   :  { %1757 = vmatpush1.bf16.msra.mxu0 %v3814_v1  ;;  %v3821_v6 = vld [vmem:[%s5612_s1 + $0x234] ss:$8 sps:$4 sm:$0xff]   ;;  %v3823_v7 = vld [vmem:[%s5612_s1 + $0x230] ss:$8 sps:$4 sm:$0xff]   ;;  %v3824_v8 = vld [vmem:[%s5612_s1 + $0x244] ss:$8 sps:$4 sm:$0xff]  }
   0x4   :  { %1758 = vmatprep.subr.bf16.mxu0 %v3815_v2  ;;  %v3826_v9 = vld [vmem:[%s5612_s1 + $0x240] ss:$8 sps:$4 sm:$0xff]   ;;  %v3827_v10 = vld [vmem:[%s5612_s1 + $0x254] ss:$8 sps:$4 sm:$0xff]   ;;  %v3829_v11 = vld [vmem:[%s5612_s1 + $0x250] ss:$8 sps:$4 sm:$0xff]  }
   0x5   :  { %v3830_v12 = vld [vmem:[%s5612_s1 + $0x264] ss:$8 sps:$4 sm:$0xff]   ;;  %v28_v13 = vld [vmem:[%s5613_s0 + $0x10] sm:$0xff]  ;;  %v3832_v16 = vld [vmem:[%s5612_s1 + $0x260] ss:$8 sps:$4 sm:$0xff]  }
   0x6   :  { %v36_v14 = vld [vmem:[%s5613_s0 + $0x50] sm:$0xff]  ;;  %v3836_v19 = vld [vmem:[%s5612_s1 + $0x284] ss:$8 sps:$4 sm:$0xff]   ;;  %v3838_v20 = vld [vmem:[%s5612_s1 + $0x280] ss:$8 sps:$4 sm:$0xff]  }
   0x7   :  { %1759 = vmatpush1.bf16.msra.mxu0 %v3817_v3  ;;  %v3352_v15 = vcombine.high %v28_v13, %v36_v14  ;;  %v3833_v17 = vld [vmem:[%s5612_s1 + $0x274] ss:$8 sps:$4 sm:$0xff]   ;;  %v3835_v18 = vld [vmem:[%s5612_s1 + $0x270] ss:$8 sps:$4 sm:$0xff]   ;;  %v3842_v23 = vld [vmem:[%s5612_s1 + $0x2a4] ss:$8 sps:$4 sm:$0xff]   ;;  %v3351_v38 = vcombine.low %v28_v13, %v36_v14 }
   0x8   :  { %1760 = vmatprep.subr.bf16.mxu0 %v3818_v4  ;;  %v3839_v21 = vld [vmem:[%s5612_s1 + $0x294] ss:$8 sps:$4 sm:$0xff]   ;;  %v3841_v22 = vld [vmem:[%s5612_s1 + $0x290] ss:$8 sps:$4 sm:$0xff]   ;;  %v3844_v24 = vld [vmem:[%s5612_s1 + $0x2a0] ss:$8 sps:$4 sm:$0xff]  }
   0x9   :  { %1788 = vmatprep.mubr.bf16.mxu0 %v3352_v15  ;;  %v3845_v25 = vld [vmem:[%s5612_s1 + $0x2b4] ss:$8 sps:$4 sm:$0xff]   ;;  %v3847_v26 = vld [vmem:[%s5612_s1 + $0x2b0] ss:$8 sps:$4 sm:$0xff]   ;;  %v3848_v27 = vld [vmem:[%s5612_s1 + $0x2c4] ss:$8 sps:$4 sm:$0xff]  }
   0xa   :  { %v3850_v28 = vld [vmem:[%s5612_s1 + $0x2c0] ss:$8 sps:$4 sm:$0xff]   ;;  %v3851_v29 = vld [vmem:[%s5612_s1 + $0x2d4] ss:$8 sps:$4 sm:$0xff]   ;;  %v3853_v30 = vld [vmem:[%s5612_s1 + $0x2d0] ss:$8 sps:$4 sm:$0xff]  }
   0xb   :  { %1761 = vmatpush1.bf16.msra.mxu0 %v3820_v5  ;;  %v3854_v31 = vld [vmem:[%s5612_s1 + $0x2e4] ss:$8 sps:$4 sm:$0xff]   ;;  %v3856_v32 = vld [vmem:[%s5612_s1 + $0x2e0] ss:$8 sps:$4 sm:$0xff]   ;;  %v3857_v33 = vld [vmem:[%s5612_s1 + $0x2f4] ss:$8 sps:$4 sm:$0xff]  }
   0xc   :  { %1762 = vmatprep.subr.bf16.mxu0 %v3821_v6  ;;  %v3859_v34 = vld [vmem:[%s5612_s1 + $0x2f0] ss:$8 sps:$4 sm:$0xff]   ;;  %v3862_v35 = vld [vmem:[%s5612_s1 + $0x304] ss:$8 sps:$4 sm:$0xff]   ;;  %v3860_v39 = vld [vmem:[%s5612_s1 + $0x300] ss:$8 sps:$4 sm:$0xff]  }
   0xd   :  { %v4349_v36 = vld [vmem:[%s5613_s0 + $0x18] sm:$0xff]  ;;  %v3953_v42 = vld [vmem:[%s5612_s1 + $0x4] ss:$8 sps:$4 sm:$0xff]   ;;  %v3958_v43 = vld [vmem:[%s5612_s1] ss:$8 sps:$4 sm:$0xff]  }
   0xe   :  { %v4354_v37 = vld [vmem:[%s5613_s0 + $0x58] sm:$0xff]  ;;  %1670 = vmatprep.subr.bf16.mxu1 %v3953_v42  ;;  %v3868_v46 = vld [vmem:[%s5612_s1 + $0x324] ss:$8 sps:$4 sm:$0xff]   ;;  %v3866_v49 = vld [vmem:[%s5612_s1 + $0x320] ss:$8 sps:$4 sm:$0xff]  }
   0xf   :  { %1763 = vmatpush1.bf16.msra.mxu0 %v3823_v7  ;;  %v3865_v40 = vld [vmem:[%s5612_s1 + $0x314] ss:$8 sps:$4 sm:$0xff]   ;;  %v3354_v41 = vcombine.high %v4349_v36, %v4354_v37  ;;  %v3863_v44 = vld [vmem:[%s5612_s1 + $0x310] ss:$8 sps:$4 sm:$0xff]   ;;  %1671 = vmatpush1.bf16.msra.mxu1 %v3958_v43  ;;  %v3965_v48 = vld [vmem:[%s5612_s1 + $0x24] ss:$8 sps:$4 sm:$0xff]  }
  0x10   :  { %1764 = vmatprep.subr.bf16.mxu0 %v3824_v8  ;;  %v3959_v45 = vld [vmem:[%s5612_s1 + $0x14] ss:$8 sps:$4 sm:$0xff]   ;;  %v3964_v47 = vld [vmem:[%s5612_s1 + $0x10] ss:$8 sps:$4 sm:$0xff]   ;;  %v3970_v51 = vld [vmem:[%s5612_s1 + $0x20] ss:$8 sps:$4 sm:$0xff]  }
  0x11   :  { %1672 = vmatprep.subr.bf16.mxu1 %v3959_v45  ;;  %v3871_v50 = vld [vmem:[%s5612_s1 + $0x334] ss:$8 sps:$4 sm:$0xff]   ;;  %v3869_v53 = vld [vmem:[%s5612_s1 + $0x330] ss:$8 sps:$4 sm:$0xff]   ;;  %v3874_v54 = vld [vmem:[%s5612_s1 + $0x344] ss:$8 sps:$4 sm:$0xff]  }
  0x12   :  { %v3971_v52 = vld [vmem:[%s5612_s1 + $0x34] ss:$8 sps:$4 sm:$0xff]   ;;  %v3976_v55 = vld [vmem:[%s5612_s1 + $0x30] ss:$8 sps:$4 sm:$0xff]   ;;  %v3977_v56 = vld [vmem:[%s5612_s1 + $0x44] ss:$8 sps:$4 sm:$0xff]  }
  0x13   :  { %1765 = vmatpush1.bf16.msra.mxu0 %v3826_v9  ;;  %1673 = vmatpush1.bf16.msra.mxu1 %v3964_v47  ;;  %v3872_v57 = vld [vmem:[%s5612_s1 + $0x340] ss:$8 sps:$4 sm:$0xff]   ;;  %v3877_v58 = vld [vmem:[%s5612_s1 + $0x354] ss:$8 sps:$4 sm:$0xff]   ;;  %v3875_v61 = vld [vmem:[%s5612_s1 + $0x350] ss:$8 sps:$4 sm:$0xff]  }
  0x14   :  { %1766 = vmatprep.subr.bf16.mxu0 %v3827_v10  ;;  %1674 = vmatprep.subr.bf16.mxu1 %v3965_v48  ;;  %v3982_v59 = vld [vmem:[%s5612_s1 + $0x40] ss:$8 sps:$4 sm:$0xff]   ;;  %v3983_v60 = vld [vmem:[%s5612_s1 + $0x54] ss:$8 sps:$4 sm:$0xff]   ;;  %v3880_v62 = vld [vmem:[%s5612_s1 + $0x364] ss:$8 sps:$4 sm:$0xff]   ;;  %v3353_v48 = vcombine.low %v4349_v36, %v4354_v37 }
  0x15   :  { %v3988_v63 = vld [vmem:[%s5612_s1 + $0x50] ss:$8 sps:$4 sm:$0xff]   ;;  %v3989_v0 = vld [vmem:[%s5612_s1 + $0x64] ss:$8 sps:$4 sm:$0xff]   ;;  %v3878_v1 = vld [vmem:[%s5612_s1 + $0x360] ss:$8 sps:$4 sm:$0xff]  }
  0x16   :  { %v3883_v2 = vld [vmem:[%s5612_s1 + $0x374] ss:$8 sps:$4 sm:$0xff]   ;;  %v3994_v3 = vld [vmem:[%s5612_s1 + $0x60] ss:$8 sps:$4 sm:$0xff]   ;;  %v3881_v5 = vld [vmem:[%s5612_s1 + $0x370] ss:$8 sps:$4 sm:$0xff]  }
  0x17   :  { %1767 = vmatpush1.bf16.msra.mxu0 %v3829_v11  ;;  %1675 = vmatpush1.bf16.msra.mxu1 %v3970_v51  ;;  %v3995_v4 = vld [vmem:[%s5612_s1 + $0x74] ss:$8 sps:$4 sm:$0xff]   ;;  %v3886_v6 = vld [vmem:[%s5612_s1 + $0x384] ss:$8 sps:$4 sm:$0xff]   ;;  %v4000_v7 = vld [vmem:[%s5612_s1 + $0x70] ss:$8 sps:$4 sm:$0xff]  }
  0x18   :  { %1768 = vmatprep.subr.bf16.mxu0 %v3830_v12  ;;  %1676 = vmatprep.subr.bf16.mxu1 %v3971_v52  ;;  %v4001_v8 = vld [vmem:[%s5612_s1 + $0x84] ss:$8 sps:$4 sm:$0xff]   ;;  %v3884_v9 = vld [vmem:[%s5612_s1 + $0x380] ss:$8 sps:$4 sm:$0xff]   ;;  %v3889_v10 = vld [vmem:[%s5612_s1 + $0x394] ss:$8 sps:$4 sm:$0xff]  }
  0x19   :  { %v4006_v11 = vld [vmem:[%s5612_s1 + $0x80] ss:$8 sps:$4 sm:$0xff]   ;;  %v4007_v12 = vld [vmem:[%s5612_s1 + $0x94] ss:$8 sps:$4 sm:$0xff]   ;;  %v3887_v13 = vld [vmem:[%s5612_s1 + $0x390] ss:$8 sps:$4 sm:$0xff]  }
  0x1a   :  { %v3892_v14 = vld [vmem:[%s5612_s1 + $0x3a4] ss:$8 sps:$4 sm:$0xff]   ;;  %v4012_v15 = vld [vmem:[%s5612_s1 + $0x90] ss:$8 sps:$4 sm:$0xff]   ;;  %v3913_v51 = vld [vmem:[%s5612_s1 + $0x414] ss:$8 sps:$4 sm:$0xff]  }
  0x1b   :  { %1769 = vmatpush1.bf16.msra.mxu0 %v3832_v16  ;;  %1677 = vmatpush1.bf16.msra.mxu1 %v3976_v55  ;;  %v4013_v16 = vld [vmem:[%s5612_s1 + $0xa4] ss:$8 sps:$4 sm:$0xff]   ;;  %v4048_v45 = vld [vmem:[%s5612_s1 + $0xf0] ss:$8 sps:$4 sm:$0xff]   ;;  %v4049_v36 = vld [vmem:[%s5612_s1 + $0x100] ss:$8 sps:$4 sm:$0xff]  }
  0x1c   :  { %1770 = vmatprep.subr.bf16.mxu0 %v3833_v17  ;;  %1678 = vmatprep.subr.bf16.mxu1 %v3977_v56  ;;  %v3890_v17 = vld [vmem:[%s5612_s1 + $0x3a0] ss:$8 sps:$4 sm:$0xff]   ;;  %v4051_v47 = vld [vmem:[%s5612_s1 + $0x104] ss:$8 sps:$4 sm:$0xff]   ;;  %v4057_v37 = vld [vmem:[%s5612_s1 + $0x114] ss:$8 sps:$4 sm:$0xff]  }
  0x1d   :  { %v26_v42 = vld [vmem:[%s5613_s0] sm:$0xff]  ;;  %v4055_v55 = vld [vmem:[%s5612_s1 + $0x110] ss:$8 sps:$4 sm:$0xff]  }
  0x1e   :  { %v34_v43 = vld [vmem:[%s5613_s0 + $0x40] sm:$0xff] }
  0x1f   :  { %1771 = vmatpush1.bf16.msra.mxu0 %v3835_v18  ;;  %1679 = vmatpush1.bf16.msra.mxu1 %v3982_v59  ;;  %v3895_v18 = vld [vmem:[%s5612_s1 + $0x3b4] ss:$8 sps:$4 sm:$0xff]   ;;  %v3347_v52 = vcombine.low %v26_v42, %v34_v43  ;;  %v4063_v56 = vld [vmem:[%s5612_s1 + $0x124] ss:$8 sps:$4 sm:$0xff]   ;;  %v4061_v59 = vld [vmem:[%s5612_s1 + $0x120] ss:$8 sps:$4 sm:$0xff]  }
  0x20   :  { %1772 = vmatprep.subr.bf16.mxu0 %v3836_v19  ;;  %1680 = vmatprep.subr.bf16.mxu1 %v3983_v60  ;;  %v4018_v19 = vld [vmem:[%s5612_s1 + $0xa0] ss:$8 sps:$4 sm:$0xff]   ;;  %v4069_v60 = vld [vmem:[%s5612_s1 + $0x134] ss:$8 sps:$4 sm:$0xff]  }
  0x23   :  { %1773 = vmatpush1.bf16.msra.mxu0 %v3838_v20  ;;  %1681 = vmatpush1.bf16.msra.mxu1 %v3988_v63  ;;  %v4019_v20 = vld [vmem:[%s5612_s1 + $0xb4] ss:$8 sps:$4 sm:$0xff]   ;;  %v4067_v63 = vld [vmem:[%s5612_s1 + $0x130] ss:$8 sps:$4 sm:$0xff]  }
  0x24   :  { %1774 = vmatprep.subr.bf16.mxu0 %v3839_v21  ;;  %1682 = vmatprep.subr.bf16.mxu1 %v3989_v0  ;;  %v3893_v21 = vld [vmem:[%s5612_s1 + $0x3b0] ss:$8 sps:$4 sm:$0xff]   ;;  %v4075_v0 = vld [vmem:[%s5612_s1 + $0x144] ss:$8 sps:$4 sm:$0xff]  }
  0x27   :  { %1775 = vmatpush1.bf16.msra.mxu0 %v3841_v22  ;;  %1683 = vmatpush1.bf16.msra.mxu1 %v3994_v3  ;;  %v3898_v22 = vld [vmem:[%s5612_s1 + $0x3c4] ss:$8 sps:$4 sm:$0xff]   ;;  %v4073_v3 = vld [vmem:[%s5612_s1 + $0x140] ss:$8 sps:$4 sm:$0xff]  }
  0x28   :  { %1776 = vmatprep.subr.bf16.mxu0 %v3842_v23  ;;  %1684 = vmatprep.subr.bf16.mxu1 %v3995_v4  ;;  %v4024_v23 = vld [vmem:[%s5612_s1 + $0xb0] ss:$8 sps:$4 sm:$0xff]   ;;  %v4081_v4 = vld [vmem:[%s5612_s1 + $0x154] ss:$8 sps:$4 sm:$0xff]  }
  0x2b   :  { %1777 = vmatpush1.bf16.msra.mxu0 %v3844_v24  ;;  %1685 = vmatpush1.bf16.msra.mxu1 %v4000_v7  ;;  %v4025_v24 = vld [vmem:[%s5612_s1 + $0xc4] ss:$8 sps:$4 sm:$0xff]   ;;  %v4079_v7 = vld [vmem:[%s5612_s1 + $0x150] ss:$8 sps:$4 sm:$0xff]  }
  0x2c   :  { %1778 = vmatprep.subr.bf16.mxu0 %v3845_v25  ;;  %1686 = vmatprep.subr.bf16.mxu1 %v4001_v8  ;;  %v3896_v25 = vld [vmem:[%s5612_s1 + $0x3c0] ss:$8 sps:$4 sm:$0xff]   ;;  %v4087_v8 = vld [vmem:[%s5612_s1 + $0x164] ss:$8 sps:$4 sm:$0xff]  }
  0x2f   :  { %1779 = vmatpush1.bf16.msra.mxu0 %v3847_v26  ;;  %1687 = vmatpush1.bf16.msra.mxu1 %v4006_v11  ;;  %v3901_v26 = vld [vmem:[%s5612_s1 + $0x3d4] ss:$8 sps:$4 sm:$0xff]   ;;  %v4085_v11 = vld [vmem:[%s5612_s1 + $0x160] ss:$8 sps:$4 sm:$0xff]  }
  0x30   :  { %1780 = vmatprep.subr.bf16.mxu0 %v3848_v27  ;;  %1688 = vmatprep.subr.bf16.mxu1 %v4007_v12  ;;  %v4030_v27 = vld [vmem:[%s5612_s1 + $0xc0] ss:$8 sps:$4 sm:$0xff]   ;;  %v4093_v12 = vld [vmem:[%s5612_s1 + $0x174] ss:$8 sps:$4 sm:$0xff]  }
  0x33   :  { %1781 = vmatpush1.bf16.msra.mxu0 %v3850_v28  ;;  %1689 = vmatpush1.bf16.msra.mxu1 %v4012_v15  ;;  %v4031_v28 = vld [vmem:[%s5612_s1 + $0xd4] ss:$8 sps:$4 sm:$0xff]   ;;  %v4091_v15 = vld [vmem:[%s5612_s1 + $0x170] ss:$8 sps:$4 sm:$0xff]  }
  0x34   :  { %1782 = vmatprep.subr.bf16.mxu0 %v3851_v29  ;;  %1690 = vmatprep.subr.bf16.mxu1 %v4013_v16  ;;  %v3899_v29 = vld [vmem:[%s5612_s1 + $0x3d0] ss:$8 sps:$4 sm:$0xff]   ;;  %v4099_v16 = vld [vmem:[%s5612_s1 + $0x184] ss:$8 sps:$4 sm:$0xff]  }
  0x37   :  { %1783 = vmatpush1.bf16.msra.mxu0 %v3853_v30  ;;  %1691 = vmatpush1.bf16.msra.mxu1 %v4018_v19  ;;  %v3904_v30 = vld [vmem:[%s5612_s1 + $0x3e4] ss:$8 sps:$4 sm:$0xff]   ;;  %v4097_v19 = vld [vmem:[%s5612_s1 + $0x180] ss:$8 sps:$4 sm:$0xff]  }
  0x38   :  { %1784 = vmatprep.subr.bf16.mxu0 %v3854_v31  ;;  %1692 = vmatprep.subr.bf16.mxu1 %v4019_v20  ;;  %v4036_v31 = vld [vmem:[%s5612_s1 + $0xd0] ss:$8 sps:$4 sm:$0xff]   ;;  %v4105_v20 = vld [vmem:[%s5612_s1 + $0x194] ss:$8 sps:$4 sm:$0xff]  }
  0x3b   :  { %1785 = vmatpush1.bf16.msra.mxu0 %v3856_v32  ;;  %1693 = vmatpush1.bf16.msra.mxu1 %v4024_v23  ;;  %v4037_v32 = vld [vmem:[%s5612_s1 + $0xe4] ss:$8 sps:$4 sm:$0xff]   ;;  %v4103_v23 = vld [vmem:[%s5612_s1 + $0x190] ss:$8 sps:$4 sm:$0xff]  }
  0x3c   :  { %1786 = vmatprep.subr.bf16.mxu0 %v3857_v33  ;;  %1694 = vmatprep.subr.bf16.mxu1 %v4025_v24  ;;  %v3902_v33 = vld [vmem:[%s5612_s1 + $0x3e0] ss:$8 sps:$4 sm:$0xff]   ;;  %v4111_v24 = vld [vmem:[%s5612_s1 + $0x1a4] ss:$8 sps:$4 sm:$0xff]  }
  0x3f   :  { %1787 = vmatpush1.bf16.msra.mxu0 %v3859_v34  ;;  %1695 = vmatpush1.bf16.msra.mxu1 %v4030_v27  ;;  %v3907_v34 = vld [vmem:[%s5612_s1 + $0x3f4] ss:$8 sps:$4 sm:$0xff]   ;;  %v4109_v27 = vld [vmem:[%s5612_s1 + $0x1a0] ss:$8 sps:$4 sm:$0xff]  }
  0x40   :  { %1799 = vmatprep.subr.bf16.mxu0 %v3862_v35  ;;  %1696 = vmatprep.subr.bf16.mxu1 %v4031_v28  ;;  %v4042_v35 = vld [vmem:[%s5612_s1 + $0xe0] ss:$8 sps:$4 sm:$0xff]   ;;  %v4117_v28 = vld [vmem:[%s5612_s1 + $0x1b4] ss:$8 sps:$4 sm:$0xff]  }
  0x42   :  { %1789 = vmatmul.mubr.bf16.vlgmr.msra.gmra.mrb[0].mxu0 %v3351_v38  ;;  %v4043_v38 = vld [vmem:[%s5612_s1 + $0xf4] ss:$8 sps:$4 sm:$0xff]  }
  0x43   :  { %1800 = vmatpush1.bf16.msra.mxu0 %v3860_v39  ;;  %1831 = vmatprep.mubr.bf16.mxu0 %v3354_v41  ;;  %v3905_v39 = vld [vmem:[%s5612_s1 + $0x3f0] ss:$8 sps:$4 sm:$0xff]   ;;  %v4550_v41 = vld [vmem:[%s5613_s0 + $0x20] sm:$0xff] }
  0x44   :  { %1801 = vmatprep.subr.bf16.mxu0 %v3865_v40  ;;  %1697 = vmatpush1.bf16.msra.mxu1 %v4036_v31  ;;  %v3910_v40 = vld [vmem:[%s5612_s1 + $0x404] ss:$8 sps:$4 sm:$0xff]   ;;  %v4115_v31 = vld [vmem:[%s5612_s1 + $0x1b0] ss:$8 sps:$4 sm:$0xff]  }
  0x45   :  { %1698 = vmatprep.subr.bf16.mxu1 %v4037_v32  ;;  %v4123_v32 = vld [vmem:[%s5612_s1 + $0x1c4] ss:$8 sps:$4 sm:$0xff]  }
  0x47   :  { %1802 = vmatpush1.bf16.msra.mxu0 %v3863_v44  ;;  %v4561_v44 = vld [vmem:[%s5613_s0 + $0x60] sm:$0xff] }
  0x48   :  { %1803 = vmatprep.subr.bf16.mxu0 %v3868_v46  ;;  %1699 = vmatpush1.bf16.msra.mxu1 %v4042_v35  ;;  %v3348_v46 = vcombine.high %v26_v42, %v34_v43  ;;  %v4121_v35 = vld [vmem:[%s5612_s1 + $0x1c0] ss:$8 sps:$4 sm:$0xff]   ;;  %v4127_v42 = vld [vmem:[%s5612_s1 + $0x1d0] ss:$8 sps:$4 sm:$0xff]   ;;  %v4135_v43 = vld [vmem:[%s5612_s1 + $0x1e4] ss:$8 sps:$4 sm:$0xff]  }
  0x49   :  { %1700 = vmatprep.subr.bf16.mxu1 %v4043_v38  ;;  %v4129_v38 = vld [vmem:[%s5612_s1 + $0x1d4] ss:$8 sps:$4 sm:$0xff]  }
  0x4a   :  { %1702 = vmatprep.mubr.bf16.mxu1 %v3348_v46  ;;  %v3957_v46 = vld [vmem:[%s5612_s1 + $0x4f4] ss:$8 sps:$4 sm:$0xff]  }
  0x4b   :  { %1804 = vmatpush1.bf16.msra.mxu0 %v3866_v49  ;;  %v3908_v49 = vld [vmem:[%s5612_s1 + $0x400] ss:$8 sps:$4 sm:$0xff]  }
  0x4c   :  { %1805 = vmatprep.subr.bf16.mxu0 %v3871_v50  ;;  %v3356_v50 = vcombine.high %v4550_v41, %v4561_v44  ;;  %1701 = vmatpush1.bf16.msra.mxu1 %v4048_v45  ;;  %v3950_v45 = vld [vmem:[%s5612_s1 + $0x4e0] ss:$8 sps:$4 sm:$0xff]  }
  0x4d   :  { %1713 = vmatprep.subr.bf16.mxu1 %v4051_v47  ;;  %v4133_v47 = vld [vmem:[%s5612_s1 + $0x1e0] ss:$8 sps:$4 sm:$0xff]  }
  0x4f   :  { %1806 = vmatpush1.bf16.msra.mxu0 %v3869_v53  ;;  %v3911_v53 = vld [vmem:[%s5612_s1 + $0x410] ss:$8 sps:$4 sm:$0xff]   ;;  %1703 = vmatmul.mubr.bf16.vlgmr.msra.gmra.mrb[0].mxu1 %v3347_v52 }
  0x50   :  { %1807 = vmatprep.subr.bf16.mxu0 %v3874_v54  ;;  %v3916_v54 = vld [vmem:[%s5612_s1 + $0x424] ss:$8 sps:$4 sm:$0xff]   ;;  %1714 = vmatpush1.bf16.msra.mxu1 %v4049_v36 }
  0x51   :  { %1715 = vmatprep.subr.bf16.mxu1 %v4057_v37  ;;  %v3963_v36 = vld [vmem:[%s5612_s1 + $0x504] ss:$8 sps:$4 sm:$0xff]  }
  0x52   :  { %v4768_v37 = vld [vmem:[%s5613_s0 + $0x28] sm:$0xff] }
  0x53   :  { %1808 = vmatpush1.bf16.msra.mxu0 %v3872_v57  ;;  %v3914_v57 = vld [vmem:[%s5612_s1 + $0x420] ss:$8 sps:$4 sm:$0xff]  }
  0x54   :  { %1809 = vmatprep.subr.bf16.mxu0 %v3877_v58  ;;  %v3919_v58 = vld [vmem:[%s5612_s1 + $0x434] ss:$8 sps:$4 sm:$0xff]   ;;  %1716 = vmatpush1.bf16.msra.mxu1 %v4055_v55  ;;  %v3355_v55 = vcombine.low %v4550_v41, %v4561_v44  ;;  %v3967_v41 = vld [vmem:[%s5612_s1 + $0x510] ss:$8 sps:$4 sm:$0xff]   ;;  %v3975_v44 = vld [vmem:[%s5612_s1 + $0x524] ss:$8 sps:$4 sm:$0xff]  }
  0x55   :  { %1717 = vmatprep.subr.bf16.mxu1 %v4063_v56  ;;  %v3961_v56 = vld [vmem:[%s5612_s1 + $0x500] ss:$8 sps:$4 sm:$0xff]  }
  0x57   :  { %1810 = vmatpush1.bf16.msra.mxu0 %v3875_v61  ;;  %v3917_v61 = vld [vmem:[%s5612_s1 + $0x430] ss:$8 sps:$4 sm:$0xff]  }
  0x58   :  { %1811 = vmatprep.subr.bf16.mxu0 %v3880_v62  ;;  %v3922_v62 = vld [vmem:[%s5612_s1 + $0x444] ss:$8 sps:$4 sm:$0xff]   ;;  %1718 = vmatpush1.bf16.msra.mxu1 %v4061_v59 }
  0x59   :  { %1719 = vmatprep.subr.bf16.mxu1 %v4069_v60  ;;  %v3973_v60 = vld [vmem:[%s5612_s1 + $0x520] ss:$8 sps:$4 sm:$0xff]  }
  0x5b   :  { %1812 = vmatpush1.bf16.msra.mxu0 %v3878_v1  ;;  %v3920_v1 = vld [vmem:[%s5612_s1 + $0x440] ss:$8 sps:$4 sm:$0xff]  }
  0x5c   :  { %1813 = vmatprep.subr.bf16.mxu0 %v3883_v2  ;;  %v3925_v2 = vld [vmem:[%s5612_s1 + $0x454] ss:$8 sps:$4 sm:$0xff]   ;;  %1720 = vmatpush1.bf16.msra.mxu1 %v4067_v63  ;;  %v3987_v63 = vld [vmem:[%s5612_s1 + $0x544] ss:$8 sps:$4 sm:$0xff]  }
  0x5d   :  { %1721 = vmatprep.subr.bf16.mxu1 %v4075_v0  ;;  %v3985_v0 = vld [vmem:[%s5612_s1 + $0x540] ss:$8 sps:$4 sm:$0xff]  }
  0x5f   :  { %1814 = vmatpush1.bf16.msra.mxu0 %v3881_v5  ;;  %v3923_v5 = vld [vmem:[%s5612_s1 + $0x450] ss:$8 sps:$4 sm:$0xff]  }
  0x60   :  { %1815 = vmatprep.subr.bf16.mxu0 %v3886_v6  ;;  %v3928_v6 = vld [vmem:[%s5612_s1 + $0x464] ss:$8 sps:$4 sm:$0xff]   ;;  %1722 = vmatpush1.bf16.msra.mxu1 %v4073_v3 }
  0x61   :  { %1723 = vmatprep.subr.bf16.mxu1 %v4081_v4  ;;  %v3999_v3 = vld [vmem:[%s5612_s1 + $0x564] ss:$8 sps:$4 sm:$0xff]   ;;  %v3997_v4 = vld [vmem:[%s5612_s1 + $0x560] ss:$8 sps:$4 sm:$0xff]  }
  0x63   :  { %1816 = vmatpush1.bf16.msra.mxu0 %v3884_v9  ;;  %v3926_v9 = vld [vmem:[%s5612_s1 + $0x460] ss:$8 sps:$4 sm:$0xff]  }
  0x64   :  { %1817 = vmatprep.subr.bf16.mxu0 %v3889_v10  ;;  %v3931_v10 = vld [vmem:[%s5612_s1 + $0x474] ss:$8 sps:$4 sm:$0xff]   ;;  %1724 = vmatpush1.bf16.msra.mxu1 %v4079_v7  ;;  %v4011_v7 = vld [vmem:[%s5612_s1 + $0x584] ss:$8 sps:$4 sm:$0xff]  }
  0x65   :  { %1725 = vmatprep.subr.bf16.mxu1 %v4087_v8  ;;  %v4009_v8 = vld [vmem:[%s5612_s1 + $0x580] ss:$8 sps:$4 sm:$0xff]  }
  0x67   :  { %1818 = vmatpush1.bf16.msra.mxu0 %v3887_v13  ;;  %v3929_v13 = vld [vmem:[%s5612_s1 + $0x470] ss:$8 sps:$4 sm:$0xff]  }
  0x68   :  { %1819 = vmatprep.subr.bf16.mxu0 %v3892_v14  ;;  %v3934_v14 = vld [vmem:[%s5612_s1 + $0x484] ss:$8 sps:$4 sm:$0xff]   ;;  %1726 = vmatpush1.bf16.msra.mxu1 %v4085_v11 }
  0x69   :  { %1727 = vmatprep.subr.bf16.mxu1 %v4093_v12  ;;  %v4023_v11 = vld [vmem:[%s5612_s1 + $0x5a4] ss:$8 sps:$4 sm:$0xff]   ;;  %v4021_v12 = vld [vmem:[%s5612_s1 + $0x5a0] ss:$8 sps:$4 sm:$0xff]  }
  0x6b   :  { %1820 = vmatpush1.bf16.msra.mxu0 %v3890_v17  ;;  %v3932_v17 = vld [vmem:[%s5612_s1 + $0x480] ss:$8 sps:$4 sm:$0xff]  }
  0x6c   :  { %1821 = vmatprep.subr.bf16.mxu0 %v3895_v18  ;;  %v3937_v18 = vld [vmem:[%s5612_s1 + $0x494] ss:$8 sps:$4 sm:$0xff]   ;;  %1728 = vmatpush1.bf16.msra.mxu1 %v4091_v15  ;;  %v4035_v15 = vld [vmem:[%s5612_s1 + $0x5c4] ss:$8 sps:$4 sm:$0xff]  }
  0x6d   :  { %1729 = vmatprep.subr.bf16.mxu1 %v4099_v16  ;;  %v4033_v16 = vld [vmem:[%s5612_s1 + $0x5c0] ss:$8 sps:$4 sm:$0xff]  }
  0x6f   :  { %1822 = vmatpush1.bf16.msra.mxu0 %v3893_v21  ;;  %v3935_v21 = vld [vmem:[%s5612_s1 + $0x490] ss:$8 sps:$4 sm:$0xff]  }
  0x70   :  { %1823 = vmatprep.subr.bf16.mxu0 %v3898_v22  ;;  %v3940_v22 = vld [vmem:[%s5612_s1 + $0x4a4] ss:$8 sps:$4 sm:$0xff]   ;;  %1730 = vmatpush1.bf16.msra.mxu1 %v4097_v19 }
  0x71   :  { %1731 = vmatprep.subr.bf16.mxu1 %v4105_v20  ;;  %v4047_v19 = vld [vmem:[%s5612_s1 + $0x5e4] ss:$8 sps:$4 sm:$0xff]   ;;  %v4045_v20 = vld [vmem:[%s5612_s1 + $0x5e0] ss:$8 sps:$4 sm:$0xff]  }
  0x73   :  { %1824 = vmatpush1.bf16.msra.mxu0 %v3896_v25  ;;  %v3938_v25 = vld [vmem:[%s5612_s1 + $0x4a0] ss:$8 sps:$4 sm:$0xff]  }
  0x74   :  { %1825 = vmatprep.subr.bf16.mxu0 %v3901_v26  ;;  %v3943_v26 = vld [vmem:[%s5612_s1 + $0x4b4] ss:$8 sps:$4 sm:$0xff]   ;;  %1732 = vmatpush1.bf16.msra.mxu1 %v4103_v23  ;;  %v4060_v23 = vld [vmem:[%s5612_s1 + $0x604] ss:$8 sps:$4 sm:$0xff]  }
  0x75   :  { %1733 = vmatprep.subr.bf16.mxu1 %v4111_v24  ;;  %v4881_v24 = vld [vmem:[%s5613_s0 + $0x30] sm:$0xff] }
  0x77   :  { %1826 = vmatpush1.bf16.msra.mxu0 %v3899_v29  ;;  %v3941_v29 = vld [vmem:[%s5612_s1 + $0x4b0] ss:$8 sps:$4 sm:$0xff]  }
  0x78   :  { %1827 = vmatprep.subr.bf16.mxu0 %v3904_v30  ;;  %v3946_v30 = vld [vmem:[%s5612_s1 + $0x4c4] ss:$8 sps:$4 sm:$0xff]   ;;  %1734 = vmatpush1.bf16.msra.mxu1 %v4109_v27  ;;  %v4058_v27 = vld [vmem:[%s5612_s1 + $0x600] ss:$8 sps:$4 sm:$0xff]  }
  0x79   :  { %1735 = vmatprep.subr.bf16.mxu1 %v4117_v28 }
  0x7b   :  { %1828 = vmatpush1.bf16.msra.mxu0 %v3902_v33  ;;  %v3944_v33 = vld [vmem:[%s5612_s1 + $0x4c0] ss:$8 sps:$4 sm:$0xff]  }
  0x7c   :  { %1829 = vmatprep.subr.bf16.mxu0 %v3907_v34  ;;  %v3949_v34 = vld [vmem:[%s5612_s1 + $0x4d4] ss:$8 sps:$4 sm:$0xff]   ;;  %1736 = vmatpush1.bf16.msra.mxu1 %v4115_v31  ;;  %v4072_v31 = vld [vmem:[%s5612_s1 + $0x624] ss:$8 sps:$4 sm:$0xff]  }
  0x7d   :  { %1737 = vmatprep.subr.bf16.mxu1 %v4123_v32  ;;  %v4070_v32 = vld [vmem:[%s5612_s1 + $0x620] ss:$8 sps:$4 sm:$0xff]  }
  0x7f   :  { %1830 = vmatpush1.bf16.msra.mxu0 %v3905_v39  ;;  %v3947_v39 = vld [vmem:[%s5612_s1 + $0x4d0] ss:$8 sps:$4 sm:$0xff]  }
  0x80   :  { %1842 = vmatprep.subr.bf16.mxu0 %v3910_v40  ;;  %v3952_v40 = vld [vmem:[%s5612_s1 + $0x4e4] ss:$8 sps:$4 sm:$0xff]   ;;  %1738 = vmatpush1.bf16.msra.mxu1 %v4121_v35 }
  0x81   :  { %1739 = vmatprep.subr.bf16.mxu1 %v4129_v38  ;;  %v4084_v35 = vld [vmem:[%s5612_s1 + $0x644] ss:$8 sps:$4 sm:$0xff]   ;;  %v4082_v38 = vld [vmem:[%s5612_s1 + $0x640] ss:$8 sps:$4 sm:$0xff]  }
  0x82   :  { %1832 = vmatmul.mubr.bf16.vlgmr.msra.gmra.mrb[0].mxu0 %v3353_v48  ;;  %v4141_v48 = vld [vmem:[%s5612_s1 + $0x1f4] ss:$8 sps:$4 sm:$0xff]  }
  0x83   :  { %1843 = vmatpush1.bf16.msra.mxu0 %v3908_v49  ;;  %1874 = vmatprep.mubr.bf16.mxu0 %v3356_v50  ;;  %v27_v49 = vld [vmem:[%s5613_s0 + $0x8] sm:$0xff] }
  0x84   :  { %1844 = vmatprep.subr.bf16.mxu0 %v3913_v51  ;;  %1740 = vmatpush1.bf16.msra.mxu1 %v4127_v42  ;;  %v35_v50 = vld [vmem:[%s5613_s0 + $0x48] sm:$0xff]  ;;  %v3955_v51 = vld [vmem:[%s5612_s1 + $0x4f0] ss:$8 sps:$4 sm:$0xff]  }
  0x85   :  { %1741 = vmatprep.subr.bf16.mxu1 %v4135_v43  ;;  %v3350_v52 = vcombine.high %v27_v49, %v35_v50  ;;  %v3349_v59 = vcombine.low %v27_v49, %v35_v50  ;;  %v4096_v42 = vld [vmem:[%s5612_s1 + $0x664] ss:$8 sps:$4 sm:$0xff]   ;;  %v4094_v43 = vld [vmem:[%s5612_s1 + $0x660] ss:$8 sps:$4 sm:$0xff]  }
  0x86   :  { %v2039_v49 = vld [vmem:[%s5614_s4 + $0x40] sm:$0xff] }
  0x87   :  { %1845 = vmatpush1.bf16.msra.mxu0 %v3911_v53  ;;  %v4773_v53 = vld [vmem:[%s5613_s0 + $0x68] sm:$0xff]  ;;  %1745 = vmatprep.mubr.bf16.mxu1 %v3350_v52  ;;  %v2047_v50 = vld [vmem:[%s5614_s4 + $0x80] sm:$0xff] }
  0x88   :  { %1846 = vmatprep.subr.bf16.mxu0 %v3916_v54  ;;  %1742 = vmatpush1.bf16.msra.mxu1 %v4133_v47  ;;  %v4139_v54 = vld [vmem:[%s5612_s1 + $0x1f0] ss:$8 sps:$4 sm:$0xff]   ;;  %v4108_v47 = vld [vmem:[%s5612_s1 + $0x684] ss:$8 sps:$4 sm:$0xff]  }
  0x89   :  { %1743 = vmatprep.subr.bf16.mxu1 %v4141_v48  ;;  %v2031_v48 = vld [vmem:[%s5614_s4] sm:$0xff] }
  0x8a   :  { %v3620_v52 = vcombine.high %v2031_v48, %v2039_v49 }
  0x8b   :  { %1847 = vmatpush1.bf16.msra.mxu0 %v3914_v57  ;;  %v3358_v57 = vcombine.high %v4768_v37, %v4773_v53 }
  0x8c   :  { %1848 = vmatprep.subr.bf16.mxu0 %v3919_v58  ;;  %v3969_v58 = vld [vmem:[%s5612_s1 + $0x514] ss:$8 sps:$4 sm:$0xff]   ;;  %1744 = vmatpush1.bf16.msra.mxu1 %v4139_v54 }
  0x8d   :  { %2883 = vmatprep.subr.bf16.mxu1 %v3620_v52  ;;  %v4114_v54 = vld [vmem:[%s5612_s1 + $0x694] ss:$8 sps:$4 sm:$0xff]   ;;  %v2079_v52 = vld [vmem:[%s5614_s4 + $0x180] sm:$0xff] }
  0x8f   :  { %1849 = vmatpush1.bf16.msra.mxu0 %v3917_v61  ;;  %1746 = vmatmul.mubr.bf16.vlgmr.msra.gmra.mrb[0].mxu1 %v3349_v59  ;;  %v3981_v61 = vld [vmem:[%s5612_s1 + $0x534] ss:$8 sps:$4 sm:$0xff]  }
  0x90   :  { %1850 = vmatprep.subr.bf16.mxu0 %v3922_v62  ;;  %v3979_v62 = vld [vmem:[%s5612_s1 + $0x530] ss:$8 sps:$4 sm:$0xff]   ;;  %v4126_v59 = vld [vmem:[%s5612_s1 + $0x6b4] ss:$8 sps:$4 sm:$0xff]  }
  0x93   :  { %1851 = vmatpush1.bf16.msra.mxu0 %v3920_v1  ;;  %v3993_v1 = vld [vmem:[%s5612_s1 + $0x554] ss:$8 sps:$4 sm:$0xff]  }
  0x94   :  { %1852 = vmatprep.subr.bf16.mxu0 %v3925_v2  ;;  %v3991_v2 = vld [vmem:[%s5612_s1 + $0x550] ss:$8 sps:$4 sm:$0xff]  }
  0x97   :  { %1853 = vmatpush1.bf16.msra.mxu0 %v3923_v5  ;;  %v4005_v5 = vld [vmem:[%s5612_s1 + $0x574] ss:$8 sps:$4 sm:$0xff]  }
  0x98   :  { %1854 = vmatprep.subr.bf16.mxu0 %v3928_v6  ;;  %v4003_v6 = vld [vmem:[%s5612_s1 + $0x570] ss:$8 sps:$4 sm:$0xff]  }
  0x9b   :  { %1855 = vmatpush1.bf16.msra.mxu0 %v3926_v9  ;;  %v4017_v9 = vld [vmem:[%s5612_s1 + $0x594] ss:$8 sps:$4 sm:$0xff]  }
  0x9c   :  { %1856 = vmatprep.subr.bf16.mxu0 %v3931_v10  ;;  %v4015_v10 = vld [vmem:[%s5612_s1 + $0x590] ss:$8 sps:$4 sm:$0xff]  }
  0x9f   :  { %1857 = vmatpush1.bf16.msra.mxu0 %v3929_v13  ;;  %v4029_v13 = vld [vmem:[%s5612_s1 + $0x5b4] ss:$8 sps:$4 sm:$0xff]  }
  0xa0   :  { %1858 = vmatprep.subr.bf16.mxu0 %v3934_v14  ;;  %v4027_v14 = vld [vmem:[%s5612_s1 + $0x5b0] ss:$8 sps:$4 sm:$0xff]  }
  0xa3   :  { %1859 = vmatpush1.bf16.msra.mxu0 %v3932_v17  ;;  %v4041_v17 = vld [vmem:[%s5612_s1 + $0x5d4] ss:$8 sps:$4 sm:$0xff]  }
  0xa4   :  { %1860 = vmatprep.subr.bf16.mxu0 %v3937_v18  ;;  %v4039_v18 = vld [vmem:[%s5612_s1 + $0x5d0] ss:$8 sps:$4 sm:$0xff]  }
  0xa7   :  { %1861 = vmatpush1.bf16.msra.mxu0 %v3935_v21  ;;  %v4054_v21 = vld [vmem:[%s5612_s1 + $0x5f4] ss:$8 sps:$4 sm:$0xff]  }
  0xa8   :  { %1862 = vmatprep.subr.bf16.mxu0 %v3940_v22  ;;  %v4052_v22 = vld [vmem:[%s5612_s1 + $0x5f0] ss:$8 sps:$4 sm:$0xff]  }
  0xab   :  { %1863 = vmatpush1.bf16.msra.mxu0 %v3938_v25  ;;  %v4886_v25 = vld [vmem:[%s5613_s0 + $0x70] sm:$0xff] }
  0xac   :  { %1864 = vmatprep.subr.bf16.mxu0 %v3943_v26  ;;  %v3357_v26 = vcombine.low %v4768_v37, %v4773_v53  ;;  %v3360_v28 = vcombine.high %v4881_v24, %v4886_v25  ;;  %v4106_v53 = vld [vmem:[%s5612_s1 + $0x680] ss:$8 sps:$4 sm:$0xff]  }
  0xaf   :  { %1865 = vmatpush1.bf16.msra.mxu0 %v3941_v29  ;;  %v4066_v29 = vld [vmem:[%s5612_s1 + $0x614] ss:$8 sps:$4 sm:$0xff]  }
  0xb0   :  { %1866 = vmatprep.subr.bf16.mxu0 %v3946_v30  ;;  %v4064_v30 = vld [vmem:[%s5612_s1 + $0x610] ss:$8 sps:$4 sm:$0xff]  }
  0xb3   :  { %1867 = vmatpush1.bf16.msra.mxu0 %v3944_v33  ;;  %v4078_v33 = vld [vmem:[%s5612_s1 + $0x634] ss:$8 sps:$4 sm:$0xff]  }
  0xb4   :  { %1868 = vmatprep.subr.bf16.mxu0 %v3949_v34  ;;  %v4076_v34 = vld [vmem:[%s5612_s1 + $0x630] ss:$8 sps:$4 sm:$0xff]  }
  0xb7   :  { %1869 = vmatpush1.bf16.msra.mxu0 %v3947_v39  ;;  %v4090_v39 = vld [vmem:[%s5612_s1 + $0x654] ss:$8 sps:$4 sm:$0xff]  }
  0xb8   :  { %1870 = vmatprep.subr.bf16.mxu0 %v3952_v40  ;;  %v4088_v40 = vld [vmem:[%s5612_s1 + $0x650] ss:$8 sps:$4 sm:$0xff]  }
  0xbb   :  { %1871 = vmatpush1.bf16.msra.mxu0 %v3950_v45  ;;  %v4102_v45 = vld [vmem:[%s5612_s1 + $0x674] ss:$8 sps:$4 sm:$0xff]  }
  0xbc   :  { %1872 = vmatprep.subr.bf16.mxu0 %v3957_v46  ;;  %v4100_v46 = vld [vmem:[%s5612_s1 + $0x670] ss:$8 sps:$4 sm:$0xff]  }
  0xbf   :  { %1873 = vmatpush1.bf16.msra.mxu0 %v3955_v51  ;;  %v3619_v51 = vcombine.low %v2031_v48, %v2039_v49  ;;  %v2063_v48 = vld [vmem:[%s5614_s4 + $0x100] sm:$0xff] }
  0xc0   :  { %1885 = vmatprep.subr.bf16.mxu0 %v3963_v36  ;;  %v2055_v36 = vld [vmem:[%s5614_s4 + $0xc0] sm:$0xff] }
  0xc1   :  { %v3636_v37 = vcombine.high %v2047_v50, %v2055_v36  ;;  %2884 = vmatpush1.bf16.msra.mxu1 %v3619_v51  ;;  %v2071_v49 = vld [vmem:[%s5614_s4 + $0x140] sm:$0xff] }
  0xc2   :  { %1875 = vmatmul.mubr.bf16.vlgmr.msra.gmra.mrb[0].mxu0 %v3355_v55  ;;  %v3635_v55 = vcombine.low %v2047_v50, %v2055_v36  ;;  %v3652_v50 = vcombine.high %v2063_v48, %v2071_v49  ;;  %v3651_v51 = vcombine.low %v2063_v48, %v2071_v49  ;;  %v2087_v36 = vld [vmem:[%s5614_s4 + $0x1c0] sm:$0xff]  ;;  %v2064_v48 = vld [vmem:[%s5614_s4 + $0x108] sm:$0xff] }
  0xc3   :  { %1886 = vmatpush1.bf16.msra.mxu0 %v3961_v56  ;;  %1917 = vmatprep.mubr.bf16.mxu0 %v3358_v57  ;;  %v4112_v56 = vld [vmem:[%s5612_s1 + $0x690] ss:$8 sps:$4 sm:$0xff]   ;;  %v4120_v57 = vld [vmem:[%s5612_s1 + $0x6a4] ss:$8 sps:$4 sm:$0xff]  }
  0xc4   :  { %1887 = vmatprep.subr.bf16.mxu0 %v3969_v58  ;;  %2885 = vmatprep.subr.bf16.mxu1 %v3636_v37  ;;  %v4118_v58 = vld [vmem:[%s5612_s1 + $0x6a0] ss:$8 sps:$4 sm:$0xff]   ;;  %v3668_v37 = vcombine.high %v2079_v52, %v2087_v36 }
  0xc5   :  { %2886 = vmatpush1.bf16.msra.mxu1 %v3635_v55  ;;  %v2103_v55 = vld [vmem:[%s5614_s4 + $0x240] sm:$0xff]  ;;  %v2072_v49 = vld [vmem:[%s5614_s4 + $0x148] sm:$0xff] }
  0xc6   :  { %2887 = vmatprep.subr.bf16.mxu1 %v3652_v50 }
  0xc7   :  { %1888 = vmatpush1.bf16.msra.mxu0 %v3967_v41  ;;  %v4124_v41 = vld [vmem:[%s5612_s1 + $0x6b0] ss:$8 sps:$4 sm:$0xff]  }
  0xc8   :  { %1889 = vmatprep.subr.bf16.mxu0 %v3975_v44  ;;  %v4132_v44 = vld [vmem:[%s5612_s1 + $0x6c4] ss:$8 sps:$4 sm:$0xff]  }
  0xc9   :  { %2888 = vmatpush1.bf16.msra.mxu1 %v3651_v51  ;;  %v3654_v51 = vcombine.high %v2064_v48, %v2072_v49 }
  0xca   :  { %2889 = vmatprep.subr.bf16.mxu1 %v3668_v37  ;;  %v3653_v37 = vcombine.low %v2064_v48, %v2072_v49  ;;  %v2050_v49 = vld [vmem:[%s5614_s4 + $0x98] sm:$0xff] }
  0xcb   :  { %1890 = vmatpush1.bf16.msra.mxu0 %v3973_v60  ;;  %v4130_v60 = vld [vmem:[%s5612_s1 + $0x6c0] ss:$8 sps:$4 sm:$0xff]  }
  0xcc   :  { %1891 = vmatprep.subr.bf16.mxu0 %v3981_v61  ;;  %v4138_v61 = vld [vmem:[%s5612_s1 + $0x6d4] ss:$8 sps:$4 sm:$0xff]  }
  0xcf   :  { %1892 = vmatpush1.bf16.msra.mxu0 %v3979_v62  ;;  %v4136_v62 = vld [vmem:[%s5612_s1 + $0x6d0] ss:$8 sps:$4 sm:$0xff]  }
  0xd0   :  { %1893 = vmatprep.subr.bf16.mxu0 %v3987_v63  ;;  %v4144_v63 = vld [vmem:[%s5612_s1 + $0x6e4] ss:$8 sps:$4 sm:$0xff]  }
  0xd3   :  { %1894 = vmatpush1.bf16.msra.mxu0 %v3985_v0  ;;  %v4142_v0 = vld [vmem:[%s5612_s1 + $0x6e0] ss:$8 sps:$4 sm:$0xff]  }
  0xd4   :  { %1895 = vmatprep.subr.bf16.mxu0 %v3993_v1  ;;  %v4147_v1 = vld [vmem:[%s5612_s1 + $0x6f4] ss:$8 sps:$4 sm:$0xff]  }
  0xd7   :  { %1896 = vmatpush1.bf16.msra.mxu0 %v3991_v2  ;;  %v4145_v2 = vld [vmem:[%s5612_s1 + $0x6f0] ss:$8 sps:$4 sm:$0xff]  }
  0xd8   :  { %1897 = vmatprep.subr.bf16.mxu0 %v3999_v3  ;;  %v4150_v3 = vld [vmem:[%s5612_s1 + $0x704] ss:$8 sps:$4 sm:$0xff]  }
  0xdb   :  { %1898 = vmatpush1.bf16.msra.mxu0 %v3997_v4  ;;  %v5003_v4 = vld [vmem:[%s5613_s0 + $0x38] sm:$0xff] }
  0xdc   :  { %1899 = vmatprep.subr.bf16.mxu0 %v4005_v5  ;;  %v5008_v5 = vld [vmem:[%s5613_s0 + $0x78] sm:$0xff] }
  0xdf   :  { %1900 = vmatpush1.bf16.msra.mxu0 %v4003_v6  ;;  %v3359_v6 = vcombine.low %v4881_v24, %v4886_v25  ;;  %v4172_v24 = vld [vmem:[%s5612_s1 + $0x780] ss:$8 sps:$4 sm:$0xff]   ;;  %v4177_v25 = vld [vmem:[%s5612_s1 + $0x794] ss:$8 sps:$4 sm:$0xff]  }
  0xe0   :  { %1901 = vmatprep.subr.bf16.mxu0 %v4011_v7  ;;  %v4148_v7 = vld [vmem:[%s5612_s1 + $0x700] ss:$8 sps:$4 sm:$0xff]  }
  0xe3   :  { %1902 = vmatpush1.bf16.msra.mxu0 %v4009_v8  ;;  %v3362_v8 = vcombine.high %v5003_v4, %v5008_v5 }
  0xe4   :  { %1903 = vmatprep.subr.bf16.mxu0 %v4017_v9  ;;  %v4153_v9 = vld [vmem:[%s5612_s1 + $0x714] ss:$8 sps:$4 sm:$0xff]  }
  0xe7   :  { %1904 = vmatpush1.bf16.msra.mxu0 %v4015_v10  ;;  %v4151_v10 = vld [vmem:[%s5612_s1 + $0x710] ss:$8 sps:$4 sm:$0xff]  }
  0xe8   :  { %1905 = vmatprep.subr.bf16.mxu0 %v4023_v11  ;;  %v4156_v11 = vld [vmem:[%s5612_s1 + $0x724] ss:$8 sps:$4 sm:$0xff]  }
  0xeb   :  { %1906 = vmatpush1.bf16.msra.mxu0 %v4021_v12  ;;  %v4154_v12 = vld [vmem:[%s5612_s1 + $0x720] ss:$8 sps:$4 sm:$0xff]  }
  0xec   :  { %1907 = vmatprep.subr.bf16.mxu0 %v4029_v13  ;;  %v4159_v13 = vld [vmem:[%s5612_s1 + $0x734] ss:$8 sps:$4 sm:$0xff]  }
  0xef   :  { %1908 = vmatpush1.bf16.msra.mxu0 %v4027_v14  ;;  %v4157_v14 = vld [vmem:[%s5612_s1 + $0x730] ss:$8 sps:$4 sm:$0xff]  }
  0xf0   :  { %1909 = vmatprep.subr.bf16.mxu0 %v4035_v15  ;;  %v4162_v15 = vld [vmem:[%s5612_s1 + $0x744] ss:$8 sps:$4 sm:$0xff]  }
  0xf3   :  { %1910 = vmatpush1.bf16.msra.mxu0 %v4033_v16  ;;  %v4160_v16 = vld [vmem:[%s5612_s1 + $0x740] ss:$8 sps:$4 sm:$0xff]  }
  0xf4   :  { %1911 = vmatprep.subr.bf16.mxu0 %v4041_v17  ;;  %v4165_v17 = vld [vmem:[%s5612_s1 + $0x754] ss:$8 sps:$4 sm:$0xff]  }
  0xf7   :  { %1912 = vmatpush1.bf16.msra.mxu0 %v4039_v18  ;;  %v4163_v18 = vld [vmem:[%s5612_s1 + $0x750] ss:$8 sps:$4 sm:$0xff]  }
  0xf8   :  { %1913 = vmatprep.subr.bf16.mxu0 %v4047_v19  ;;  %v4168_v19 = vld [vmem:[%s5612_s1 + $0x764] ss:$8 sps:$4 sm:$0xff]  }
  0xfb   :  { %1914 = vmatpush1.bf16.msra.mxu0 %v4045_v20  ;;  %v4166_v20 = vld [vmem:[%s5612_s1 + $0x760] ss:$8 sps:$4 sm:$0xff]  }
  0xfc   :  { %1915 = vmatprep.subr.bf16.mxu0 %v4054_v21  ;;  %v4171_v21 = vld [vmem:[%s5612_s1 + $0x774] ss:$8 sps:$4 sm:$0xff]  }
  0xff   :  { %1916 = vmatpush1.bf16.msra.mxu0 %v4052_v22  ;;  %v4169_v22 = vld [vmem:[%s5612_s1 + $0x770] ss:$8 sps:$4 sm:$0xff]  }
 0x100   :  { %1928 = vmatprep.subr.bf16.mxu0 %v4060_v23  ;;  %v4174_v23 = vld [vmem:[%s5612_s1 + $0x784] ss:$8 sps:$4 sm:$0xff]  }
 0x102   :  { %1918 = vmatmul.mubr.bf16.vlgmr.msra.gmra.mrb[0].mxu0 %v3357_v26  ;;  %v4175_v26 = vld [vmem:[%s5612_s1 + $0x790] ss:$8 sps:$4 sm:$0xff]  }
 0x103   :  { %1929 = vmatpush1.bf16.msra.mxu0 %v4058_v27  ;;  %1960 = vmatprep.mubr.bf16.mxu0 %v3360_v28  ;;  %v4180_v27 = vld [vmem:[%s5612_s1 + $0x7a4] ss:$8 sps:$4 sm:$0xff]   ;;  %v4178_v28 = vld [vmem:[%s5612_s1 + $0x7a0] ss:$8 sps:$4 sm:$0xff]  }
 0x104   :  { %1930 = vmatprep.subr.bf16.mxu0 %v4066_v29  ;;  %v4183_v29 = vld [vmem:[%s5612_s1 + $0x7b4] ss:$8 sps:$4 sm:$0xff]  }
 0x107   :  { %1931 = vmatpush1.bf16.msra.mxu0 %v4064_v30  ;;  %v4181_v30 = vld [vmem:[%s5612_s1 + $0x7b0] ss:$8 sps:$4 sm:$0xff]  }
 0x108   :  { %1932 = vmatprep.subr.bf16.mxu0 %v4072_v31  ;;  %v4186_v31 = vld [vmem:[%s5612_s1 + $0x7c4] ss:$8 sps:$4 sm:$0xff]  }
 0x10b   :  { %1933 = vmatpush1.bf16.msra.mxu0 %v4070_v32  ;;  %v4184_v32 = vld [vmem:[%s5612_s1 + $0x7c0] ss:$8 sps:$4 sm:$0xff]  }
 0x10c   :  { %1934 = vmatprep.subr.bf16.mxu0 %v4078_v33  ;;  %v4189_v33 = vld [vmem:[%s5612_s1 + $0x7d4] ss:$8 sps:$4 sm:$0xff]  }
 0x10f   :  { %1935 = vmatpush1.bf16.msra.mxu0 %v4076_v34  ;;  %v4187_v34 = vld [vmem:[%s5612_s1 + $0x7d0] ss:$8 sps:$4 sm:$0xff]  }
 0x110   :  { %1936 = vmatprep.subr.bf16.mxu0 %v4084_v35  ;;  %v4192_v35 = vld [vmem:[%s5612_s1 + $0x7e4] ss:$8 sps:$4 sm:$0xff]  }
 0x113   :  { %1937 = vmatpush1.bf16.msra.mxu0 %v4082_v38  ;;  %v4190_v38 = vld [vmem:[%s5612_s1 + $0x7e0] ss:$8 sps:$4 sm:$0xff]  }
 0x114   :  { %1938 = vmatprep.subr.bf16.mxu0 %v4090_v39  ;;  %v4195_v39 = vld [vmem:[%s5612_s1 + $0x7f4] ss:$8 sps:$4 sm:$0xff]  }
 0x117   :  { %1939 = vmatpush1.bf16.msra.mxu0 %v4088_v40  ;;  %v4193_v40 = vld [vmem:[%s5612_s1 + $0x7f0] ss:$8 sps:$4 sm:$0xff]  }
 0x118   :  { %1940 = vmatprep.subr.bf16.mxu0 %v4096_v42  ;;  %v3361_v42 = vcombine.low %v5003_v4, %v5008_v5  ;;  %v2032_v4 = vld [vmem:[%s5614_s4 + $0x8] sm:$0xff] }
 0x119   :  { %v2040_v5 = vld [vmem:[%s5614_s4 + $0x48] sm:$0xff] }
 0x11b   :  { %1941 = vmatpush1.bf16.msra.mxu0 %v4094_v43 }
 0x11c   :  { %1942 = vmatprep.subr.bf16.mxu0 %v4102_v45 }
 0x11f   :  { %1943 = vmatpush1.bf16.msra.mxu0 %v4100_v46 }
 0x120   :  { %1944 = vmatprep.subr.bf16.mxu0 %v4108_v47 }
 0x123   :  { %1945 = vmatpush1.bf16.msra.mxu0 %v4106_v53  ;;  %v3667_v53 = vcombine.low %v2079_v52, %v2087_v36  ;;  %v2080_v52 = vld [vmem:[%s5614_s4 + $0x188] sm:$0xff] }
 0x124   :  { %1946 = vmatprep.subr.bf16.mxu0 %v4114_v54  ;;  %v2095_v54 = vld [vmem:[%s5614_s4 + $0x200] sm:$0xff]  ;;  %v2088_v36 = vld [vmem:[%s5614_s4 + $0x1c8] sm:$0xff] }
 0x125   :  { %2890 = vmatpush1.bf16.msra.mxu1 %v3667_v53  ;;  %v3670_v53 = vcombine.high %v2080_v52, %v2088_v36 }
 0x127   :  { %1947 = vmatpush1.bf16.msra.mxu0 %v4112_v56  ;;  %v3684_v56 = vcombine.high %v2095_v54, %v2103_v55 }
 0x128   :  { %1948 = vmatprep.subr.bf16.mxu0 %v4120_v57  ;;  %v3683_v57 = vcombine.low %v2095_v54, %v2103_v55  ;;  %v2096_v54 = vld [vmem:[%s5614_s4 + $0x208] sm:$0xff] }
 0x129   :  { %2891 = vmatprep.subr.bf16.mxu1 %v3684_v56  ;;  %v2104_v55 = vld [vmem:[%s5614_s4 + $0x248] sm:$0xff]  ;;  %v3669_v56 = vcombine.low %v2080_v52, %v2088_v36  ;;  %v2066_v36 = vld [vmem:[%s5614_s4 + $0x118] sm:$0xff] }
 0x12a   :  { %2892 = vmatpush1.bf16.msra.mxu1 %v3683_v57  ;;  %v3686_v57 = vcombine.high %v2096_v54, %v2104_v55 }
 0x12b   :  { %1949 = vmatpush1.bf16.msra.mxu0 %v4118_v58  ;;  %v2111_v58 = vld [vmem:[%s5614_s4 + $0x280] sm:$0xff] }
 0x12c   :  { %1950 = vmatprep.subr.bf16.mxu0 %v4126_v59  ;;  %v2119_v59 = vld [vmem:[%s5614_s4 + $0x2c0] sm:$0xff] }
 0x12f   :  { %1951 = vmatpush1.bf16.msra.mxu0 %v4124_v41  ;;  %v3700_v41 = vcombine.high %v2111_v58, %v2119_v59 }
 0x130   :  { %1952 = vmatprep.subr.bf16.mxu0 %v4132_v44  ;;  %v3699_v44 = vcombine.low %v2111_v58, %v2119_v59  ;;  %v2112_v58 = vld [vmem:[%s5614_s4 + $0x288] sm:$0xff] }
 0x131   :  { %2893 = vmatprep.subr.bf16.mxu1 %v3700_v41  ;;  %v2120_v59 = vld [vmem:[%s5614_s4 + $0x2c8] sm:$0xff]  ;;  %v3685_v41 = vcombine.low %v2096_v54, %v2104_v55  ;;  %v2082_v55 = vld [vmem:[%s5614_s4 + $0x198] sm:$0xff] }
 0x132   :  { %2894 = vmatpush1.bf16.msra.mxu1 %v3699_v44  ;;  %v3702_v44 = vcombine.high %v2112_v58, %v2120_v59 }
 0x133   :  { %1953 = vmatpush1.bf16.msra.mxu0 %v4130_v60  ;;  %v2127_v60 = vld [vmem:[%s5614_s4 + $0x300] sm:$0xff] }
 0x134   :  { %1954 = vmatprep.subr.bf16.mxu0 %v4138_v61  ;;  %v2135_v61 = vld [vmem:[%s5614_s4 + $0x340] sm:$0xff] }
 0x137   :  { %1955 = vmatpush1.bf16.msra.mxu0 %v4136_v62  ;;  %v3716_v62 = vcombine.high %v2127_v60, %v2135_v61 }
 0x138   :  { %1956 = vmatprep.subr.bf16.mxu0 %v4144_v63  ;;  %v3715_v63 = vcombine.low %v2127_v60, %v2135_v61  ;;  %v2128_v60 = vld [vmem:[%s5614_s4 + $0x308] sm:$0xff] }
 0x139   :  { %2895 = vmatprep.subr.bf16.mxu1 %v3716_v62  ;;  %v2136_v61 = vld [vmem:[%s5614_s4 + $0x348] sm:$0xff]  ;;  %v3701_v62 = vcombine.low %v2112_v58, %v2120_v59  ;;  %v2098_v59 = vld [vmem:[%s5614_s4 + $0x218] sm:$0xff] }
 0x13a   :  { %2896 = vmatpush1.bf16.msra.mxu1 %v3715_v63  ;;  %v3718_v63 = vcombine.high %v2128_v60, %v2136_v61 }
 0x13b   :  { %1957 = vmatpush1.bf16.msra.mxu0 %v4142_v0  ;;  %v2143_v0 = vld [vmem:[%s5614_s4 + $0x380] sm:$0xff] }
 0x13c   :  { %1958 = vmatprep.subr.bf16.mxu0 %v4147_v1  ;;  %v2151_v1 = vld [vmem:[%s5614_s4 + $0x3c0] sm:$0xff] }
 0x13f   :  { %1959 = vmatpush1.bf16.msra.mxu0 %v4145_v2  ;;  %v3732_v2 = vcombine.high %v2143_v0, %v2151_v1 }
 0x140   :  { %1971 = vmatprep.subr.bf16.mxu0 %v4150_v3  ;;  %v3731_v3 = vcombine.low %v2143_v0, %v2151_v1  ;;  %v2144_v0 = vld [vmem:[%s5614_s4 + $0x388] sm:$0xff] }
 0x141   :  { %2897 = vmatprep.subr.bf16.mxu1 %v3732_v2  ;;  %v2152_v1 = vld [vmem:[%s5614_s4 + $0x3c8] sm:$0xff]  ;;  %v3717_v2 = vcombine.low %v2128_v60, %v2136_v61  ;;  %v2114_v61 = vld [vmem:[%s5614_s4 + $0x298] sm:$0xff] }
 0x142   :  { %1961 = vmatmul.mubr.bf16.vlgmr.msra.gmra.mrb[0].mxu0 %v3359_v6  ;;  %2898 = vmatpush1.bf16.msra.mxu1 %v3731_v3  ;;  %v3622_v6 = vcombine.high %v2032_v4, %v2040_v5  ;;  %v3734_v3 = vcombine.high %v2144_v0, %v2152_v1 }
 0x143   :  { %1972 = vmatpush1.bf16.msra.mxu0 %v4148_v7  ;;  %2003 = vmatprep.mubr.bf16.mxu0 %v3362_v8  ;;  %v3621_v7 = vcombine.low %v2032_v4, %v2040_v5  ;;  %v4200_v8 = vmov 0   ;;  %v2033_v4 = vld [vmem:[%s5614_s4 + $0x10] sm:$0xff] }
 0x144   :  { %1973 = vmatprep.subr.bf16.mxu0 %v4153_v9  ;;  %2915 = vmatprep.mubr.bf16.mxu1 %v4200_v8  ;;  %v300_v9 = vlaneseq  ;;  %v2041_v5 = vld [vmem:[%s5614_s4 + $0x50] sm:$0xff] }
 0x145   :  { %2926 = vmatprep.subr.bf16.mxu1 %v3622_v6  ;;  %v3733_v6 = vcombine.low %v2144_v0, %v2152_v1  ;;  %v2130_v1 = vld [vmem:[%s5614_s4 + $0x318] sm:$0xff] }
 0x147   :  { %1974 = vmatpush1.bf16.msra.mxu0 %v4151_v10  ;;  %v5152_v10 = vshrl.u32 %v300_v9, 7  ;;  %v2049_v9 = vld [vmem:[%s5614_s4 + $0x90] sm:$0xff] }
 0x148   :  { %1975 = vmatprep.subr.bf16.mxu0 %v4156_v11 }
 0x149   :  { %v5155_v11 = vsub.s32 0, %v5152_v10 }
 0x14b   :  { %1976 = vmatpush1.bf16.msra.mxu0 %v4154_v12  ;;  %v298_v12 = vld [vmem:[%s5615_s2] sm:$0x3] }
 0x14c   :  { %1977 = vmatprep.subr.bf16.mxu0 %v4159_v13  ;;  %v5161_v13 = vsub.s32 1, %v5152_v10 }
 0x14f   :  { %1978 = vmatpush1.bf16.msra.mxu0 %v4157_v14  ;;  %v303_v14 = vrot.slane %v298_v12, %v5155_v11 }
 0x150   :  { %1979 = vmatprep.subr.bf16.mxu0 %v4162_v15  ;;  %v307_v15 = vrot.slane %v298_v12, %v5161_v13  ;;  %v2057_v12 = vld [vmem:[%s5614_s4 + $0xd0] sm:$0xff] }
 0x153   :  { %1980 = vmatpush1.bf16.msra.mxu0 %v4160_v16 }
 0x154   :  { %1981 = vmatprep.subr.bf16.mxu0 %v4165_v17 }
 0x157   :  { %1982 = vmatpush1.bf16.msra.mxu0 %v4163_v18 }
 0x158   :  { %1983 = vmatprep.subr.bf16.mxu0 %v4168_v19 }
 0x15b   :  { %1984 = vmatpush1.bf16.msra.mxu0 %v4166_v20 }
 0x15c   :  { %1985 = vmatprep.subr.bf16.mxu0 %v4171_v21 }
 0x15f   :  { %1986 = vmatpush1.bf16.msra.mxu0 %v4169_v22 }
 0x160   :  { %1987 = vmatprep.subr.bf16.mxu0 %v4174_v23 }
 0x162   :  { %v1747_v43 = vpop.f32.mrb[0].mxu1 }
 0x163   :  { %1988 = vmatpush1.bf16.msra.mxu0 %v4172_v24  ;;  %v1749_v45 = vpop.f32.mrb[1].mxu1  ;;  %v3779_v16 = vadd.f32 %v1747_v43, %v303_v14  ;;  %v2056_v43 = vld [vmem:[%s5614_s4 + $0xc8] sm:$0xff] }
 0x164   :  { %1989 = vmatprep.subr.bf16.mxu0 %v4177_v25  ;;  %v1751_v46 = vpop.f32.mrb[2].mxu1  ;;  %v3781_v17 = vadd.f32 %v1749_v45, %v307_v15 }
 0x165   :  { %v1753_v47 = vpop.f32.mrb[3].mxu1  ;;  %v3783_v19 = vadd.f32 %v1751_v46, %v303_v14  ;;  %v3623_v14 = vcombine.low %v2033_v4, %v2041_v5 }
 0x166   :  { %v3785_v22 = vadd.f32 %v1753_v47, %v307_v15  ;;  %v3640_v15 = vcombine.high %v2049_v9, %v2057_v12 }
 0x167   :  { %1990 = vmatpush1.bf16.msra.mxu0 %v4175_v26 }
 0x168   :  { %1991 = vmatprep.subr.bf16.mxu0 %v4180_v27 }
 0x16b   :  { %1992 = vmatpush1.bf16.msra.mxu0 %v4178_v28 }
 0x16c   :  { %1993 = vmatprep.subr.bf16.mxu0 %v4183_v29 }
 0x16f   :  { %1994 = vmatpush1.bf16.msra.mxu0 %v4181_v30 }
 0x170   :  { %1995 = vmatprep.subr.bf16.mxu0 %v4186_v31 }
 0x173   :  { %1996 = vmatpush1.bf16.msra.mxu0 %v4184_v32  ;;  %v2018_v32 = vld [vmem:[%s5617_s3] sm:$0xff] }
 0x174   :  { %1997 = vmatprep.subr.bf16.mxu0 %v4189_v33 }
 0x177   :  { %1998 = vmatpush1.bf16.msra.mxu0 %v4187_v34  ;;  %v2019_v34 = vld [vmem:[%s5617_s3 + $0x8] sm:$0xff] }
 0x178   :  { %1999 = vmatprep.subr.bf16.mxu0 %v4192_v35 }
 0x17b   :  { %2000 = vmatpush1.bf16.msra.mxu0 %v4190_v38 }
 0x17c   :  { %2001 = vmatprep.subr.bf16.mxu0 %v4195_v39 }
 0x17f   :  { %2002 = vmatpush1.bf16.msra.mxu0 %v4193_v40 }
 0x182   :  { %2004 = vmatmul.mubr.bf16.vlgmr.msra.gmra.mrb[0].mxu0 %v3361_v42  ;;  %v2048_v42 = vld [vmem:[%s5614_s4 + $0x88] sm:$0xff] }
 0x183   :  { %v3638_v47 = vcombine.high %v2048_v42, %v2056_v43  ;;  %v3637_v50 = vcombine.low %v2048_v42, %v2056_v43  ;;  %v2034_v43 = vld [vmem:[%s5614_s4 + $0x18] sm:$0xff] }
 0x255   :  { %v2005_v18 = vpop.f32.mrb[0].mxu0 }
 0x256   :  { %v3780_v20 = vadd.f32 %v3779_v16, %v2005_v18  ;;  %v2007_v21 = vpop.f32.mrb[1].mxu0  ;;  %v2065_v16 = vld [vmem:[%s5614_s4 + $0x110] sm:$0xff]  ;;  %v3639_v18 = vcombine.low %v2049_v9, %v2057_v12  ;;  %v2035_v12 = vld [vmem:[%s5614_s4 + $0x20] sm:$0xff] }
 0x257   :  { %v3782_v23 = vadd.f32 %v3781_v17, %v2007_v21  ;;  %v2009_v24 = vpop.f32.mrb[2].mxu0  ;;  %v2073_v17 = vld [vmem:[%s5614_s4 + $0x150] sm:$0xff] }
 0x258   :  { %2014 = vst [vmem:[%s5616_s6] sm:$0xff] %v3780_v20  ;;  %v3784_v25 = vadd.f32 %v3783_v19, %v2009_v24  ;;  %v2011_v26 = vpop.f32.mrb[3].mxu0  ;;  %v3656_v19 = vcombine.high %v2065_v16, %v2073_v17  ;;  %v2089_v21 = vld [vmem:[%s5614_s4 + $0x1d0] sm:$0xff] }
 0x259   :  { %2015 = vst [vmem:[%s5616_s6 + $0x8] sm:$0xff] %v3782_v23  ;;  %v2020_v27 = vmul.f32 0.5, %v3782_v23  ;;  %v3786_v28 = vadd.f32 %v3785_v22, %v2011_v26  ;;  %v3655_v22 = vcombine.low %v2065_v16, %v2073_v17  ;;  %v2097_v24 = vld [vmem:[%s5614_s4 + $0x210] sm:$0xff]  ;;  %v2051_v17 = vld [vmem:[%s5614_s4 + $0xa0] sm:$0xff] }
 0x25a   :  { %2016 = vst [vmem:[%s5616_s6 + $0x10] sm:$0xff] %v3784_v25 }
 0x25b   :  { %v2022_v29 = vmul.f32 1.442695, %v2020_v27  ;;  %2017 = vst [vmem:[%s5616_s6 + $0x18] sm:$0xff] %v3786_v28  ;;  %v2021_v30 = vmul.f32 0.5, %v3786_v28  ;;  %v2113_v28 = vld [vmem:[%s5614_s4 + $0x290] sm:$0xff] }
 0x25d   :  { %4196 = vpow2.f32 %v2022_v29  ;;  %v2024_v31 = vmul.f32 1.442695, %v2021_v30  ;;  %v2121_v29 = vld [vmem:[%s5614_s4 + $0x2d0] sm:$0xff] }
 0x25f   :  { %4198 = vpow2.f32 %v2024_v31  ;;  %v3704_v31 = vcombine.high %v2113_v28, %v2121_v29 }
 0x267   :  { %v4197_v33 = vpop.eup %4196 }
 0x268   :  { %v2026_v35 = vmul.f32 %v4197_v33, %v2018_v32  ;;  %v2129_v32 = vld [vmem:[%s5614_s4 + $0x310] sm:$0xff] }
 0x269   :  { %v4199_v38 = vpop.eup %4198  ;;  %v2137_v33 = vld [vmem:[%s5614_s4 + $0x350] sm:$0xff] }
 0x26a   :  { %v2028_v39 = vadd.f32 %v3780_v20, %v2026_v35  ;;  %v2027_v40 = vmul.f32 %v4199_v38, %v2019_v34  ;;  %v2081_v20 = vld [vmem:[%s5614_s4 + $0x190] sm:$0xff]  ;;  %v3703_v34 = vcombine.low %v2113_v28, %v2121_v29  ;;  %v3720_v35 = vcombine.high %v2129_v32, %v2137_v33  ;;  %v2099_v29 = vld [vmem:[%s5614_s4 + $0x220] sm:$0xff] }
 0x26b   :  { %v3672_v23 = vcombine.high %v2081_v20, %v2089_v21  ;;  %v3671_v26 = vcombine.low %v2081_v20, %v2089_v21  ;;  %v2145_v38 = vld [vmem:[%s5614_s4 + $0x390] sm:$0xff]  ;;  %v2067_v21 = vld [vmem:[%s5614_s4 + $0x120] sm:$0xff] }
 0x26c   :  { %v2029_v45 = vadd.f32 %v3784_v25, %v2027_v40  ;;  %v2105_v25 = vld [vmem:[%s5614_s4 + $0x250] sm:$0xff]  ;;  %v3719_v40 = vcombine.low %v2129_v32, %v2137_v33  ;;  %v2115_v33 = vld [vmem:[%s5614_s4 + $0x2a0] sm:$0xff] }
 0x26d   :  { %v3688_v27 = vcombine.high %v2097_v24, %v2105_v25  ;;  %v3687_v30 = vcombine.low %v2097_v24, %v2105_v25  ;;  %v2083_v25 = vld [vmem:[%s5614_s4 + $0x1a0] sm:$0xff] }
 0x26e   :  { %v5189_v46 = vpack.c.bf16 %v2029_v45, %v2028_v39  ;;  %v2153_v39 = vld [vmem:[%s5614_s4 + $0x3d0] sm:$0xff]  ;;  %v2042_v45 = vld [vmem:[%s5614_s4 + $0x58] sm:$0xff] }
 0x26f   :  { %v3736_v42 = vcombine.high %v2145_v38, %v2153_v39  ;;  %v3626_v48 = vcombine.high %v2034_v43, %v2042_v45 }
 0x270   :  { %2916 = vmatmul.mubr.bf16.vlgmr.msra.gmra.mrb[4].mxu1 %v5189_v46 }
 0x271   :  { %2927 = vmatpush1.bf16.msra.mxu1 %v3621_v7  ;;  %2958 = vmatprep.mubr.bf16.mxu1 %v4200_v8  ;;  %v3624_v7 = vcombine.high %v2033_v4, %v2041_v5  ;;  %v2146_v5 = vld [vmem:[%s5614_s4 + $0x398] sm:$0xff] }
 0x272   :  { %2928 = vmatprep.subr.bf16.mxu1 %v3638_v47  ;;  %v3735_v47 = vcombine.low %v2145_v38, %v2153_v39  ;;  %v2131_v39 = vld [vmem:[%s5614_s4 + $0x320] sm:$0xff] }
 0x275   :  { %2929 = vmatpush1.bf16.msra.mxu1 %v3637_v50  ;;  %v2058_v50 = vld [vmem:[%s5614_s4 + $0xd8] sm:$0xff] }
 0x276   :  { %2930 = vmatprep.subr.bf16.mxu1 %v3654_v51  ;;  %v3625_v51 = vcombine.low %v2034_v43, %v2042_v45  ;;  %v3642_v52 = vcombine.high %v2050_v49, %v2058_v50  ;;  %v2147_v45 = vld [vmem:[%s5614_s4 + $0x3a0] sm:$0xff] }
 0x279   :  { %2931 = vmatpush1.bf16.msra.mxu1 %v3653_v37  ;;  %v2074_v37 = vld [vmem:[%s5614_s4 + $0x158] sm:$0xff] }
 0x27a   :  { %2932 = vmatprep.subr.bf16.mxu1 %v3670_v53  ;;  %v3641_v53 = vcombine.low %v2050_v49, %v2058_v50  ;;  %v3658_v54 = vcombine.high %v2066_v36, %v2074_v37  ;;  %v2036_v50 = vld [vmem:[%s5614_s4 + $0x28] sm:$0xff] }
 0x27d   :  { %2933 = vmatpush1.bf16.msra.mxu1 %v3669_v56  ;;  %v2090_v56 = vld [vmem:[%s5614_s4 + $0x1d8] sm:$0xff] }
 0x27e   :  { %2934 = vmatprep.subr.bf16.mxu1 %v3686_v57  ;;  %v3657_v57 = vcombine.low %v2066_v36, %v2074_v37  ;;  %v3674_v58 = vcombine.high %v2082_v55, %v2090_v56  ;;  %v2052_v37 = vld [vmem:[%s5614_s4 + $0xa8] sm:$0xff] }
 0x281   :  { %2935 = vmatpush1.bf16.msra.mxu1 %v3685_v41  ;;  %v2106_v41 = vld [vmem:[%s5614_s4 + $0x258] sm:$0xff] }
 0x282   :  { %2936 = vmatprep.subr.bf16.mxu1 %v3702_v44  ;;  %v3673_v44 = vcombine.low %v2082_v55, %v2090_v56  ;;  %v3690_v60 = vcombine.high %v2098_v59, %v2106_v41  ;;  %v2068_v56 = vld [vmem:[%s5614_s4 + $0x128] sm:$0xff] }
 0x285   :  { %2937 = vmatpush1.bf16.msra.mxu1 %v3701_v62  ;;  %v2122_v62 = vld [vmem:[%s5614_s4 + $0x2d8] sm:$0xff] }
 0x286   :  { %2938 = vmatprep.subr.bf16.mxu1 %v3718_v63  ;;  %v3689_v63 = vcombine.low %v2098_v59, %v2106_v41  ;;  %v3706_v0 = vcombine.high %v2114_v61, %v2122_v62  ;;  %v2084_v41 = vld [vmem:[%s5614_s4 + $0x1a8] sm:$0xff] }
 0x289   :  { %2939 = vmatpush1.bf16.msra.mxu1 %v3717_v2  ;;  %v2138_v2 = vld [vmem:[%s5614_s4 + $0x358] sm:$0xff] }
 0x28a   :  { %2940 = vmatprep.subr.bf16.mxu1 %v3734_v3  ;;  %v3705_v3 = vcombine.low %v2114_v61, %v2122_v62  ;;  %v3722_v4 = vcombine.high %v2130_v1, %v2138_v2  ;;  %v2100_v62 = vld [vmem:[%s5614_s4 + $0x228] sm:$0xff] }
 0x28d   :  { %2941 = vmatpush1.bf16.msra.mxu1 %v3733_v6  ;;  %v2154_v6 = vld [vmem:[%s5614_s4 + $0x3d8] sm:$0xff] }
 0x28e   :  { %2969 = vmatprep.subr.bf16.mxu1 %v3624_v7  ;;  %v3721_v7 = vcombine.low %v2130_v1, %v2138_v2  ;;  %v3738_v9 = vcombine.high %v2146_v5, %v2154_v6  ;;  %v2116_v2 = vld [vmem:[%s5614_s4 + $0x2a8] sm:$0xff] }
 0x290   :  { %2959 = vmatmul.mubr.bf16.vlgmr.msra.gmra.mrb[8].mxu1 %v5189_v46 }
 0x291   :  { %2970 = vmatpush1.bf16.msra.mxu1 %v3623_v14  ;;  %3001 = vmatprep.mubr.bf16.mxu1 %v4200_v8  ;;  %v2043_v14 = vld [vmem:[%s5614_s4 + $0x60] sm:$0xff] }
 0x292   :  { %2971 = vmatprep.subr.bf16.mxu1 %v3640_v15  ;;  %v3737_v15 = vcombine.low %v2146_v5, %v2154_v6  ;;  %v3628_v16 = vcombine.high %v2035_v12, %v2043_v14  ;;  %v2132_v6 = vld [vmem:[%s5614_s4 + $0x328] sm:$0xff] }
 0x295   :  { %2972 = vmatpush1.bf16.msra.mxu1 %v3639_v18  ;;  %v2059_v18 = vld [vmem:[%s5614_s4 + $0xe0] sm:$0xff] }
 0x296   :  { %2973 = vmatprep.subr.bf16.mxu1 %v3656_v19  ;;  %v3627_v19 = vcombine.low %v2035_v12, %v2043_v14  ;;  %v3644_v20 = vcombine.high %v2051_v17, %v2059_v18  ;;  %v2148_v14 = vld [vmem:[%s5614_s4 + $0x3a8] sm:$0xff] }
 0x299   :  { %2974 = vmatpush1.bf16.msra.mxu1 %v3655_v22  ;;  %v2075_v22 = vld [vmem:[%s5614_s4 + $0x160] sm:$0xff] }
 0x29a   :  { %2975 = vmatprep.subr.bf16.mxu1 %v3672_v23  ;;  %v3643_v23 = vcombine.low %v2051_v17, %v2059_v18  ;;  %v3660_v24 = vcombine.high %v2067_v21, %v2075_v22  ;;  %v2037_v18 = vld [vmem:[%s5614_s4 + $0x30] sm:$0xff] }
 0x29d   :  { %2976 = vmatpush1.bf16.msra.mxu1 %v3671_v26  ;;  %v2091_v26 = vld [vmem:[%s5614_s4 + $0x1e0] sm:$0xff] }
 0x29e   :  { %2977 = vmatprep.subr.bf16.mxu1 %v3688_v27  ;;  %v3659_v27 = vcombine.low %v2067_v21, %v2075_v22  ;;  %v3676_v28 = vcombine.high %v2083_v25, %v2091_v26  ;;  %v2053_v22 = vld [vmem:[%s5614_s4 + $0xb0] sm:$0xff] }
 0x2a1   :  { %2978 = vmatpush1.bf16.msra.mxu1 %v3687_v30  ;;  %v2107_v30 = vld [vmem:[%s5614_s4 + $0x260] sm:$0xff] }
 0x2a2   :  { %2979 = vmatprep.subr.bf16.mxu1 %v3704_v31  ;;  %v3675_v31 = vcombine.low %v2083_v25, %v2091_v26  ;;  %v3692_v32 = vcombine.high %v2099_v29, %v2107_v30  ;;  %v2069_v26 = vld [vmem:[%s5614_s4 + $0x130] sm:$0xff] }
 0x2a5   :  { %2980 = vmatpush1.bf16.msra.mxu1 %v3703_v34  ;;  %v2123_v34 = vld [vmem:[%s5614_s4 + $0x2e0] sm:$0xff] }
 0x2a6   :  { %2981 = vmatprep.subr.bf16.mxu1 %v3720_v35  ;;  %v3691_v35 = vcombine.low %v2099_v29, %v2107_v30  ;;  %v3708_v38 = vcombine.high %v2115_v33, %v2123_v34  ;;  %v2085_v30 = vld [vmem:[%s5614_s4 + $0x1b0] sm:$0xff] }
 0x2a9   :  { %2982 = vmatpush1.bf16.msra.mxu1 %v3719_v40  ;;  %v2139_v40 = vld [vmem:[%s5614_s4 + $0x360] sm:$0xff] }
 0x2aa   :  { %2983 = vmatprep.subr.bf16.mxu1 %v3736_v42  ;;  %v3707_v42 = vcombine.low %v2115_v33, %v2123_v34  ;;  %v3724_v43 = vcombine.high %v2131_v39, %v2139_v40  ;;  %v2101_v34 = vld [vmem:[%s5614_s4 + $0x230] sm:$0xff] }
 0x2ad   :  { %2984 = vmatpush1.bf16.msra.mxu1 %v3735_v47  ;;  %v2155_v47 = vld [vmem:[%s5614_s4 + $0x3e0] sm:$0xff] }
 0x2ae   :  { %3012 = vmatprep.subr.bf16.mxu1 %v3626_v48  ;;  %v3723_v48 = vcombine.low %v2131_v39, %v2139_v40  ;;  %v3740_v49 = vcombine.high %v2147_v45, %v2155_v47  ;;  %v2117_v40 = vld [vmem:[%s5614_s4 + $0x2b0] sm:$0xff] }
 0x2b0   :  { %3002 = vmatmul.mubr.bf16.vlgmr.msra.gmra.mrb[12].mxu1 %v5189_v46 }
 0x2b1   :  { %3013 = vmatpush1.bf16.msra.mxu1 %v3625_v51  ;;  %3044 = vmatprep.mubr.bf16.mxu1 %v4200_v8  ;;  %v2044_v51 = vld [vmem:[%s5614_s4 + $0x68] sm:$0xff] }
 0x2b2   :  { %3014 = vmatprep.subr.bf16.mxu1 %v3642_v52  ;;  %v3739_v52 = vcombine.low %v2147_v45, %v2155_v47  ;;  %v3630_v36 = vcombine.high %v2036_v50, %v2044_v51  ;;  %v2133_v47 = vld [vmem:[%s5614_s4 + $0x330] sm:$0xff] }
 0x2b5   :  { %3015 = vmatpush1.bf16.msra.mxu1 %v3641_v53  ;;  %v2060_v53 = vld [vmem:[%s5614_s4 + $0xe8] sm:$0xff] }
 0x2b6   :  { %3016 = vmatprep.subr.bf16.mxu1 %v3658_v54  ;;  %v3629_v54 = vcombine.low %v2036_v50, %v2044_v51  ;;  %v3646_v55 = vcombine.high %v2052_v37, %v2060_v53  ;;  %v2149_v51 = vld [vmem:[%s5614_s4 + $0x3b0] sm:$0xff] }
 0x2b9   :  { %3017 = vmatpush1.bf16.msra.mxu1 %v3657_v57  ;;  %v2076_v57 = vld [vmem:[%s5614_s4 + $0x168] sm:$0xff] }
 0x2ba   :  { %3018 = vmatprep.subr.bf16.mxu1 %v3674_v58  ;;  %v3645_v58 = vcombine.low %v2052_v37, %v2060_v53  ;;  %v3662_v59 = vcombine.high %v2068_v56, %v2076_v57  ;;  %v2038_v53 = vld [vmem:[%s5614_s4 + $0x38] sm:$0xff] }
 0x2bd   :  { %3019 = vmatpush1.bf16.msra.mxu1 %v3673_v44  ;;  %v2092_v44 = vld [vmem:[%s5614_s4 + $0x1e8] sm:$0xff] }
 0x2be   :  { %3020 = vmatprep.subr.bf16.mxu1 %v3690_v60  ;;  %v3661_v60 = vcombine.low %v2068_v56, %v2076_v57  ;;  %v3678_v61 = vcombine.high %v2084_v41, %v2092_v44  ;;  %v2054_v57 = vld [vmem:[%s5614_s4 + $0xb8] sm:$0xff] }
 0x2c1   :  { %3021 = vmatpush1.bf16.msra.mxu1 %v3689_v63  ;;  %v2108_v63 = vld [vmem:[%s5614_s4 + $0x268] sm:$0xff] }
 0x2c2   :  { %3022 = vmatprep.subr.bf16.mxu1 %v3706_v0  ;;  %v3677_v0 = vcombine.low %v2084_v41, %v2092_v44  ;;  %v3694_v1 = vcombine.high %v2100_v62, %v2108_v63  ;;  %v2070_v44 = vld [vmem:[%s5614_s4 + $0x138] sm:$0xff] }
 0x2c5   :  { %3023 = vmatpush1.bf16.msra.mxu1 %v3705_v3  ;;  %v2124_v3 = vld [vmem:[%s5614_s4 + $0x2e8] sm:$0xff] }
 0x2c6   :  { %3024 = vmatprep.subr.bf16.mxu1 %v3722_v4  ;;  %v3693_v4 = vcombine.low %v2100_v62, %v2108_v63  ;;  %v3710_v5 = vcombine.high %v2116_v2, %v2124_v3  ;;  %v2086_v63 = vld [vmem:[%s5614_s4 + $0x1b8] sm:$0xff] }
 0x2c9   :  { %3025 = vmatpush1.bf16.msra.mxu1 %v3721_v7  ;;  %v2140_v7 = vld [vmem:[%s5614_s4 + $0x368] sm:$0xff] }
 0x2ca   :  { %3026 = vmatprep.subr.bf16.mxu1 %v3738_v9  ;;  %v3709_v9 = vcombine.low %v2116_v2, %v2124_v3  ;;  %v3726_v12 = vcombine.high %v2132_v6, %v2140_v7  ;;  %v2102_v3 = vld [vmem:[%s5614_s4 + $0x238] sm:$0xff] }
 0x2cd   :  { %3027 = vmatpush1.bf16.msra.mxu1 %v3737_v15  ;;  %v2156_v15 = vld [vmem:[%s5614_s4 + $0x3e8] sm:$0xff] }
 0x2ce   :  { %3055 = vmatprep.subr.bf16.mxu1 %v3628_v16  ;;  %v3725_v16 = vcombine.low %v2132_v6, %v2140_v7  ;;  %v3742_v17 = vcombine.high %v2148_v14, %v2156_v15  ;;  %v2118_v6 = vld [vmem:[%s5614_s4 + $0x2b8] sm:$0xff] }
 0x2cf   :  { %v2126_v7 = vld [vmem:[%s5614_s4 + $0x2f8] sm:$0xff] }
 0x2d0   :  { %3045 = vmatmul.mubr.bf16.vlgmr.msra.gmra.mrb[16].mxu1 %v5189_v46 }
 0x2d1   :  { %3056 = vmatpush1.bf16.msra.mxu1 %v3627_v19  ;;  %3087 = vmatprep.mubr.bf16.mxu1 %v4200_v8  ;;  %v2045_v19 = vld [vmem:[%s5614_s4 + $0x70] sm:$0xff] }
 0x2d2   :  { %3057 = vmatprep.subr.bf16.mxu1 %v3644_v20  ;;  %v3741_v20 = vcombine.low %v2148_v14, %v2156_v15  ;;  %v3632_v21 = vcombine.high %v2037_v18, %v2045_v19  ;;  %v3714_v14 = vcombine.high %v2118_v6, %v2126_v7  ;;  %v2134_v15 = vld [vmem:[%s5614_s4 + $0x338] sm:$0xff] }
 0x2d5   :  { %3058 = vmatpush1.bf16.msra.mxu1 %v3643_v23  ;;  %v2061_v23 = vld [vmem:[%s5614_s4 + $0xf0] sm:$0xff] }
 0x2d6   :  { %3059 = vmatprep.subr.bf16.mxu1 %v3660_v24  ;;  %v3631_v24 = vcombine.low %v2037_v18, %v2045_v19  ;;  %v3648_v25 = vcombine.high %v2053_v22, %v2061_v23  ;;  %v3713_v18 = vcombine.low %v2118_v6, %v2126_v7 }
 0x2d9   :  { %3060 = vmatpush1.bf16.msra.mxu1 %v3659_v27  ;;  %v2077_v27 = vld [vmem:[%s5614_s4 + $0x170] sm:$0xff] }
 0x2da   :  { %3061 = vmatprep.subr.bf16.mxu1 %v3676_v28  ;;  %v3647_v28 = vcombine.low %v2053_v22, %v2061_v23  ;;  %v3664_v29 = vcombine.high %v2069_v26, %v2077_v27  ;;  %v2150_v22 = vld [vmem:[%s5614_s4 + $0x3b8] sm:$0xff] }
 0x2db   :  { %v2158_v23 = vld [vmem:[%s5614_s4 + $0x3f8] sm:$0xff] }
 0x2dd   :  { %3062 = vmatpush1.bf16.msra.mxu1 %v3675_v31  ;;  %v2093_v31 = vld [vmem:[%s5614_s4 + $0x1f0] sm:$0xff] }
 0x2de   :  { %3063 = vmatprep.subr.bf16.mxu1 %v3692_v32  ;;  %v3663_v32 = vcombine.low %v2069_v26, %v2077_v27  ;;  %v3680_v33 = vcombine.high %v2085_v30, %v2093_v31 }
 0x2e1   :  { %3064 = vmatpush1.bf16.msra.mxu1 %v3691_v35  ;;  %v2109_v35 = vld [vmem:[%s5614_s4 + $0x270] sm:$0xff] }
 0x2e2   :  { %3065 = vmatprep.subr.bf16.mxu1 %v3708_v38  ;;  %v3679_v38 = vcombine.low %v2085_v30, %v2093_v31  ;;  %v3696_v39 = vcombine.high %v2101_v34, %v2109_v35  ;;  %v3746_v31 = vcombine.high %v2150_v22, %v2158_v23 }
 0x2e5   :  { %3066 = vmatpush1.bf16.msra.mxu1 %v3707_v42  ;;  %v2125_v42 = vld [vmem:[%s5614_s4 + $0x2f0] sm:$0xff] }
 0x2e6   :  { %3067 = vmatprep.subr.bf16.mxu1 %v3724_v43  ;;  %v3695_v43 = vcombine.low %v2101_v34, %v2109_v35  ;;  %v3712_v45 = vcombine.high %v2117_v40, %v2125_v42  ;;  %v3745_v35 = vcombine.low %v2150_v22, %v2158_v23 }
 0x2e9   :  { %3068 = vmatpush1.bf16.msra.mxu1 %v3723_v48  ;;  %v2141_v48 = vld [vmem:[%s5614_s4 + $0x370] sm:$0xff] }
 0x2ea   :  { %3069 = vmatprep.subr.bf16.mxu1 %v3740_v49  ;;  %v3711_v49 = vcombine.low %v2117_v40, %v2125_v42  ;;  %v3728_v50 = vcombine.high %v2133_v47, %v2141_v48 }
 0x2ed   :  { %3070 = vmatpush1.bf16.msra.mxu1 %v3739_v52  ;;  %v2157_v52 = vld [vmem:[%s5614_s4 + $0x3f0] sm:$0xff] }
 0x2ee   :  { %3098 = vmatprep.subr.bf16.mxu1 %v3630_v36  ;;  %v3727_v36 = vcombine.low %v2133_v47, %v2141_v48  ;;  %v3744_v37 = vcombine.high %v2149_v51, %v2157_v52 }
 0x2f0   :  { %3088 = vmatmul.mubr.bf16.vlgmr.msra.gmra.mrb[20].mxu1 %v5189_v46 }
 0x2f1   :  { %3099 = vmatpush1.bf16.msra.mxu1 %v3629_v54  ;;  %3130 = vmatprep.mubr.bf16.mxu1 %v4200_v8  ;;  %v2046_v54 = vld [vmem:[%s5614_s4 + $0x78] sm:$0xff] }
 0x2f2   :  { %3100 = vmatprep.subr.bf16.mxu1 %v3646_v55  ;;  %v3743_v55 = vcombine.low %v2149_v51, %v2157_v52  ;;  %v3634_v56 = vcombine.high %v2038_v53, %v2046_v54 }
 0x2f5   :  { %3101 = vmatpush1.bf16.msra.mxu1 %v3645_v58  ;;  %v2062_v58 = vld [vmem:[%s5614_s4 + $0xf8] sm:$0xff] }
 0x2f6   :  { %3102 = vmatprep.subr.bf16.mxu1 %v3662_v59  ;;  %v3633_v59 = vcombine.low %v2038_v53, %v2046_v54  ;;  %v3650_v41 = vcombine.high %v2054_v57, %v2062_v58  ;;  %v2185_v53 = vsub.s32 5, %v5152_v10 }
 0x2f9   :  { %3103 = vmatpush1.bf16.msra.mxu1 %v3661_v60  ;;  %v2078_v60 = vld [vmem:[%s5614_s4 + $0x178] sm:$0xff] }
 0x2fa   :  { %3104 = vmatprep.subr.bf16.mxu1 %v3678_v61  ;;  %v3649_v61 = vcombine.low %v2054_v57, %v2062_v58  ;;  %v3666_v62 = vcombine.high %v2070_v44, %v2078_v60 }
 0x2fd   :  { %3105 = vmatpush1.bf16.msra.mxu1 %v3677_v0  ;;  %v2094_v0 = vld [vmem:[%s5614_s4 + $0x1f8] sm:$0xff] }
 0x2fe   :  { %3106 = vmatprep.subr.bf16.mxu1 %v3694_v1  ;;  %v3665_v1 = vcombine.low %v2070_v44, %v2078_v60  ;;  %v3682_v2 = vcombine.high %v2086_v63, %v2094_v0 }
 0x301   :  { %3107 = vmatpush1.bf16.msra.mxu1 %v3693_v4  ;;  %v3681_v4 = vcombine.low %v2086_v63, %v2094_v0  ;;  %v2189_v0 = vsub.s32 6, %v5152_v10 }
 0x302   :  { %3108 = vmatprep.subr.bf16.mxu1 %v3710_v5 }
 0x305   :  { %3109 = vmatpush1.bf16.msra.mxu1 %v3709_v9 }
 0x306   :  { %3110 = vmatprep.subr.bf16.mxu1 %v3726_v12  ;;  %v5520_v12 = vld [vmem:[%s5618_s5] sm:$0xff] }
 0x307   :  { %v2170_v19 = vrot.slane %v5520_v12, %v5161_v13 }
 0x309   :  { %3111 = vmatpush1.bf16.msra.mxu1 %v3725_v16  ;;  %v2142_v16 = vld [vmem:[%s5614_s4 + $0x378] sm:$0xff] }
 0x30a   :  { %3112 = vmatprep.subr.bf16.mxu1 %v3742_v17  ;;  %v2166_v17 = vrot.slane %v5520_v12, %v5155_v11 }
 0x30d   :  { %3113 = vmatpush1.bf16.msra.mxu1 %v3741_v20  ;;  %v3730_v20 = vcombine.high %v2134_v15, %v2142_v16 }
 0x30e   :  { %3141 = vmatprep.subr.bf16.mxu1 %v3632_v21 }
 0x310   :  { %3131 = vmatmul.mubr.bf16.vlgmr.msra.gmra.mrb[24].mxu1 %v5189_v46 }
 0x311   :  { %3142 = vmatpush1.bf16.msra.mxu1 %v3631_v24  ;;  %3173 = vmatprep.mubr.bf16.mxu1 %v4200_v8 }
 0x312   :  { %3143 = vmatprep.subr.bf16.mxu1 %v3648_v25 }
 0x315   :  { %3144 = vmatpush1.bf16.msra.mxu1 %v3647_v28  ;;  %v3729_v28 = vcombine.low %v2134_v15, %v2142_v16 }
 0x316   :  { %3145 = vmatprep.subr.bf16.mxu1 %v3664_v29 }
 0x319   :  { %3146 = vmatpush1.bf16.msra.mxu1 %v3663_v32 }
 0x31a   :  { %3147 = vmatprep.subr.bf16.mxu1 %v3680_v33 }
 0x31d   :  { %3148 = vmatpush1.bf16.msra.mxu1 %v3679_v38  ;;  %v2173_v38 = vsub.s32 2, %v5152_v10 }
 0x31e   :  { %3149 = vmatprep.subr.bf16.mxu1 %v3696_v39  ;;  %v2177_v39 = vsub.s32 3, %v5152_v10 }
 0x31f   :  { %v2174_v40 = vrot.slane %v5520_v12, %v2173_v38 }
 0x320   :  { %v2178_v42 = vrot.slane %v5520_v12, %v2177_v39 }
 0x321   :  { %3150 = vmatpush1.bf16.msra.mxu1 %v3695_v43 }
 0x322   :  { %3151 = vmatprep.subr.bf16.mxu1 %v3712_v45 }
 0x325   :  { %3152 = vmatpush1.bf16.msra.mxu1 %v3711_v49 }
 0x326   :  { %3153 = vmatprep.subr.bf16.mxu1 %v3728_v50 }
 0x329   :  { %3154 = vmatpush1.bf16.msra.mxu1 %v3727_v36 }
 0x32a   :  { %3155 = vmatprep.subr.bf16.mxu1 %v3744_v37  ;;  %v2181_v37 = vsub.s32 4, %v5152_v10 }
 0x32c   :  { %v2182_v54 = vrot.slane %v5520_v12, %v2181_v37 }
 0x32d   :  { %3156 = vmatpush1.bf16.msra.mxu1 %v3743_v55  ;;  %v2186_v55 = vrot.slane %v5520_v12, %v2185_v53 }
 0x32e   :  { %3184 = vmatprep.subr.bf16.mxu1 %v3634_v56 }
 0x330   :  { %3174 = vmatmul.mubr.bf16.vlgmr.msra.gmra.mrb[28].mxu1 %v5189_v46 }
 0x331   :  { %3185 = vmatpush1.bf16.msra.mxu1 %v3633_v59  ;;  %3216 = vmatprep.mubr.bf16.mxu1 %v4200_v8  ;;  %v2110_v8 = vld [vmem:[%s5614_s4 + $0x278] sm:$0xff] }
 0x332   :  { %3186 = vmatprep.subr.bf16.mxu1 %v3650_v41  ;;  %v3698_v5 = vcombine.high %v2102_v3, %v2110_v8  ;;  %v3697_v9 = vcombine.low %v2102_v3, %v2110_v8 }
 0x335   :  { %3187 = vmatpush1.bf16.msra.mxu1 %v3649_v61 }
 0x336   :  { %3188 = vmatprep.subr.bf16.mxu1 %v3666_v62 }
 0x339   :  { %3189 = vmatpush1.bf16.msra.mxu1 %v3665_v1  ;;  %v2193_v1 = vsub.s32 7, %v5152_v10 }
 0x33a   :  { %3190 = vmatprep.subr.bf16.mxu1 %v3682_v2  ;;  %v2190_v2 = vrot.slane %v5520_v12, %v2189_v0 }
 0x33b   :  { %v2194_v3 = vrot.slane %v5520_v12, %v2193_v1  ;;  %v2160_v12 = vld [vmem:[%s5618_s5 + $0x8] sm:$0xff] }
 0x33c   :  { %v2214_v10 = vrot.slane %v2160_v12, %v2181_v37  ;;  %v2222_v37 = vrot.slane %v2160_v12, %v2189_v0 }
 0x33d   :  { %3191 = vmatpush1.bf16.msra.mxu1 %v3681_v4 }
 0x33e   :  { %3192 = vmatprep.subr.bf16.mxu1 %v3698_v5 }
 0x341   :  { %3193 = vmatpush1.bf16.msra.mxu1 %v3697_v9 }
 0x342   :  { %3194 = vmatprep.subr.bf16.mxu1 %v3714_v14 }
 0x343   :  { %v2917_v21 = vpop.f32.mrb[4].mxu1 }
 0x344   :  { %v2918_v24 = vadd.f32 %v2917_v21, %v2166_v17  ;;  %v2919_v25 = vpop.f32.mrb[5].mxu1 }
 0x345   :  { %v2920_v26 = vadd.f32 %v2919_v25, %v2170_v19  ;;  %3195 = vmatpush1.bf16.msra.mxu1 %v3713_v18  ;;  %v2921_v27 = vpop.f32.mrb[6].mxu1  ;;  %v2198_v18 = vrot.slane %v2160_v12, %v5155_v11  ;;  %v2206_v11 = vrot.slane %v2160_v12, %v2173_v38  ;;  %v2218_v38 = vrot.slane %v2160_v12, %v2185_v53 }
 0x346   :  { %v2922_v29 = vadd.f32 %v2921_v27, %v2166_v17  ;;  %v2923_v30 = vpop.f32.mrb[7].mxu1  ;;  %3196 = vmatprep.subr.bf16.mxu1 %v3730_v20  ;;  %v2226_v53 = vrot.slane %v2160_v12, %v2193_v1 }
 0x347   :  { %v3763_v32 = vpack.c.bf16 %v2920_v26, %v2918_v24  ;;  %v2924_v33 = vadd.f32 %v2923_v30, %v2170_v19  ;;  %v2202_v19 = vrot.slane %v2160_v12, %v5161_v13  ;;  %v2210_v13 = vrot.slane %v2160_v12, %v2177_v39 }
 0x349   :  { %3323 = vst [vmem:[%s5619_s7] sm:$0xff] %v3763_v32  ;;  %v3771_v34 = vpack.c.bf16 %v2924_v33, %v2922_v29  ;;  %3197 = vmatpush1.bf16.msra.mxu1 %v3729_v28 }
 0x34a   :  { %3198 = vmatprep.subr.bf16.mxu1 %v3746_v31 }
 0x34b   :  { %3331 = vst [vmem:[%s5619_s7 + $0x40] sm:$0xff] %v3771_v34 }
 0x34d   :  { %3199 = vmatpush1.bf16.msra.mxu1 %v3745_v35 }
 0x350   :  { %3217 = vmatmul.mubr.bf16.vlgmr.msra.gmra.mrb[32].mxu1 %v5189_v46 }
 0x363   :  { %v2960_v43 = vpop.f32.mrb[8].mxu1 }
 0x364   :  { %v2961_v45 = vadd.f32 %v2960_v43, %v2174_v40  ;;  %v2962_v47 = vpop.f32.mrb[9].mxu1 }
 0x365   :  { %v2963_v48 = vadd.f32 %v2962_v47, %v2178_v42  ;;  %v2964_v49 = vpop.f32.mrb[10].mxu1 }
 0x366   :  { %v2965_v50 = vadd.f32 %v2964_v49, %v2174_v40  ;;  %v2966_v51 = vpop.f32.mrb[11].mxu1 }
 0x367   :  { %v3764_v46 = vpack.c.bf16 %v2963_v48, %v2961_v45  ;;  %v2967_v52 = vadd.f32 %v2966_v51, %v2178_v42 }
 0x369   :  { %3324 = vst [vmem:[%s5619_s7 + $0x8] sm:$0xff] %v3764_v46  ;;  %v3772_v36 = vpack.c.bf16 %v2967_v52, %v2965_v50 }
 0x36b   :  { %3332 = vst [vmem:[%s5619_s7 + $0x48] sm:$0xff] %v3772_v36 }
 0x383   :  { %v3003_v56 = vpop.f32.mrb[12].mxu1 }
 0x384   :  { %v3004_v57 = vadd.f32 %v3003_v56, %v2182_v54  ;;  %v3005_v58 = vpop.f32.mrb[13].mxu1 }
 0x385   :  { %v3006_v59 = vadd.f32 %v3005_v58, %v2186_v55  ;;  %v3007_v41 = vpop.f32.mrb[14].mxu1 }
 0x386   :  { %v3008_v44 = vadd.f32 %v3007_v41, %v2182_v54  ;;  %v3009_v60 = vpop.f32.mrb[15].mxu1 }
 0x387   :  { %v3765_v61 = vpack.c.bf16 %v3006_v59, %v3004_v57  ;;  %v3010_v62 = vadd.f32 %v3009_v60, %v2186_v55 }
 0x389   :  { %3325 = vst [vmem:[%s5619_s7 + $0x10] sm:$0xff] %v3765_v61  ;;  %v3773_v63 = vpack.c.bf16 %v3010_v62, %v3008_v44 }
 0x38b   :  { %3333 = vst [vmem:[%s5619_s7 + $0x50] sm:$0xff] %v3773_v63 }
 0x3a3   :  { %v3046_v8 = vpop.f32.mrb[16].mxu1 }
 0x3a4   :  { %v3047_v4 = vadd.f32 %v3046_v8, %v2190_v2  ;;  %v3048_v5 = vpop.f32.mrb[17].mxu1 }
 0x3a5   :  { %v3049_v6 = vadd.f32 %v3048_v5, %v2194_v3  ;;  %v3050_v7 = vpop.f32.mrb[18].mxu1 }
 0x3a6   :  { %v3051_v9 = vadd.f32 %v3050_v7, %v2190_v2  ;;  %v3052_v14 = vpop.f32.mrb[19].mxu1 }
 0x3a7   :  { %v3766_v15 = vpack.c.bf16 %v3049_v6, %v3047_v4  ;;  %v3053_v16 = vadd.f32 %v3052_v14, %v2194_v3 }
 0x3a9   :  { %3326 = vst [vmem:[%s5619_s7 + $0x18] sm:$0xff] %v3766_v15  ;;  %v3774_v17 = vpack.c.bf16 %v3053_v16, %v3051_v9 }
 0x3ab   :  { %3334 = vst [vmem:[%s5619_s7 + $0x58] sm:$0xff] %v3774_v17 }
 0x3c3   :  { %v3089_v20 = vpop.f32.mrb[20].mxu1 }
 0x3c4   :  { %v3090_v21 = vadd.f32 %v3089_v20, %v2198_v18  ;;  %v3091_v22 = vpop.f32.mrb[21].mxu1 }
 0x3c5   :  { %v3092_v23 = vadd.f32 %v3091_v22, %v2202_v19  ;;  %v3093_v24 = vpop.f32.mrb[22].mxu1 }
 0x3c6   :  { %v3094_v25 = vadd.f32 %v3093_v24, %v2198_v18  ;;  %v3095_v26 = vpop.f32.mrb[23].mxu1 }
 0x3c7   :  { %v3767_v27 = vpack.c.bf16 %v3092_v23, %v3090_v21  ;;  %v3096_v28 = vadd.f32 %v3095_v26, %v2202_v19 }
 0x3c9   :  { %3327 = vst [vmem:[%s5619_s7 + $0x20] sm:$0xff] %v3767_v27  ;;  %v3775_v29 = vpack.c.bf16 %v3096_v28, %v3094_v25 }
 0x3cb   :  { %3335 = vst [vmem:[%s5619_s7 + $0x60] sm:$0xff] %v3775_v29 }
 0x3e3   :  { %v3132_v30 = vpop.f32.mrb[24].mxu1 }
 0x3e4   :  { %v3133_v31 = vadd.f32 %v3132_v30, %v2206_v11  ;;  %v3134_v32 = vpop.f32.mrb[25].mxu1 }
 0x3e5   :  { %v3135_v33 = vadd.f32 %v3134_v32, %v2210_v13  ;;  %v3136_v34 = vpop.f32.mrb[26].mxu1 }
 0x3e6   :  { %v3137_v35 = vadd.f32 %v3136_v34, %v2206_v11  ;;  %v3138_v40 = vpop.f32.mrb[27].mxu1 }
 0x3e7   :  { %v3768_v42 = vpack.c.bf16 %v3135_v33, %v3133_v31  ;;  %v3139_v43 = vadd.f32 %v3138_v40, %v2210_v13 }
 0x3e9   :  { %3328 = vst [vmem:[%s5619_s7 + $0x28] sm:$0xff] %v3768_v42  ;;  %v3776_v45 = vpack.c.bf16 %v3139_v43, %v3137_v35 }
 0x3eb   :  { %3336 = vst [vmem:[%s5619_s7 + $0x68] sm:$0xff] %v3776_v45 }
 0x403   :  { %v3175_v39 = vpop.f32.mrb[28].mxu1 }
 0x404   :  { %v3176_v47 = vadd.f32 %v3175_v39, %v2214_v10  ;;  %v3177_v48 = vpop.f32.mrb[29].mxu1 }
 0x405   :  { %v3178_v49 = vadd.f32 %v3177_v48, %v2218_v38  ;;  %v3179_v50 = vpop.f32.mrb[30].mxu1 }
 0x406   :  { %v3180_v51 = vadd.f32 %v3179_v50, %v2214_v10  ;;  %v3181_v46 = vpop.f32.mrb[31].mxu1 }
 0x407   :  { %v3769_v52 = vpack.c.bf16 %v3178_v49, %v3176_v47  ;;  %v3182_v36 = vadd.f32 %v3181_v46, %v2218_v38 }
 0x409   :  { %3329 = vst [vmem:[%s5619_s7 + $0x30] sm:$0xff] %v3769_v52  ;;  %v3777_v54 = vpack.c.bf16 %v3182_v36, %v3180_v51 }
 0x40b   :  { %3337 = vst [vmem:[%s5619_s7 + $0x70] sm:$0xff] %v3777_v54 }
 0x423   :  { %v3218_v55 = vpop.f32.mrb[32].mxu1 }
 0x424   :  { %v3219_v56 = vadd.f32 %v3218_v55, %v2222_v37  ;;  %v3220_v57 = vpop.f32.mrb[33].mxu1 }
 0x425   :  { %v3221_v58 = vadd.f32 %v3220_v57, %v2226_v53  ;;  %v3222_v59 = vpop.f32.mrb[34].mxu1 }
 0x426   :  { %v3223_v41 = vadd.f32 %v3222_v59, %v2222_v37  ;;  %v3224_v44 = vpop.f32.mrb[35].mxu1 }
 0x427   :  { %v3770_v60 = vpack.c.bf16 %v3221_v58, %v3219_v56  ;;  %v3225_v61 = vadd.f32 %v3224_v44, %v2226_v53 }
 0x429   :  { %3330 = vst [vmem:[%s5619_s7 + $0x38] sm:$0xff] %v3770_v60  ;;  %v3778_v62 = vpack.c.bf16 %v3225_v61, %v3223_v41 }
 0x42b   :  { %3338 = vst [vmem:[%s5619_s7 + $0x78] sm:$0xff] %v3778_v62 }

// kernel: cvae_forward.12
= control target key start
LH: loop header
LB: loop body
LE: loop exit
PB: predicated region body
PF: predicated region fallthrough
CT: control target
= control target key end

     0   :  { %s962_s12 = smov 0   ;;  %s964_s13 = smov 0   ;;  %s1086_s0 = inlined_call_operand.vmem [shape: bf16[192,256], index: 0, kind: input, shape index: {}]   ;;  %s1087_s1 = inlined_call_operand.vmem [shape: bf16[256,128], index: 1, kind: input, shape index: {}]   ;;  %s1088_s2 = inlined_call_operand.vmem [shape: f32[1,128], index: 2, kind: input, shape index: {}]   ;;  %s1089_s3 = inlined_call_operand.vmem [shape: bf16[192,128], index: 3, kind: output, shape index: {}]  }
   0x1   :  { %s966_s14 = smov 0  }
   0x2 LB: > { %s25_s15 = sadd.s32 1, %s936_s13  ;;  %p697_p0 = scmp.ge.s32.totalorder %s940_s14, 1  ;;  %s940_s14 = sphi %s966_s14, %s13_s14   ;;  %s936_s13 = sphi %s964_s13, %s1091_s13   ;;  %s932_s12 = sphi %s962_s12, %s1090_s12  }
   0x3   : > { %p27_p1 = scmp.ge.s32.totalorder %s25_s15, 2  ;;  %p170_p2 = scmp.lt.s32.totalorder %s940_s14, 3 }
   0x5   : > { %s1093_s15 = smov (%p27_p1, %s25_s15), 0  ;;  %p171_p3 = pnand %p697_p0, %p170_p2 }
   0x6   : > { %v884_v0 = vld [vmem:[%s1087_s1 + $0x40] sm:$0xff] (!%p171_p3)   ;;  %s205_s18 = smul.u32 (!%p171_p3), 12, %s932_s12  ;;  %v886_v2 = vld [vmem:[%s1087_s1 + $0x48] sm:$0xff] (!%p171_p3)   ;;  %v888_v4 = vld [vmem:[%s1087_s1 + $0x50] sm:$0xff] (!%p171_p3)  }
   0x7   : > { %174 = sbr.rel (%p171_p3) target bundleno = 279 (0x117), region = 32  ;;  %v885_v1 = vld [vmem:[%s1087_s1] sm:$0xff] (!%p171_p3)   ;;  %792 = vmatprep.subr.bf16.mxu0 (!%p171_p3), %v884_v0  ;;  %844 = vmatprep.subr.bf16.mxu1 (!%p171_p3), %v884_v0  ;;  %v887_v3 = vld [vmem:[%s1087_s1 + $0x8] sm:$0xff] (!%p171_p3)   ;;  %v889_v5 = vld [vmem:[%s1087_s1 + $0x10] sm:$0xff] (!%p171_p3)  }
   0x8   : > { %793 = vmatpush3.bf16.msra.mxu0 (!%p171_p3), %v885_v1  ;;  %852 = vmatpush3.bf16.msra.mxu1 (!%p171_p3), %v885_v1  ;;  %p206_p4 = scmp.lt.s32.totalorder (!%p171_p3), %s205_s18, 23  ;;  %v890_v6 = vld [vmem:[%s1087_s1 + $0x58] sm:$0xff] (!%p171_p3)   ;;  %v892_v8 = vld [vmem:[%s1087_s1 + $0x60] sm:$0xff] (!%p171_p3)   ;;  %v894_v10 = vld [vmem:[%s1087_s1 + $0x68] sm:$0xff] (!%p171_p3)  }
   0x9   : > { %794 = vmatprep.subr.bf16.mxu0 (!%p171_p3), %v886_v2  ;;  %845 = vmatprep.subr.bf16.mxu1 (!%p171_p3), %v886_v2  ;;  %v891_v7 = vld [vmem:[%s1087_s1 + $0x18] sm:$0xff] (!%p171_p3)   ;;  %v893_v9 = vld [vmem:[%s1087_s1 + $0x20] sm:$0xff] (!%p171_p3)   ;;  %v895_v13 = vld [vmem:[%s1087_s1 + $0x28] sm:$0xff] (!%p171_p3)  }
   0xa   : > { %v896_v14 = vld [vmem:[%s1087_s1 + $0x70] sm:$0xff] (!%p171_p3)   ;;  %v898_v16 = vld [vmem:[%s1087_s1 + $0x78] sm:$0xff] (!%p171_p3)   ;;  %v1051_v30 = vld [vmem:[%s1088_s2] ss:$0 sm:$0xff] (!%p171_p3) }
   0xb   : > { %v897_v15 = vld [vmem:[%s1087_s1 + $0x30] sm:$0xff] (!%p171_p3)   ;;  %v899_v17 = vld [vmem:[%s1087_s1 + $0x38] sm:$0xff] (!%p171_p3)  }
   0xc   : > { %795 = vmatpush3.bf16.msra.mxu0 (!%p171_p3), %v887_v3  ;;  %853 = vmatpush3.bf16.msra.mxu1 (!%p171_p3), %v887_v3 }
   0xd   : > { %796 = vmatprep.subr.bf16.mxu0 (!%p171_p3), %v888_v4  ;;  %846 = vmatprep.subr.bf16.mxu1 (!%p171_p3), %v888_v4 }
   0xe   : > { %s1095_s18 = smov (!%p206_p4, %s205_s18), 23 }
   0xf   : > { %s744_s6 = sshll.u32 %s1095_s18, 3  ;;  %s700_s5 = sshll.u32 %s1095_s18, 2 }
  0x10   : > { %797 = vmatpush3.bf16.msra.mxu0 %v889_v5  ;;  %854 = vmatpush3.bf16.msra.mxu1 %v889_v5  ;;  %s1013_s11 = scalar_lea.vmem %s1086_s0, %s744_s6  ;;  %s1061_s8 = scalar_lea.vmem %s1089_s3, %s700_s5 }
  0x11   : > { %798 = vmatprep.subr.bf16.mxu0 %v890_v6  ;;  %847 = vmatprep.subr.bf16.mxu1 %v890_v6  ;;  %v902_v11 = vld [vmem:[%s1013_s11 + $0x4] ss:$8 sps:$4 sm:$0xff]   ;;  %v905_v12 = vld [vmem:[%s1013_s11 + $0x34] ss:$8 sps:$4 sm:$0xff]   ;;  %v900_v18 = vld [vmem:[%s1013_s11] ss:$8 sps:$4 sm:$0xff]  }
  0x12   : > { %468 = vmatprep.mubr.bf16.mxu0 %v902_v11  ;;  %492 = vmatprep.mubr.bf16.mxu1 %v905_v12  ;;  %v903_v19 = vld [vmem:[%s1013_s11 + $0x30] ss:$8 sps:$4 sm:$0xff]   ;;  %v906_v20 = vld [vmem:[%s1013_s11 + $0x14] ss:$8 sps:$4 sm:$0xff]   ;;  %v908_v21 = vld [vmem:[%s1013_s11 + $0x44] ss:$8 sps:$4 sm:$0xff]  }
  0x13   : > { %v910_v22 = vld [vmem:[%s1013_s11 + $0x10] ss:$8 sps:$4 sm:$0xff]   ;;  %v911_v23 = vld [vmem:[%s1013_s11 + $0x40] ss:$8 sps:$4 sm:$0xff]   ;;  %v912_v24 = vld [vmem:[%s1013_s11 + $0x24] ss:$8 sps:$4 sm:$0xff]  }
  0x14   : > { %799 = vmatpush3.bf16.msra.mxu0 %v891_v7  ;;  %855 = vmatpush3.bf16.msra.mxu1 %v891_v7  ;;  %v914_v25 = vld [vmem:[%s1013_s11 + $0x54] ss:$8 sps:$4 sm:$0xff]   ;;  %v916_v26 = vld [vmem:[%s1013_s11 + $0x20] ss:$8 sps:$4 sm:$0xff]   ;;  %v917_v27 = vld [vmem:[%s1013_s11 + $0x50] ss:$8 sps:$4 sm:$0xff]  }
  0x15   : > { %800 = vmatprep.subr.bf16.mxu0 %v892_v8  ;;  %848 = vmatprep.subr.bf16.mxu1 %v892_v8 }
  0x18   : > { %801 = vmatpush3.bf16.msra.mxu0 %v893_v9  ;;  %856 = vmatpush3.bf16.msra.mxu1 %v893_v9 }
  0x19   : > { %802 = vmatprep.subr.bf16.mxu0 %v894_v10  ;;  %849 = vmatprep.subr.bf16.mxu1 %v894_v10 }
  0x1c   : > { %803 = vmatpush3.bf16.msra.mxu0 %v895_v13  ;;  %857 = vmatpush3.bf16.msra.mxu1 %v895_v13 }
  0x1d   : > { %804 = vmatprep.subr.bf16.mxu0 %v896_v14  ;;  %850 = vmatprep.subr.bf16.mxu1 %v896_v14 }
  0x20   : > { %805 = vmatpush3.bf16.msra.mxu0 %v897_v15  ;;  %858 = vmatpush3.bf16.msra.mxu1 %v897_v15 }
  0x21   : > { %806 = vmatprep.subr.bf16.mxu0 %v898_v16  ;;  %851 = vmatprep.subr.bf16.mxu1 %v898_v16 }
  0x24   : > { %807 = vmatpush3.bf16.msra.mxu0 %v899_v17  ;;  %859 = vmatpush3.bf16.msra.mxu1 %v899_v17 }
  0x27   : > { %469 = vmatmul.mubr.bf16.vlgmr.msra.gmra.mrb[0].mxu0 %v900_v18  ;;  %493 = vmatmul.mubr.bf16.vlgmr.msra.gmra.mrb[0].mxu1 %v903_v19 }
  0x28   : > { %476 = vmatprep.mubr.bf16.mxu0 %v906_v20  ;;  %500 = vmatprep.mubr.bf16.mxu1 %v908_v21 }
  0x2f   : > { %477 = vmatmul.mubr.bf16.gmra.mrb[4].mxu0 %v910_v22  ;;  %501 = vmatmul.mubr.bf16.gmra.mrb[4].mxu1 %v911_v23 }
  0x30   : > { %484 = vmatprep.mubr.bf16.mxu0 %v912_v24  ;;  %508 = vmatprep.mubr.bf16.mxu1 %v914_v25 }
  0x37   : > { %485 = vmatmul.mubr.bf16.gmra.mrb[8].mxu0 %v916_v26  ;;  %509 = vmatmul.mubr.bf16.gmra.mrb[8].mxu1 %v917_v27 }
  0xfa   : > { %v808_v28 = vpop.f32.mrb[0].mxu0  ;;  %v826_v29 = vpop.f32.mrb[0].mxu1 }
  0xfb   : > { %v809_v31 = vpop.f32.mrb[1].mxu0  ;;  %v827_v32 = vpop.f32.mrb[1].mxu1 }
  0xfc   : > { %v810_v33 = vadd.f32 %v809_v31, %v808_v28  ;;  %v828_v34 = vadd.f32 %v827_v32, %v826_v29  ;;  %v811_v35 = vpop.f32.mrb[2].mxu0  ;;  %v829_v36 = vpop.f32.mrb[2].mxu1 }
  0xfd   : > { %v812_v37 = vpop.f32.mrb[3].mxu0  ;;  %v830_v38 = vpop.f32.mrb[3].mxu1 }
  0xfe   : > { %v471_v39 = vadd.f32 %v810_v33, %v1051_v30  ;;  %v495_v40 = vadd.f32 %v828_v34, %v1051_v30  ;;  %v813_v41 = vadd.f32 %v812_v37, %v811_v35  ;;  %v831_v42 = vadd.f32 %v830_v38, %v829_v36 }
 0x100   : > { %v474_v43 = vadd.f32 %v813_v41, %v1051_v30  ;;  %v498_v44 = vadd.f32 %v831_v42, %v1051_v30  ;;  %v517_v45 = vmax.f32 %v471_v39, 0.0  ;;  %v523_v46 = vmax.f32 %v495_v40, 0.0 }
 0x102   : > { %v518_v47 = vmax.f32 %v474_v43, 0.0  ;;  %v524_v48 = vmax.f32 %v498_v44, 0.0  ;;  %v814_v49 = vpop.f32.mrb[4].mxu0  ;;  %v832_v50 = vpop.f32.mrb[4].mxu1 }
 0x103   : > { %v815_v51 = vpop.f32.mrb[5].mxu0  ;;  %v833_v52 = vpop.f32.mrb[5].mxu1 }
 0x104   : > { %v760_v53 = vpack.c.bf16 %v518_v47, %v517_v45  ;;  %v775_v54 = vpack.c.bf16 %v524_v48, %v523_v46  ;;  %v816_v55 = vadd.f32 %v815_v51, %v814_v49  ;;  %v834_v56 = vadd.f32 %v833_v52, %v832_v50  ;;  %v817_v57 = vpop.f32.mrb[6].mxu0  ;;  %v835_v58 = vpop.f32.mrb[6].mxu1 }
 0x105   : > { %v818_v59 = vpop.f32.mrb[7].mxu0  ;;  %v836_v60 = vpop.f32.mrb[7].mxu1 }
 0x106   : > { %761 = vst [vmem:[%s1061_s8] sm:$0xff] %v760_v53   ;;  %789 = vst [vmem:[%s1061_s8 + $0x18] sm:$0xff] %v775_v54   ;;  %v479_v61 = vadd.f32 %v816_v55, %v1051_v30  ;;  %v503_v62 = vadd.f32 %v834_v56, %v1051_v30  ;;  %v819_v63 = vadd.f32 %v818_v59, %v817_v57 }
 0x107   : > { %v837_v0 = vadd.f32 %v836_v60, %v835_v58 }
 0x108   : > { %v482_v1 = vadd.f32 %v819_v63, %v1051_v30  ;;  %v519_v3 = vmax.f32 %v479_v61, 0.0  ;;  %v525_v4 = vmax.f32 %v503_v62, 0.0 }
 0x109   : > { %v506_v2 = vadd.f32 %v837_v0, %v1051_v30 }
 0x10a   : > { %v520_v5 = vmax.f32 %v482_v1, 0.0  ;;  %v820_v7 = vpop.f32.mrb[8].mxu0  ;;  %v838_v8 = vpop.f32.mrb[8].mxu1 }
 0x10b   : > { %v526_v6 = vmax.f32 %v506_v2, 0.0  ;;  %v821_v9 = vpop.f32.mrb[9].mxu0  ;;  %v839_v10 = vpop.f32.mrb[9].mxu1 }
 0x10c   : > { %v765_v11 = vpack.c.bf16 %v520_v5, %v519_v3  ;;  %v822_v13 = vadd.f32 %v821_v9, %v820_v7  ;;  %v840_v14 = vadd.f32 %v839_v10, %v838_v8  ;;  %v823_v15 = vpop.f32.mrb[10].mxu0  ;;  %v841_v16 = vpop.f32.mrb[10].mxu1 }
 0x10d   : > { %v780_v12 = vpack.c.bf16 %v526_v6, %v525_v4  ;;  %v824_v17 = vpop.f32.mrb[11].mxu0  ;;  %v842_v18 = vpop.f32.mrb[11].mxu1 }
 0x10e   : > { %787 = vst [vmem:[%s1061_s8 + $0x8] sm:$0xff] %v765_v11   ;;  %v487_v19 = vadd.f32 %v822_v13, %v1051_v30  ;;  %v511_v20 = vadd.f32 %v840_v14, %v1051_v30  ;;  %v825_v21 = vadd.f32 %v824_v17, %v823_v15  ;;  %v843_v22 = vadd.f32 %v842_v18, %v841_v16 }
 0x10f   : > { %790 = vst [vmem:[%s1061_s8 + $0x20] sm:$0xff] %v780_v12  }
 0x110   : > { %v490_v23 = vadd.f32 %v825_v21, %v1051_v30  ;;  %v514_v24 = vadd.f32 %v843_v22, %v1051_v30  ;;  %v521_v25 = vmax.f32 %v487_v19, 0.0  ;;  %v527_v26 = vmax.f32 %v511_v20, 0.0 }
 0x112   : > { %v522_v27 = vmax.f32 %v490_v23, 0.0  ;;  %v528_v28 = vmax.f32 %v514_v24, 0.0 }
 0x114   : > { %v770_v29 = vpack.c.bf16 %v522_v27, %v521_v25  ;;  %v785_v31 = vpack.c.bf16 %v528_v28, %v527_v26 }
 0x116   : > { %788 = vst [vmem:[%s1061_s8 + $0x10] sm:$0xff] %v770_v29   ;;  %791 = vst [vmem:[%s1061_s8 + $0x28] sm:$0xff] %v785_v31  }
 0x117 PF: > { %s13_s14 = sadd.s32 1, %s940_s14   ;;  %s1090_s12 = smov %s936_s13 }
 0x118   : > { %p10_p5 = scmp.ge.s32.totalorder %s13_s14, 4   ;;  %s1091_s13 = smov %s1093_s15 }
 0x11a   :  { %12 = sbr.rel (!%p10_p5) target bundleno = 2 (0x2), region = 68 }

// kernel: cvae_forward.13
= control target key start
LH: loop header
LB: loop body
LE: loop exit
PB: predicated region body
PF: predicated region fallthrough
CT: control target
= control target key end

     0   :  { %s1466_s12 = smov 0   ;;  %s1468_s13 = smov 0   ;;  %s1723_s0 = inlined_call_operand.vmem [shape: bf16[608,128], index: 0, kind: input, shape index: {}]   ;;  %s1724_s1 = inlined_call_operand.vmem [shape: bf16[128,12], index: 1, kind: input, shape index: {}]   ;;  %s1725_s2 = inlined_call_operand.vmem [shape: f32[1,12], index: 2, kind: input, shape index: {}]   ;;  %s1726_s3 = inlined_call_operand.vmem [shape: f32[608,12], index: 3, kind: output, shape index: {}]  }
   0x1   :  { %s1470_s14 = smov 0  }
   0x2 LB: > { %s25_s15 = sadd.s32 1, %s1438_s13  ;;  %p1009_p0 = scmp.ge.s32.totalorder %s1442_s14, 1  ;;  %s1442_s14 = sphi %s1470_s14, %s13_s14   ;;  %s1438_s13 = sphi %s1468_s13, %s1728_s13   ;;  %s1434_s12 = sphi %s1466_s12, %s1727_s12  }
   0x3   : > { %p27_p1 = scmp.ge.s32.totalorder %s25_s15, 2  ;;  %p169_p2 = scmp.lt.s32.totalorder %s1442_s14, 3 }
   0x5   : > { %s1730_s15 = smov (%p27_p1, %s25_s15), 0  ;;  %p170_p3 = pnand %p1009_p0, %p169_p2 }
   0x6   : > { %v1241_v0 = vld [vmem:[%s1724_s1] sm:$0xff] (!%p170_p3)   ;;  %v1444_v1 = vmov (!%p170_p3), 0.0   ;;  %v1242_v2 = vld [vmem:[%s1724_s1 + $0x8] sm:$0xff] (!%p170_p3)   ;;  %s203_s20 = smul.u32 (!%p170_p3), 38, %s1434_s12  ;;  %vm1445_vm0 = vmmov (!%p170_p3), 0   ;;  %v1243_v3 = vld [vmem:[%s1724_s1 + $0x10] sm:$0xff] (!%p170_p3)  }
   0x7   : > { %173 = sbr.rel (%p170_p3) target bundleno = 360 (0x168), region = 32  ;;  %1107 = vmatprep.subr.bf16.mxu0 (!%p170_p3), %v1444_v1  ;;  %1199 = vmatprep.subr.bf16.mxu1 (!%p170_p3), %v1444_v1  ;;  %v1244_v4 = vld [vmem:[%s1724_s1 + $0x18] sm:$0xff] (!%p170_p3)   ;;  %v1245_v5 = vld [vmem:[%s1724_s1 + $0x20] sm:$0xff] (!%p170_p3)   ;;  %v1246_v6 = vld [vmem:[%s1724_s1 + $0x28] sm:$0xff] (!%p170_p3)   ;;  %vm862_vm1 = vcmask (!%p170_p3), 97280  }
   0x8   : > { %1108 = vmatpush3.bf16.msra.mxu0 (!%p170_p3), %v1241_v0  ;;  %1207 = vmatpush3.bf16.msra.mxu1 (!%p170_p3), %v1241_v0  ;;  %p204_p4 = scmp.lt.s32.totalorder (!%p170_p3), %s203_s20, 75  ;;  %v1247_v7 = vld [vmem:[%s1724_s1 + $0x30] sm:$0xff] (!%p170_p3)   ;;  %v1248_v8 = vld [vmem:[%s1724_s1 + $0x38] sm:$0xff] (!%p170_p3)   ;;  %v1592_v28 = vld [vmem:[%s1725_s2] ss:$0 sm:$0xff] (!%p170_p3) }
   0x9   : > { %1109 = vmatprep.subr.bf16.mxu0 (!%p170_p3), %v1444_v1  ;;  %1200 = vmatprep.subr.bf16.mxu1 (!%p170_p3), %v1444_v1 }
   0xa   : > { %1123 = vmatprep.mubr.msk.bf16.mxu0 (!%p170_p3), %vm1445_vm0, %v1444_v1  ;;  %1163 = vmatprep.mubr.msk.bf16.mxu1 (!%p170_p3), %vm1445_vm0, %v1444_v1 }
   0xc   : > { %1110 = vmatpush3.bf16.msra.mxu0 (!%p170_p3), %v1242_v2  ;;  %1208 = vmatpush3.bf16.msra.mxu1 (!%p170_p3), %v1242_v2 }
   0xd   : > { %1111 = vmatprep.subr.bf16.mxu0 (!%p170_p3), %v1444_v1  ;;  %1201 = vmatprep.subr.bf16.mxu1 (!%p170_p3), %v1444_v1 }
   0xe   : > { %s1732_s20 = smov (!%p204_p4, %s203_s20), 75 }
   0xf   : > { %s1010_s23 = sshll.u32 %s1732_s20, 2  ;;  %s1011_s12 = sshll.u32 %s1732_s20, 3 }
  0x10   : > { %s1509_s26 = scalar_lea.vmem %s1723_s0, %s1010_s23  ;;  %1112 = vmatpush3.bf16.msra.mxu0 %v1243_v3  ;;  %1209 = vmatpush3.bf16.msra.mxu1 %v1243_v3  ;;  %s1612_s18 = scalar_lea.vmem %s1726_s3, %s1011_s12 }
  0x11   : > { %1113 = vmatprep.subr.bf16.mxu0 %v1444_v1  ;;  %1202 = vmatprep.subr.bf16.mxu1 %v1444_v1  ;;  %v1249_v9 = vld [vmem:[%s1509_s26] sm:$0xff]   ;;  %v1250_v10 = vld [vmem:[%s1509_s26 + $0x50] sm:$0xff]   ;;  %v1251_v11 = vld [vmem:[%s1509_s26 + $0x8] sm:$0xff]  }
  0x12   : > { %v1252_v12 = vld [vmem:[%s1509_s26 + $0x58] sm:$0xff]   ;;  %v1253_v13 = vld [vmem:[%s1509_s26 + $0x10] sm:$0xff]   ;;  %v1254_v14 = vld [vmem:[%s1509_s26 + $0x60] sm:$0xff]  }
  0x13   : > { %v1255_v15 = vld [vmem:[%s1509_s26 + $0x18] sm:$0xff]   ;;  %v1256_v16 = vld [vmem:[%s1509_s26 + $0x68] sm:$0xff]   ;;  %v1257_v17 = vld [vmem:[%s1509_s26 + $0x20] sm:$0xff]  }
  0x14   : > { %1114 = vmatpush3.bf16.msra.mxu0 %v1244_v4  ;;  %1210 = vmatpush3.bf16.msra.mxu1 %v1244_v4  ;;  %v1258_v18 = vld [vmem:[%s1509_s26 + $0x70] sm:$0xff]   ;;  %v1259_v19 = vld [vmem:[%s1509_s26 + $0x28] sm:$0xff]   ;;  %v1260_v20 = vld [vmem:[%s1509_s26 + $0x78] sm:$0xff]  }
  0x15   : > { %1115 = vmatprep.subr.bf16.mxu0 %v1444_v1  ;;  %1203 = vmatprep.subr.bf16.mxu1 %v1444_v1  ;;  %v1261_v21 = vld [vmem:[%s1509_s26 + $0x30] sm:$0xff]   ;;  %v1262_v22 = vld [vmem:[%s1509_s26 + $0x80] sm:$0xff]   ;;  %v1263_v23 = vld [vmem:[%s1509_s26 + $0x38] sm:$0xff]  }
  0x16   : > { %v1264_v24 = vld [vmem:[%s1509_s26 + $0x88] sm:$0xff]   ;;  %v1265_v25 = vld [vmem:[%s1509_s26 + $0x40] sm:$0xff]   ;;  %v1266_v26 = vld [vmem:[%s1509_s26 + $0x90] sm:$0xff]  }
  0x17   : > { %v1267_v27 = vld [vmem:[%s1509_s26 + $0x48] sm:$0xff]  }
  0x18   : > { %1116 = vmatpush3.bf16.msra.mxu0 %v1245_v5  ;;  %1211 = vmatpush3.bf16.msra.mxu1 %v1245_v5 }
  0x19   : > { %1117 = vmatprep.subr.bf16.mxu0 %v1444_v1  ;;  %1204 = vmatprep.subr.bf16.mxu1 %v1444_v1 }
  0x1c   : > { %1118 = vmatpush3.bf16.msra.mxu0 %v1246_v6  ;;  %1212 = vmatpush3.bf16.msra.mxu1 %v1246_v6 }
  0x1d   : > { %1119 = vmatprep.subr.bf16.mxu0 %v1444_v1  ;;  %1205 = vmatprep.subr.bf16.mxu1 %v1444_v1 }
  0x20   : > { %1120 = vmatpush3.bf16.msra.mxu0 %v1247_v7  ;;  %1213 = vmatpush3.bf16.msra.mxu1 %v1247_v7 }
  0x21   : > { %1121 = vmatprep.subr.bf16.mxu0 %v1444_v1  ;;  %1206 = vmatprep.subr.bf16.mxu1 %v1444_v1 }
  0x24   : > { %1122 = vmatpush3.bf16.msra.mxu0 %v1248_v8  ;;  %1214 = vmatpush3.bf16.msra.mxu1 %v1248_v8 }
  0x27   : > { %1124 = vmatmul.mubr.bf16.vlgmr.msra.gmra.mrb[0].mxu0 %v1249_v9  ;;  %1164 = vmatmul.mubr.bf16.vlgmr.msra.gmra.mrb[0].mxu1 %v1250_v10 }
  0x28   : > { %1127 = vmatprep.mubr.msk.bf16.mxu0 %vm1445_vm0, %v1444_v1  ;;  %1167 = vmatprep.mubr.msk.bf16.mxu1 %vm1445_vm0, %v1444_v1 }
  0x2f   : > { %1128 = vmatmul.mubr.bf16.gmra.mrb[4].mxu0 %v1251_v11  ;;  %1168 = vmatmul.mubr.bf16.gmra.mrb[4].mxu1 %v1252_v12 }
  0x30   : > { %1131 = vmatprep.mubr.msk.bf16.mxu0 %vm1445_vm0, %v1444_v1  ;;  %1171 = vmatprep.mubr.msk.bf16.mxu1 %vm1445_vm0, %v1444_v1 }
  0x37   : > { %1132 = vmatmul.mubr.bf16.gmra.mrb[8].mxu0 %v1253_v13  ;;  %1172 = vmatmul.mubr.bf16.gmra.mrb[8].mxu1 %v1254_v14 }
  0x38   : > { %1135 = vmatprep.mubr.msk.bf16.mxu0 %vm1445_vm0, %v1444_v1  ;;  %1175 = vmatprep.mubr.msk.bf16.mxu1 %vm1445_vm0, %v1444_v1 }
  0x3f   : > { %1136 = vmatmul.mubr.bf16.gmra.mrb[12].mxu0 %v1255_v15  ;;  %1176 = vmatmul.mubr.bf16.gmra.mrb[12].mxu1 %v1256_v16 }
  0x40   : > { %1139 = vmatprep.mubr.msk.bf16.mxu0 %vm1445_vm0, %v1444_v1  ;;  %1179 = vmatprep.mubr.msk.bf16.mxu1 %vm1445_vm0, %v1444_v1 }
  0x47   : > { %1140 = vmatmul.mubr.bf16.gmra.mrb[16].mxu0 %v1257_v17  ;;  %1180 = vmatmul.mubr.bf16.gmra.mrb[16].mxu1 %v1258_v18 }
  0x48   : > { %1143 = vmatprep.mubr.msk.bf16.mxu0 %vm1445_vm0, %v1444_v1  ;;  %1183 = vmatprep.mubr.msk.bf16.mxu1 %vm1445_vm0, %v1444_v1 }
  0x4f   : > { %1144 = vmatmul.mubr.bf16.gmra.mrb[20].mxu0 %v1259_v19  ;;  %1184 = vmatmul.mubr.bf16.gmra.mrb[20].mxu1 %v1260_v20 }
  0x50   : > { %1147 = vmatprep.mubr.msk.bf16.mxu0 %vm1445_vm0, %v1444_v1  ;;  %1187 = vmatprep.mubr.msk.bf16.mxu1 %vm1445_vm0, %v1444_v1 }
  0x57   : > { %1148 = vmatmul.mubr.bf16.gmra.mrb[24].mxu0 %v1261_v21  ;;  %1188 = vmatmul.mubr.bf16.gmra.mrb[24].mxu1 %v1262_v22 }
  0x58   : > { %1151 = vmatprep.mubr.msk.bf16.mxu0 %vm1445_vm0, %v1444_v1  ;;  %1191 = vmatprep.mubr.msk.bf16.mxu1 %vm1445_vm0, %v1444_v1 }
  0x5f   : > { %1152 = vmatmul.mubr.bf16.gmra.mrb[28].mxu0 %v1263_v23  ;;  %1192 = vmatmul.mubr.bf16.gmra.mrb[28].mxu1 %v1264_v24 }
  0x60   : > { %1155 = vmatprep.mubr.msk.bf16.mxu0 %vm1445_vm0, %v1444_v1  ;;  %1195 = vmatprep.mubr.msk.bf16.mxu1 %vm1445_vm0, %v1444_v1 }
  0x67   : > { %1156 = vmatmul.mubr.bf16.gmra.mrb[32].mxu0 %v1265_v25  ;;  %1196 = vmatmul.mubr.bf16.gmra.mrb[32].mxu1 %v1266_v26 }
  0x68   : > { %1159 = vmatprep.mubr.msk.bf16.mxu0 %vm1445_vm0, %v1444_v1 }
  0x6f   : > { %1160 = vmatmul.mubr.bf16.gmra.mrb[36].mxu0 %v1267_v27 }
  0xfa   : > { %v483_v29 = vpop.f32.mrb[0].mxu0  ;;  %v563_v30 = vpop.f32.mrb[0].mxu1 }
  0xfb   : > { %v484_v31 = vadd.f32 %v1592_v28, %v483_v29  ;;  %v1125_v32 = vpop.f32.mrb[1].mxu0  ;;  %v564_v33 = vadd.f32 %v1592_v28, %v563_v30  ;;  %v1165_v34 = vpop.f32.mrb[1].mxu1 }
  0xfc   : > { %v486_v35 = vpop.f32.mrb[2].mxu0  ;;  %v566_v36 = vpop.f32.mrb[2].mxu1 }
  0xfd   : > { %v1040_v37 = vmul.f32 -1.442695, %v484_v31  ;;  %v487_v38 = vadd.f32 %v1592_v28, %v486_v35  ;;  %v1126_v39 = vpop.f32.mrb[3].mxu0  ;;  %v1060_v40 = vmul.f32 -1.442695, %v564_v33  ;;  %v567_v41 = vadd.f32 %v1592_v28, %v566_v36  ;;  %v1166_v42 = vpop.f32.mrb[3].mxu1 }
  0xff   : > { %1268 = vpow2.f32 %v1040_v37  ;;  %v1041_v43 = vmul.f32 -1.442695, %v487_v38  ;;  %v1061_v44 = vmul.f32 -1.442695, %v567_v41 }
 0x100   : > { %1270 = vpow2.f32 %v1060_v40 }
 0x101   : > { %1272 = vpow2.f32 %v1041_v43 }
 0x102   : > { %1274 = vpow2.f32 %v1061_v44  ;;  %v491_v45 = vpop.f32.mrb[4].mxu0  ;;  %v571_v46 = vpop.f32.mrb[4].mxu1 }
 0x103   : > { %v492_v47 = vadd.f32 %v1592_v28, %v491_v45  ;;  %v1129_v48 = vpop.f32.mrb[5].mxu0  ;;  %v572_v49 = vadd.f32 %v1592_v28, %v571_v46  ;;  %v1169_v50 = vpop.f32.mrb[5].mxu1 }
 0x104   : > { %v494_v51 = vpop.f32.mrb[6].mxu0  ;;  %v574_v52 = vpop.f32.mrb[6].mxu1 }
 0x105   : > { %v1042_v53 = vmul.f32 -1.442695, %v492_v47  ;;  %v495_v54 = vadd.f32 %v1592_v28, %v494_v51  ;;  %v1130_v55 = vpop.f32.mrb[7].mxu0  ;;  %v1062_v56 = vmul.f32 -1.442695, %v572_v49  ;;  %v575_v57 = vadd.f32 %v1592_v28, %v574_v52  ;;  %v1170_v58 = vpop.f32.mrb[7].mxu1 }
 0x107   : > { %1276 = vpow2.f32 %v1042_v53  ;;  %v1043_v59 = vmul.f32 -1.442695, %v495_v54  ;;  %v1063_v60 = vmul.f32 -1.442695, %v575_v57 }
 0x108   : > { %1278 = vpow2.f32 %v1062_v56 }
 0x109   : > { %v1269_v61 = vpop.eup %1268  ;;  %1280 = vpow2.f32 %v1043_v59 }
 0x10a   : > { %v1271_v62 = vpop.eup %1270  ;;  %v748_v63 = vadd.f32 1.0, %v1269_v61  ;;  %1282 = vpow2.f32 %v1063_v60  ;;  %v499_v0 = vpop.f32.mrb[8].mxu0 }
 0x10b   : > { %v579_v1 = vpop.f32.mrb[8].mxu1  ;;  %v1273_v2 = vpop.eup %1272  ;;  %v768_v3 = vadd.f32 1.0, %v1271_v62  ;;  %v500_v4 = vadd.f32 %v1592_v28, %v499_v0 }
 0x10c   : > { %v1133_v5 = vpop.f32.mrb[9].mxu0  ;;  %v580_v6 = vadd.f32 %v1592_v28, %v579_v1  ;;  %v1173_v7 = vpop.f32.mrb[9].mxu1  ;;  %1284 = vrcp.f32 %v748_v63  ;;  %v749_v9 = vadd.f32 1.0, %v1273_v2 }
 0x10d   : > { %v1275_v8 = vpop.eup %1274  ;;  %v502_v10 = vpop.f32.mrb[10].mxu0  ;;  %1286 = vrcp.f32 %v768_v3  ;;  %v1044_v13 = vmul.f32 -1.442695, %v500_v4 }
 0x10e   : > { %v582_v11 = vpop.f32.mrb[10].mxu1  ;;  %v769_v12 = vadd.f32 1.0, %v1275_v8  ;;  %v503_v14 = vadd.f32 %v1592_v28, %v502_v10  ;;  %v1134_v15 = vpop.f32.mrb[11].mxu0  ;;  %1288 = vrcp.f32 %v749_v9  ;;  %v1064_v17 = vmul.f32 -1.442695, %v580_v6 }
 0x10f   : > { %v1174_v16 = vpop.f32.mrb[11].mxu1  ;;  %v583_v18 = vadd.f32 %v1592_v28, %v582_v11 }
 0x110   : > { %1290 = vrcp.f32 %v769_v12  ;;  %v1045_v19 = vmul.f32 -1.442695, %v503_v14 }
 0x111   : > { %1292 = vpow2.f32 %v1044_v13  ;;  %v1065_v20 = vmul.f32 -1.442695, %v583_v18  ;;  %v1277_v21 = vpop.eup %1276 }
 0x112   : > { %1294 = vpow2.f32 %v1045_v19  ;;  %v1279_v22 = vpop.eup %1278  ;;  %v750_v23 = vadd.f32 1.0, %v1277_v21  ;;  %v507_v24 = vpop.f32.mrb[12].mxu0 }
 0x113   : > { %1296 = vpow2.f32 %v1064_v17  ;;  %v587_v25 = vpop.f32.mrb[12].mxu1  ;;  %v1281_v26 = vpop.eup %1280  ;;  %v770_v27 = vadd.f32 1.0, %v1279_v22  ;;  %v508_v29 = vadd.f32 %v1592_v28, %v507_v24 }
 0x114   : > { %1298 = vpow2.f32 %v1065_v20  ;;  %v1137_v30 = vpop.f32.mrb[13].mxu0  ;;  %v588_v31 = vadd.f32 %v1592_v28, %v587_v25  ;;  %v1177_v32 = vpop.f32.mrb[13].mxu1  ;;  %v751_v34 = vadd.f32 1.0, %v1281_v26 }
 0x115   : > { %v1283_v33 = vpop.eup %1282  ;;  %1300 = vrcp.f32 %v750_v23  ;;  %v510_v35 = vpop.f32.mrb[14].mxu0  ;;  %v1046_v38 = vmul.f32 -1.442695, %v508_v29 }
 0x116   : > { %v590_v36 = vpop.f32.mrb[14].mxu1  ;;  %1302 = vrcp.f32 %v770_v27  ;;  %v771_v37 = vadd.f32 1.0, %v1283_v33  ;;  %v511_v39 = vadd.f32 %v1592_v28, %v510_v35  ;;  %v1138_v40 = vpop.f32.mrb[15].mxu0  ;;  %v1066_v43 = vmul.f32 -1.442695, %v588_v31 }
 0x117   : > { %v1178_v41 = vpop.f32.mrb[15].mxu1  ;;  %v1285_v42 = vpop.eup %1284  ;;  %1304 = vrcp.f32 %v751_v34  ;;  %v591_v44 = vadd.f32 %v1592_v28, %v590_v36 }
 0x118   : > { %v1287_v45 = vpop.eup %1286  ;;  %863 = vst.msk [vmem:[%s1612_s18] sm:$0xff] %vm862_vm1, %v1285_v42  ;;  %1306 = vrcp.f32 %v771_v37  ;;  %v1047_v46 = vmul.f32 -1.442695, %v511_v39 }
 0x119   : > { %v1289_v47 = vpop.eup %1288  ;;  %883 = vst.msk [vmem:[%s1612_s18 + $0xa0] sm:$0xff] %vm862_vm1, %v1287_v45  ;;  %1308 = vpow2.f32 %v1046_v38  ;;  %v1067_v48 = vmul.f32 -1.442695, %v591_v44 }
 0x11a   : > { %v1291_v49 = vpop.eup %1290  ;;  %864 = vst.msk [vmem:[%s1612_s18 + $0x8] sm:$0xff] %vm862_vm1, %v1289_v47  ;;  %1310 = vpow2.f32 %v1047_v46  ;;  %v515_v51 = vpop.f32.mrb[16].mxu0 }
 0x11b   : > { %v1293_v50 = vpop.eup %1292  ;;  %884 = vst.msk [vmem:[%s1612_s18 + $0xa8] sm:$0xff] %vm862_vm1, %v1291_v49  ;;  %1312 = vpow2.f32 %v1066_v43  ;;  %v595_v52 = vpop.f32.mrb[16].mxu1  ;;  %v516_v55 = vadd.f32 %v1592_v28, %v515_v51 }
 0x11c   : > { %v1295_v53 = vpop.eup %1294  ;;  %v752_v54 = vadd.f32 1.0, %v1293_v50  ;;  %1314 = vpow2.f32 %v1067_v48  ;;  %v1141_v56 = vpop.f32.mrb[17].mxu0  ;;  %v596_v57 = vadd.f32 %v1592_v28, %v595_v52 }
 0x11d   : > { %v1181_v58 = vpop.f32.mrb[17].mxu1  ;;  %v1297_v59 = vpop.eup %1296  ;;  %v753_v60 = vadd.f32 1.0, %v1295_v53  ;;  %v1048_v1 = vmul.f32 -1.442695, %v516_v55 }
 0x11e   : > { %v518_v61 = vpop.f32.mrb[18].mxu0  ;;  %v598_v62 = vpop.f32.mrb[18].mxu1  ;;  %1316 = vrcp.f32 %v752_v54  ;;  %v772_v0 = vadd.f32 1.0, %v1297_v59  ;;  %v1068_v10 = vmul.f32 -1.442695, %v596_v57 }
 0x11f   : > { %v1299_v63 = vpop.eup %1298  ;;  %v519_v2 = vadd.f32 %v1592_v28, %v518_v61  ;;  %v1142_v3 = vpop.f32.mrb[19].mxu0  ;;  %1318 = vrcp.f32 %v753_v60  ;;  %v599_v7 = vadd.f32 %v1592_v28, %v598_v62 }
 0x120   : > { %v1182_v4 = vpop.f32.mrb[19].mxu1  ;;  %v1301_v5 = vpop.eup %1300  ;;  %v773_v6 = vadd.f32 1.0, %v1299_v63  ;;  %1320 = vrcp.f32 %v772_v0 }
 0x121   : > { %v1303_v8 = vpop.eup %1302  ;;  %865 = vst.msk [vmem:[%s1612_s18 + $0x10] sm:$0xff] %vm862_vm1, %v1301_v5  ;;  %v1049_v9 = vmul.f32 -1.442695, %v519_v2  ;;  %v1069_v12 = vmul.f32 -1.442695, %v599_v7 }
 0x122   : > { %v1305_v11 = vpop.eup %1304  ;;  %885 = vst.msk [vmem:[%s1612_s18 + $0xb0] sm:$0xff] %vm862_vm1, %v1303_v8  ;;  %1322 = vrcp.f32 %v773_v6  ;;  %v523_v15 = vpop.f32.mrb[20].mxu0 }
 0x123   : > { %v1307_v13 = vpop.eup %1306  ;;  %866 = vst.msk [vmem:[%s1612_s18 + $0x18] sm:$0xff] %vm862_vm1, %v1305_v11  ;;  %1324 = vpow2.f32 %v1048_v1  ;;  %v603_v16 = vpop.f32.mrb[20].mxu1  ;;  %v524_v19 = vadd.f32 %v1592_v28, %v523_v15 }
 0x124   : > { %v1309_v14 = vpop.eup %1308  ;;  %886 = vst.msk [vmem:[%s1612_s18 + $0xb8] sm:$0xff] %vm862_vm1, %v1307_v13  ;;  %1326 = vpow2.f32 %v1049_v9  ;;  %v1145_v20 = vpop.f32.mrb[21].mxu0  ;;  %v604_v21 = vadd.f32 %v1592_v28, %v603_v16 }
 0x125   : > { %v1311_v17 = vpop.eup %1310  ;;  %v754_v18 = vadd.f32 1.0, %v1309_v14  ;;  %1328 = vpow2.f32 %v1068_v10  ;;  %v1185_v22 = vpop.f32.mrb[21].mxu1  ;;  %v1050_v30 = vmul.f32 -1.442695, %v524_v19 }
 0x126   : > { %v1313_v23 = vpop.eup %1312  ;;  %v755_v24 = vadd.f32 1.0, %v1311_v17  ;;  %1330 = vpow2.f32 %v1069_v12  ;;  %v526_v25 = vpop.f32.mrb[22].mxu0  ;;  %v1070_v38 = vmul.f32 -1.442695, %v604_v21 }
 0x127   : > { %v606_v26 = vpop.f32.mrb[22].mxu1  ;;  %v1315_v27 = vpop.eup %1314  ;;  %1332 = vrcp.f32 %v754_v18  ;;  %v774_v29 = vadd.f32 1.0, %v1313_v23  ;;  %v527_v31 = vadd.f32 %v1592_v28, %v526_v25 }
 0x128   : > { %v1146_v32 = vpop.f32.mrb[23].mxu0  ;;  %v1186_v33 = vpop.f32.mrb[23].mxu1  ;;  %1334 = vrcp.f32 %v755_v24  ;;  %v775_v34 = vadd.f32 1.0, %v1315_v27  ;;  %v607_v35 = vadd.f32 %v1592_v28, %v606_v26 }
 0x129   : > { %v1317_v36 = vpop.eup %1316  ;;  %1336 = vrcp.f32 %v774_v29  ;;  %v1051_v37 = vmul.f32 -1.442695, %v527_v31 }
 0x12a   : > { %v1319_v39 = vpop.eup %1318  ;;  %867 = vst.msk [vmem:[%s1612_s18 + $0x20] sm:$0xff] %vm862_vm1, %v1317_v36  ;;  %1338 = vrcp.f32 %v775_v34  ;;  %v1071_v40 = vmul.f32 -1.442695, %v607_v35  ;;  %v531_v43 = vpop.f32.mrb[24].mxu0 }
 0x12b   : > { %v1321_v41 = vpop.eup %1320  ;;  %868 = vst.msk [vmem:[%s1612_s18 + $0x28] sm:$0xff] %vm862_vm1, %v1319_v39  ;;  %1340 = vpow2.f32 %v1050_v30  ;;  %v611_v44 = vpop.f32.mrb[24].mxu1  ;;  %v532_v46 = vadd.f32 %v1592_v28, %v531_v43 }
 0x12c   : > { %v1323_v42 = vpop.eup %1322  ;;  %887 = vst.msk [vmem:[%s1612_s18 + $0xc0] sm:$0xff] %vm862_vm1, %v1321_v41  ;;  %1342 = vpow2.f32 %v1051_v37  ;;  %v1149_v47 = vpop.f32.mrb[25].mxu0  ;;  %v612_v52 = vadd.f32 %v1592_v28, %v611_v44 }
 0x12d   : > { %v1325_v45 = vpop.eup %1324  ;;  %888 = vst.msk [vmem:[%s1612_s18 + $0xc8] sm:$0xff] %vm862_vm1, %v1323_v42  ;;  %1344 = vpow2.f32 %v1070_v38  ;;  %v1189_v48 = vpop.f32.mrb[25].mxu1  ;;  %v1052_v60 = vmul.f32 -1.442695, %v532_v46 }
 0x12e   : > { %v1327_v49 = vpop.eup %1326  ;;  %v756_v50 = vadd.f32 1.0, %v1325_v45  ;;  %1346 = vpow2.f32 %v1071_v40  ;;  %v534_v51 = vpop.f32.mrb[26].mxu0  ;;  %v1072_v3 = vmul.f32 -1.442695, %v612_v52 }
 0x12f   : > { %v614_v53 = vpop.f32.mrb[26].mxu1  ;;  %v1329_v54 = vpop.eup %1328  ;;  %v757_v55 = vadd.f32 1.0, %v1327_v49  ;;  %v535_v56 = vadd.f32 %v1592_v28, %v534_v51 }
 0x130   : > { %v1150_v57 = vpop.f32.mrb[27].mxu0  ;;  %v1331_v58 = vpop.eup %1330  ;;  %1348 = vrcp.f32 %v756_v50  ;;  %v776_v59 = vadd.f32 1.0, %v1329_v54  ;;  %v615_v61 = vadd.f32 %v1592_v28, %v614_v53 }
 0x131   : > { %v1190_v62 = vpop.f32.mrb[27].mxu1  ;;  %v1333_v63 = vpop.eup %1332  ;;  %1350 = vrcp.f32 %v757_v55  ;;  %v777_v0 = vadd.f32 1.0, %v1331_v58  ;;  %v1053_v1 = vmul.f32 -1.442695, %v535_v56 }
 0x132   : > { %v1335_v2 = vpop.eup %1334  ;;  %869 = vst.msk [vmem:[%s1612_s18 + $0x30] sm:$0xff] %vm862_vm1, %v1333_v63  ;;  %1352 = vrcp.f32 %v776_v59  ;;  %v1073_v5 = vmul.f32 -1.442695, %v615_v61  ;;  %v539_v7 = vpop.f32.mrb[28].mxu0 }
 0x133   : > { %v1337_v4 = vpop.eup %1336  ;;  %870 = vst.msk [vmem:[%s1612_s18 + $0x38] sm:$0xff] %vm862_vm1, %v1335_v2  ;;  %1354 = vrcp.f32 %v777_v0  ;;  %v619_v8 = vpop.f32.mrb[28].mxu1  ;;  %v540_v10 = vadd.f32 %v1592_v28, %v539_v7 }
 0x134   : > { %v1339_v6 = vpop.eup %1338  ;;  %889 = vst.msk [vmem:[%s1612_s18 + $0xd0] sm:$0xff] %vm862_vm1, %v1337_v4  ;;  %1356 = vpow2.f32 %v1052_v60  ;;  %v1153_v11 = vpop.f32.mrb[29].mxu0  ;;  %v620_v16 = vadd.f32 %v1592_v28, %v619_v8 }
 0x135   : > { %v1341_v9 = vpop.eup %1340  ;;  %890 = vst.msk [vmem:[%s1612_s18 + $0xd8] sm:$0xff] %vm862_vm1, %v1339_v6  ;;  %1358 = vpow2.f32 %v1053_v1  ;;  %v1193_v12 = vpop.f32.mrb[29].mxu1  ;;  %v1054_v25 = vmul.f32 -1.442695, %v540_v10 }
 0x136   : > { %v1343_v13 = vpop.eup %1342  ;;  %v758_v14 = vadd.f32 1.0, %v1341_v9  ;;  %1360 = vpow2.f32 %v1072_v3  ;;  %v542_v15 = vpop.f32.mrb[30].mxu0  ;;  %v1074_v31 = vmul.f32 -1.442695, %v620_v16 }
 0x137   : > { %v622_v17 = vpop.f32.mrb[30].mxu1  ;;  %v1345_v18 = vpop.eup %1344  ;;  %v759_v19 = vadd.f32 1.0, %v1343_v13  ;;  %1362 = vpow2.f32 %v1073_v5  ;;  %v543_v20 = vadd.f32 %v1592_v28, %v542_v15 }
 0x138   : > { %v1154_v21 = vpop.f32.mrb[31].mxu0  ;;  %v1194_v22 = vpop.f32.mrb[31].mxu1  ;;  %1364 = vrcp.f32 %v758_v14  ;;  %v778_v24 = vadd.f32 1.0, %v1345_v18  ;;  %v623_v26 = vadd.f32 %v1592_v28, %v622_v17 }
 0x139   : > { %v1347_v23 = vpop.eup %1346  ;;  %1366 = vrcp.f32 %v759_v19  ;;  %v1055_v29 = vmul.f32 -1.442695, %v543_v20 }
 0x13a   : > { %v779_v27 = vadd.f32 1.0, %v1347_v23  ;;  %v1349_v30 = vpop.eup %1348  ;;  %1368 = vrcp.f32 %v778_v24  ;;  %v1075_v33 = vmul.f32 -1.442695, %v623_v26  ;;  %v547_v35 = vpop.f32.mrb[32].mxu0 }
 0x13b   : > { %v1351_v32 = vpop.eup %1350  ;;  %871 = vst.msk [vmem:[%s1612_s18 + $0x40] sm:$0xff] %vm862_vm1, %v1349_v30  ;;  %v627_v36 = vpop.f32.mrb[32].mxu1  ;;  %v548_v38 = vadd.f32 %v1592_v28, %v547_v35 }
 0x13c   : > { %1370 = vrcp.f32 %v779_v27  ;;  %v1353_v34 = vpop.eup %1352  ;;  %872 = vst.msk [vmem:[%s1612_s18 + $0x48] sm:$0xff] %vm862_vm1, %v1351_v32  ;;  %v1157_v39 = vpop.f32.mrb[33].mxu0  ;;  %v628_v48 = vadd.f32 %v1592_v28, %v627_v36 }
 0x13d   : > { %1372 = vpow2.f32 %v1054_v25  ;;  %v1355_v37 = vpop.eup %1354  ;;  %891 = vst.msk [vmem:[%s1612_s18 + $0xe0] sm:$0xff] %vm862_vm1, %v1353_v34  ;;  %v1197_v40 = vpop.f32.mrb[33].mxu1  ;;  %v1056_v55 = vmul.f32 -1.442695, %v548_v38 }
 0x13e   : > { %1374 = vpow2.f32 %v1055_v29  ;;  %v1357_v41 = vpop.eup %1356  ;;  %892 = vst.msk [vmem:[%s1612_s18 + $0xe8] sm:$0xff] %vm862_vm1, %v1355_v37  ;;  %v550_v42 = vpop.f32.mrb[34].mxu0  ;;  %v1076_v60 = vmul.f32 -1.442695, %v628_v48 }
 0x13f   : > { %1376 = vpow2.f32 %v1074_v31  ;;  %v630_v43 = vpop.f32.mrb[34].mxu1  ;;  %v1359_v44 = vpop.eup %1358  ;;  %v760_v45 = vadd.f32 1.0, %v1357_v41  ;;  %v551_v46 = vadd.f32 %v1592_v28, %v550_v42 }
 0x140   : > { %1378 = vpow2.f32 %v1075_v33  ;;  %v1158_v47 = vpop.f32.mrb[35].mxu0  ;;  %v1198_v49 = vpop.f32.mrb[35].mxu1  ;;  %v761_v51 = vadd.f32 1.0, %v1359_v44  ;;  %v631_v52 = vadd.f32 %v1592_v28, %v630_v43 }
 0x141   : > { %v1361_v50 = vpop.eup %1360  ;;  %1380 = vrcp.f32 %v760_v45  ;;  %v1057_v58 = vmul.f32 -1.442695, %v551_v46 }
 0x142   : > { %v1363_v53 = vpop.eup %1362  ;;  %v780_v54 = vadd.f32 1.0, %v1361_v50  ;;  %1382 = vrcp.f32 %v761_v51  ;;  %v1077_v62 = vmul.f32 -1.442695, %v631_v52  ;;  %v555_v63 = vpop.f32.mrb[36].mxu0 }
 0x143   : > { %v1365_v56 = vpop.eup %1364  ;;  %v781_v57 = vadd.f32 1.0, %v1363_v53  ;;  %v556_v1 = vadd.f32 %v1592_v28, %v555_v63  ;;  %v1161_v2 = vpop.f32.mrb[37].mxu0 }
 0x144   : > { %v1367_v59 = vpop.eup %1366  ;;  %873 = vst.msk [vmem:[%s1612_s18 + $0x50] sm:$0xff] %vm862_vm1, %v1365_v56  ;;  %1384 = vrcp.f32 %v780_v54  ;;  %v558_v4 = vpop.f32.mrb[38].mxu0 }
 0x145   : > { %v1369_v61 = vpop.eup %1368  ;;  %874 = vst.msk [vmem:[%s1612_s18 + $0x58] sm:$0xff] %vm862_vm1, %v1367_v59  ;;  %1386 = vrcp.f32 %v781_v57  ;;  %v559_v7 = vadd.f32 %v1592_v28, %v558_v4  ;;  %v1162_v8 = vpop.f32.mrb[39].mxu0  ;;  %v1058_v13 = vmul.f32 -1.442695, %v556_v1 }
 0x146   : > { %v1371_v0 = vpop.eup %1370  ;;  %893 = vst.msk [vmem:[%s1612_s18 + $0xf0] sm:$0xff] %vm862_vm1, %v1369_v61  ;;  %1388 = vpow2.f32 %v1056_v55 }
 0x147   : > { %v1373_v3 = vpop.eup %1372  ;;  %894 = vst.msk [vmem:[%s1612_s18 + $0xf8] sm:$0xff] %vm862_vm1, %v1371_v0  ;;  %1390 = vpow2.f32 %v1057_v58  ;;  %v1059_v15 = vmul.f32 -1.442695, %v559_v7 }
 0x148   : > { %v1375_v5 = vpop.eup %1374  ;;  %v762_v6 = vadd.f32 1.0, %v1373_v3  ;;  %1392 = vpow2.f32 %v1076_v60 }
 0x149   : > { %v1377_v9 = vpop.eup %1376  ;;  %v763_v10 = vadd.f32 1.0, %v1375_v5  ;;  %1394 = vpow2.f32 %v1077_v62 }
 0x14a   : > { %v1379_v11 = vpop.eup %1378  ;;  %1396 = vrcp.f32 %v762_v6  ;;  %v782_v12 = vadd.f32 1.0, %v1377_v9 }
 0x14b   : > { %1398 = vrcp.f32 %v763_v10  ;;  %v783_v14 = vadd.f32 1.0, %v1379_v11  ;;  %v1381_v16 = vpop.eup %1380 }
 0x14c   : > { %1400 = vrcp.f32 %v782_v12  ;;  %v1383_v17 = vpop.eup %1382  ;;  %875 = vst.msk [vmem:[%s1612_s18 + $0x60] sm:$0xff] %vm862_vm1, %v1381_v16 }
 0x14d   : > { %1402 = vrcp.f32 %v783_v14  ;;  %876 = vst.msk [vmem:[%s1612_s18 + $0x68] sm:$0xff] %vm862_vm1, %v1383_v17 }
 0x14e   : > { %v1385_v28 = vpop.eup %1384  ;;  %1404 = vpow2.f32 %v1058_v13 }
 0x14f   : > { %v1387_v18 = vpop.eup %1386  ;;  %895 = vst.msk [vmem:[%s1612_s18 + $0x100] sm:$0xff] %vm862_vm1, %v1385_v28  ;;  %1406 = vpow2.f32 %v1059_v15 }
 0x150   : > { %v1389_v19 = vpop.eup %1388  ;;  %896 = vst.msk [vmem:[%s1612_s18 + $0x108] sm:$0xff] %vm862_vm1, %v1387_v18 }
 0x151   : > { %v1391_v20 = vpop.eup %1390  ;;  %v764_v21 = vadd.f32 1.0, %v1389_v19 }
 0x152   : > { %v1393_v22 = vpop.eup %1392  ;;  %v765_v23 = vadd.f32 1.0, %v1391_v20 }
 0x153   : > { %v1395_v24 = vpop.eup %1394  ;;  %1408 = vrcp.f32 %v764_v21  ;;  %v784_v25 = vadd.f32 1.0, %v1393_v22 }
 0x154   : > { %v1397_v26 = vpop.eup %1396  ;;  %1410 = vrcp.f32 %v765_v23  ;;  %v785_v27 = vadd.f32 1.0, %v1395_v24 }
 0x155   : > { %v1399_v29 = vpop.eup %1398  ;;  %877 = vst.msk [vmem:[%s1612_s18 + $0x70] sm:$0xff] %vm862_vm1, %v1397_v26  ;;  %1412 = vrcp.f32 %v784_v25 }
 0x156   : > { %v1401_v30 = vpop.eup %1400  ;;  %878 = vst.msk [vmem:[%s1612_s18 + $0x78] sm:$0xff] %vm862_vm1, %v1399_v29  ;;  %1414 = vrcp.f32 %v785_v27 }
 0x157   : > { %v1403_v31 = vpop.eup %1402  ;;  %897 = vst.msk [vmem:[%s1612_s18 + $0x110] sm:$0xff] %vm862_vm1, %v1401_v30 }
 0x158   : > { %v1405_v32 = vpop.eup %1404  ;;  %898 = vst.msk [vmem:[%s1612_s18 + $0x118] sm:$0xff] %vm862_vm1, %v1403_v31 }
 0x159   : > { %v1407_v33 = vpop.eup %1406  ;;  %v766_v34 = vadd.f32 1.0, %v1405_v32 }
 0x15a   : > { %v767_v35 = vadd.f32 1.0, %v1407_v33 }
 0x15b   : > { %1416 = vrcp.f32 %v766_v34 }
 0x15c   : > { %1418 = vrcp.f32 %v767_v35 }
 0x15d   : > { %v1409_v36 = vpop.eup %1408 }
 0x15e   : > { %v1411_v37 = vpop.eup %1410  ;;  %879 = vst.msk [vmem:[%s1612_s18 + $0x80] sm:$0xff] %vm862_vm1, %v1409_v36 }
 0x15f   : > { %v1413_v38 = vpop.eup %1412  ;;  %880 = vst.msk [vmem:[%s1612_s18 + $0x88] sm:$0xff] %vm862_vm1, %v1411_v37 }
 0x160   : > { %v1415_v39 = vpop.eup %1414  ;;  %899 = vst.msk [vmem:[%s1612_s18 + $0x120] sm:$0xff] %vm862_vm1, %v1413_v38 }
 0x161   : > { %900 = vst.msk [vmem:[%s1612_s18 + $0x128] sm:$0xff] %vm862_vm1, %v1415_v39 }
 0x165   : > { %v1417_v40 = vpop.eup %1416 }
 0x166   : > { %v1419_v41 = vpop.eup %1418  ;;  %881 = vst.msk [vmem:[%s1612_s18 + $0x90] sm:$0xff] %vm862_vm1, %v1417_v40 }
 0x167   : > { %882 = vst.msk [vmem:[%s1612_s18 + $0x98] sm:$0xff] %vm862_vm1, %v1419_v41 }
 0x168 PF: > { %s13_s14 = sadd.s32 1, %s1442_s14   ;;  %s1727_s12 = smov %s1438_s13 }
 0x169   : > { %p10_p5 = scmp.ge.s32.totalorder %s13_s14, 4   ;;  %s1728_s13 = smov %s1730_s15 }
 0x16b   :  { %12 = sbr.rel (!%p10_p5) target bundleno = 2 (0x2), region = 68 }

</bundles_post_ra>
